<compile_context>
chip_gen: v7x
topology: tpu7x:2x2x1
jax: 0.10.0
libtpu: 0.0.40
codegen_flags: <defaults>
</compile_context>

<pallas_src>
import functools

import jax
import jax.numpy as jnp
from jax.experimental import pallas as pl
from jax.experimental.pallas import tpu as pltpu


# MXU operand dtype; accumulation / elementwise epilogue are always f32.
_MXU_DTYPE = jnp.bfloat16


def _round_up(x, m):
    return (x + m - 1) // m * m


def _sublane_pack(dtype):
    # bf16 packs 16 rows per vreg tile, f32 packs 8.
    return 16 if jnp.dtype(dtype).itemsize == 2 else 8


def _cin_padded(n_feats):
    return _round_up(n_feats, _sublane_pack(_MXU_DTYPE))


# ----------------------------------------------------------------------------
# In-kernel helpers
# ----------------------------------------------------------------------------
def _guard_mask(H, W, Wp):
    """(1, H*Wp) mask: True on real image columns, False on the guard columns."""
    lane = jax.lax.broadcasted_iota(jnp.int32, (1, H * Wp), 1)
    return (lane % Wp) < W


def _zero_pads(sbuf, col, *, pad, HWp, cin, cin_p):
    """Zero the top/bottom halos of the line buffer and the per-tap channel
    padding rows of the im2col scratch.  Interiors are fully overwritten by
    every conv, so they are never zeroed.  Cost is O(pad) lanes per step."""
    z = jnp.zeros((sbuf.shape[0], pad), sbuf.dtype)
    sbuf[:, pl.ds(0, pad)] = z
    sbuf[:, pl.ds(pad + HWp, pad)] = z
    if cin_p != cin:
        zc = jnp.zeros((cin_p - cin, HWp), col.dtype)
        for t in range(9):
            col[pl.ds(t * cin_p + cin, cin_p - cin), :] = zc


def _conv3x3(sbuf, col, gmask, x, w, b, *, Wp, pad, HWp, cin, cin_p, relu=False):
    """3x3 same-padded conv in lane-dense (C, H*Wp) guard-column layout.

    sbuf : (cin, 2*pad + HWp) _MXU_DTYPE line buffer; halos are zero.
    col  : (9*cin_p, HWp) _MXU_DTYPE im2col scratch; channel-pad rows are zero.
    x    : (cin, HWp) activation (guard columns may be dirty).
    w    : (Cout, 9*cin_p) weight, tap-major / channel-minor K order.
    b    : (Cout, 1) f32 bias.         Returns (Cout, HWp) f32.
    """
    # Single select per conv: re-zero the guard columns, cast once to bf16.
    xb = jnp.where(gmask, x, 0.0).astype(sbuf.dtype)
    sbuf[:, pl.ds(pad, HWp)] = xb
    t = 0
    for dy in (-1, 0, 1):
        for dx in (-1, 0, 1):
            if dy == 0 and dx == 0:
                col[pl.ds(t * cin_p, cin), :] = xb
            else:
                # Shifted lane slice of the line buffer: zero halos give the
                # top/bottom padding, zero guard columns give left/right.
                col[pl.ds(t * cin_p, cin), :] = sbuf[:, pl.ds(pad + dy * Wp + dx, HWp)]
            t += 1
    # TODO(synk): benchmark the transposed (HWp, 9*cin_p)@(9*cin_p, Cout)
    #             orientation for better MXU row fill when Cout < 128.
    acc = jnp.dot(w, col[...], preferred_element_type=jnp.float32) + b
    if relu:
        acc = jnp.maximum(acc, 0.0)
    return acc


# ----------------------------------------------------------------------------
# Stage A: sub_mean -> head -> ResBlocks -> body conv (+skip) -> upsampler conv
# ----------------------------------------------------------------------------
def _make_stage_a_kernel(n_resblocks, H, W, res_scale, pad, cin_p):
    Wp = W + 2
    HWp = H * Wp

    def kernel(x_ref, sub_ref, head_w, head_b, blk_w, blk_b,
               body_w, body_b, up_w, up_b, o_ref, sbuf, col):
        F = sbuf.shape[0]
        _zero_pads(sbuf, col, pad=pad, HWp=HWp, cin=F, cin_p=cin_p)
        gmask = _guard_mask(H, W, Wp)
        conv = functools.partial(_conv3x3, sbuf, col, gmask,
                                 Wp=Wp, pad=pad, HWp=HWp, cin=F, cin_p=cin_p)

        # sub_mean (MeanShift, sign=-1, unit std) == per-channel subtraction.
        x = x_ref[0] - sub_ref[...]
        a = conv(x, head_w[...], head_b[...])                       # head

        res = a
        for l in range(n_resblocks):                                # ResBlocks
            h = conv(res, blk_w[l, 0], blk_b[l, 0], relu=True)
            h = conv(h, blk_w[l, 1], blk_b[l, 1])
            res = h * res_scale + res
        res = conv(res, body_w[...], body_b[...]) + a               # body + skip

        up = conv(res, up_w[...], up_b[...])                        # upsampler conv
        o_ref[0] = up.astype(o_ref.dtype)                           # bf16 out

    return kernel


# ----------------------------------------------------------------------------
# Stage B: tail conv -> add_mean
# ----------------------------------------------------------------------------
def _make_stage_b_kernel(H2, W2, pad, cin_p):
    Wp2 = W2 + 2
    HWp2 = H2 * Wp2

    def kernel(y_ref, add_ref, tail_w, tail_b, o_ref, sbuf, col):
        F = sbuf.shape[0]
        _zero_pads(sbuf, col, pad=pad, HWp=HWp2, cin=F, cin_p=cin_p)
        gmask = _guard_mask(H2, W2, Wp2)
        out = _conv3x3(sbuf, col, gmask, y_ref[0], tail_w[...], tail_b[...],
                       Wp=Wp2, pad=pad, HWp=HWp2, cin=F, cin_p=cin_p)
        o_ref[0] = (out + add_ref[...]).astype(o_ref.dtype)

    return kernel


# ----------------------------------------------------------------------------
# Parameter construction (deterministic synthetic init) and kernel repacking
# ----------------------------------------------------------------------------
def init_edsr_params(key, *, n_resblocks, n_feats, n_colors, scale):
    assert scale == 2, "Upsampler implemented for scale=2 (conv + PixelShuffle(2))"

    def winit(k, shape, s=0.05):
        return (jax.random.normal(k, shape) * s).astype(jnp.float32)

    keys = iter(jax.random.split(key, 10 + 4 * n_resblocks))
    p = {}
    p["head_w"] = winit(next(keys), (3, 3, n_colors, n_feats))
    p["head_b"] = winit(next(keys), (n_feats,))
    p["blocks"] = []
    for _ in range(n_resblocks):
        w1 = winit(next(keys), (3, 3, n_feats, n_feats))
        b1 = winit(next(keys), (n_feats,))
        w2 = winit(next(keys), (3, 3, n_feats, n_feats))
        b2 = winit(next(keys), (n_feats,))
        p["blocks"].append((w1, b1, w2, b2))
    p["body_w"] = winit(next(keys), (3, 3, n_feats, n_feats))
    p["body_b"] = winit(next(keys), (n_feats,))
    p["up_w"] = winit(next(keys), (3, 3, n_feats, 4 * n_feats))
    p["up_b"] = winit(next(keys), (4 * n_feats,))
    p["tail_w"] = winit(next(keys), (3, 3, n_feats, n_colors))
    p["tail_b"] = winit(next(keys), (n_colors,))
    return p


def _to_mxu_weight(w, cin_p):
    """(KH,KW,Cin,Cout) -> (Cout, KH*KW*cin_p); channels zero-padded to cin_p,
    K ordered tap-major / channel-minor (matches the in-kernel im2col)."""
    KH, KW, Cin, Cout = w.shape
    w = jnp.pad(w, ((0, 0), (0, 0), (0, cin_p - Cin), (0, 0)))
    return w.reshape(KH * KW * cin_p, Cout).T.astype(_MXU_DTYPE)


def _to_bias(b):
    return b.reshape(-1, 1).astype(jnp.float32)


def prepare_params(p, *, n_feats, n_colors, rgb_range):
    """Repack conceptual params into the kernels' lane-dense MXU layout."""
    F = n_feats
    cin_p = _cin_padded(F)
    rgb_mean = jnp.array([0.4488, 0.4371, 0.4040], jnp.float32)
    shift = rgb_range * rgb_mean
    kp = {}
    # MeanShift (identity weight, unit std) reduces to per-channel +- shift.
    kp["sub_v"] = jnp.concatenate(
        [shift, jnp.zeros((F - n_colors,), jnp.float32)]).reshape(F, 1)
    kp["add_v"] = shift.reshape(n_colors, 1)
    kp["head_w"] = _to_mxu_weight(p["head_w"], cin_p)
    kp["head_b"] = _to_bias(p["head_b"])
    # Stack all ResBlock weights/biases into single arrays (one DMA buffer).
    kp["blocks_w"] = jnp.stack(
        [jnp.stack([_to_mxu_weight(w1, cin_p), _to_mxu_weight(w2, cin_p)])
         for (w1, _b1, w2, _b2) in p["blocks"]])               # (L, 2, F, 9*cin_p)
    kp["blocks_b"] = jnp.stack(
        [jnp.stack([_to_bias(b1), _to_bias(b2)])
         for (_w1, b1, _w2, b2) in p["blocks"]])                # (L, 2, F, 1)
    kp["body_w"] = _to_mxu_weight(p["body_w"], cin_p)
    kp["body_b"] = _to_bias(p["body_b"])
    kp["up_w"] = _to_mxu_weight(p["up_w"], cin_p)
    kp["up_b"] = _to_bias(p["up_b"])
    kp["tail_w"] = _to_mxu_weight(p["tail_w"], cin_p)
    kp["tail_b"] = _to_bias(p["tail_b"])
    return kp


# ----------------------------------------------------------------------------
# EDSR forward (matches the PyTorch module's forward semantics)
# ----------------------------------------------------------------------------
def edsr_forward(x_nchw, kp, *, n_feats, n_colors, n_resblocks, scale, res_scale):
    assert scale == 2
    N, C, H, W = x_nchw.shape
    assert C == n_colors and n_feats >= n_colors and n_resblocks >= 1
    F = n_feats
    cin_p = _cin_padded(F)
    mxu_bytes = jnp.dtype(_MXU_DTYPE).itemsize

    Wp = W + 2                          # +2 zero guard columns per image row
    HWp = H * Wp
    pad_a = _round_up(Wp + 1, 128)      # halo sized per stage (fixes W>=64 OOB)
    H2, W2 = scale * H, scale * W
    Wp2 = W2 + 2
    HWp2 = H2 * Wp2
    pad_b = _round_up(Wp2 + 1, 128)

    # Lane-dense (C, H*Wp) layout with zero guard columns; channels padded to F.
    # TODO(synk): at large n_feats keep the head input at n_colors channels
    #             instead of padding to F (saves HBM read + input-block VMEM).
    x = x_nchw.astype(jnp.float32)
    x = jnp.pad(x, ((0, 0), (0, F - C), (0, 0), (0, 2))).reshape(N, F, HWp)

    def wspec(arr):
        nd = arr.ndim
        return pl.BlockSpec(arr.shape, lambda n, _nd=nd: (0,) * _nd)

    def vmem_limit(block_bytes, scratch_bytes):
        # Explicit budget: double-buffered blocks + scratch, 2x headroom,
        # never below the 32 MiB default, capped well under 128 MiB.
        need = 2 * block_bytes + scratch_bytes
        return int(min(max(2 * need, 32 << 20), 112 << 20))

    # ---- Stage A (fused): sub_mean + head + ResBlocks + body conv(+skip) + up conv.
    a_consts = [kp["sub_v"], kp["head_w"], kp["head_b"], kp["blocks_w"],
                kp["blocks_b"], kp["body_w"], kp["body_b"], kp["up_w"], kp["up_b"]]
    a_specs = ([pl.BlockSpec((1, F, HWp), lambda n: (n, 0, 0))]
               + [wspec(a) for a in a_consts])
    a_scratch = [pltpu.VMEM((F, 2 * pad_a + HWp), _MXU_DTYPE),     # line buffer
                 pltpu.VMEM((9 * cin_p, HWp), _MXU_DTYPE)]         # im2col
    a_block_bytes = (F * HWp * 4 + 4 * F * HWp * mxu_bytes
                     + sum(int(a.size) * a.dtype.itemsize for a in a_consts))
    a_scratch_bytes = (F * (2 * pad_a + HWp) + 9 * cin_p * HWp) * mxu_bytes

    up = pl.pallas_call(
        _make_stage_a_kernel(n_resblocks, H, W, float(res_scale), pad_a, cin_p),
        out_shape=jax.ShapeDtypeStruct((N, 4 * F, HWp), _MXU_DTYPE),
        grid=(N,),
        in_specs=a_specs,
        out_specs=pl.BlockSpec((1, 4 * F, HWp), lambda n: (n, 0, 0)),
        scratch_shapes=a_scratch,
        compiler_params=pltpu.CompilerParams(
            dimension_semantics=("parallel",),
            vmem_limit_bytes=vmem_limit(a_block_bytes, a_scratch_bytes)),
    )(x, *a_consts)

    # ---- PixelShuffle(2): pure data movement between the two fused kernels (bf16).
    y = up.reshape(N, 4 * F, H, Wp)[..., :W]                 # drop guard columns
    y = y.reshape(N, F, scale, scale, H, W)
    y = jnp.transpose(y, (0, 1, 4, 2, 5, 3)).reshape(N, F, H2, W2)
    y = jnp.pad(y, ((0, 0), (0, 0), (0, 0), (0, 2))).reshape(N, F, HWp2)

    # ---- Stage B (fused): tail conv + add_mean.
    b_consts = [kp["add_v"], kp["tail_w"], kp["tail_b"]]
    b_specs = ([pl.BlockSpec((1, F, HWp2), lambda n: (n, 0, 0))]
               + [wspec(a) for a in b_consts])
    b_scratch = [pltpu.VMEM((F, 2 * pad_b + HWp2), _MXU_DTYPE),
                 pltpu.VMEM((9 * cin_p, HWp2), _MXU_DTYPE)]
    b_block_bytes = (F * HWp2 * mxu_bytes + n_colors * HWp2 * 4
                     + sum(int(a.size) * a.dtype.itemsize for a in b_consts))
    b_scratch_bytes = (F * (2 * pad_b + HWp2) + 9 * cin_p * HWp2) * mxu_bytes

    out = pl.pallas_call(
        _make_stage_b_kernel(H2, W2, pad_b, cin_p),
        out_shape=jax.ShapeDtypeStruct((N, n_colors, HWp2), jnp.float32),
        grid=(N,),
        in_specs=b_specs,
        out_specs=pl.BlockSpec((1, n_colors, HWp2), lambda n: (n, 0, 0)),
        scratch_shapes=b_scratch,
        compiler_params=pltpu.CompilerParams(
            dimension_semantics=("parallel",),
            vmem_limit_bytes=vmem_limit(b_block_bytes, b_scratch_bytes)),
    )(y, *b_consts)

    # Drop guard columns; NCHW output like the PyTorch module.
    return out.reshape(N, n_colors, H2, Wp2)[..., :W2]


# ----------------------------------------------------------------------------
# Pure-JAX reference (for a loose numerical sanity check against bf16 MXU)
# ----------------------------------------------------------------------------
def edsr_reference(x, p, *, res_scale, rgb_range, scale):
    mean = (rgb_range * jnp.array([0.4488, 0.4371, 0.4040], jnp.float32)
            ).reshape(1, -1, 1, 1)

    def conv(z, w, b):
        return jax.lax.conv_general_dilated(
            z, w, (1, 1), "SAME",
            dimension_numbers=("NCHW", "HWIO", "NCHW")) + b.reshape(1, -1, 1, 1)

    z = x - mean
    a = conv(z, p["head_w"], p["head_b"])
    res = a
    for (w1, b1, w2, b2) in p["blocks"]:
        h = jnp.maximum(conv(res, w1, b1), 0.0)
        h = conv(h, w2, b2)
        res = h * res_scale + res
    res = conv(res, p["body_w"], p["body_b"]) + a
    up = conv(res, p["up_w"], p["up_b"])
    N, C4, H, W = up.shape
    F = C4 // (scale * scale)
    y = up.reshape(N, F, scale, scale, H, W)
    y = jnp.transpose(y, (0, 1, 4, 2, 5, 3)).reshape(N, F, scale * H, scale * W)
    return conv(y, p["tail_w"], p["tail_b"]) + mean


if __name__ == "__main__":
    # Small config consistent with the module's constructor.
    N_RESBLOCKS = 2
    N_FEATS = 8
    SCALE = 2
    N_COLORS = 3
    RES_SCALE = 0.1
    RGB_RANGE = 255.0

    key = jax.random.PRNGKey(0)
    k_params, k_x = jax.random.split(key)

    raw = init_edsr_params(k_params, n_resblocks=N_RESBLOCKS, n_feats=N_FEATS,
                           n_colors=N_COLORS, scale=SCALE)
    kp = prepare_params(raw, n_feats=N_FEATS, n_colors=N_COLORS,
                        rgb_range=RGB_RANGE)

    # Input in PyTorch NCHW layout, values in [0, rgb_range].
    x = jax.random.uniform(k_x, (2, N_COLORS, 16, 16), jnp.float32) * RGB_RANGE

    fwd = jax.jit(functools.partial(
        edsr_forward, n_feats=N_FEATS, n_colors=N_COLORS,
        n_resblocks=N_RESBLOCKS, scale=SCALE, res_scale=RES_SCALE))
    out = jax.block_until_ready(fwd(x, kp))

    assert out.shape == (2, N_COLORS, 16 * SCALE, 16 * SCALE), out.shape
    assert bool(jnp.all(jnp.isfinite(out)))

    # Loose check vs f32 XLA reference (bf16 MXU operands cause small drift).
    ref = edsr_reference(x, raw, res_scale=RES_SCALE, rgb_range=RGB_RANGE,
                         scale=SCALE)
    err = float(jnp.max(jnp.abs(out - ref)))
    assert err < 2.0, f"max abs error vs reference too large: {err}"

    print("KERNEL_OK")
</pallas_src>

<mosaic_0001>
module attributes {stable_mosaic.version = 11 : i64} {
  func.func @kernel(%arg0: i32, %arg1: memref<1x8x288xf32, #tpu.memory_space<vmem>>, %arg2: memref<8x1xf32, #tpu.memory_space<vmem>>, %arg3: memref<8x144xbf16, #tpu.memory_space<vmem>>, %arg4: memref<8x1xf32, #tpu.memory_space<vmem>>, %arg5: memref<2x2x8x144xbf16, #tpu.memory_space<vmem>>, %arg6: memref<2x2x8x1xf32, #tpu.memory_space<vmem>>, %arg7: memref<8x144xbf16, #tpu.memory_space<vmem>>, %arg8: memref<8x1xf32, #tpu.memory_space<vmem>>, %arg9: memref<32x144xbf16, #tpu.memory_space<vmem>>, %arg10: memref<32x1xf32, #tpu.memory_space<vmem>>, %arg11: memref<1x32x288xbf16, #tpu.memory_space<vmem>>, %arg12: memref<8x544xbf16, #tpu.memory_space<vmem>>, %arg13: memref<144x288xbf16, #tpu.memory_space<vmem>>) attributes {dimension_semantics = [#tpu.dimension_semantics<parallel>], iteration_bounds = array<i64: 2>, scalar_prefetch = 0 : i64, scratch_operands = 2 : i64, tpu.core_type = #tpu.core_type<tc>, window_params = [{transform_indices = @transform_0, window_bounds = array<i64: 1, 8, 288>}, {pipeline_mode = #tpu.pipeline_mode<synchronous>, transform_indices = @transform_1, window_bounds = array<i64: 8, 1>}, {pipeline_mode = #tpu.pipeline_mode<synchronous>, transform_indices = @transform_2, window_bounds = array<i64: 8, 144>}, {pipeline_mode = #tpu.pipeline_mode<synchronous>, transform_indices = @transform_3, window_bounds = array<i64: 8, 1>}, {pipeline_mode = #tpu.pipeline_mode<synchronous>, transform_indices = @transform_4, window_bounds = array<i64: 2, 2, 8, 144>}, {pipeline_mode = #tpu.pipeline_mode<synchronous>, transform_indices = @transform_5, window_bounds = array<i64: 2, 2, 8, 1>}, {pipeline_mode = #tpu.pipeline_mode<synchronous>, transform_indices = @transform_6, window_bounds = array<i64: 8, 144>}, {pipeline_mode = #tpu.pipeline_mode<synchronous>, transform_indices = @transform_7, window_bounds = array<i64: 8, 1>}, {pipeline_mode = #tpu.pipeline_mode<synchronous>, transform_indices = @transform_8, window_bounds = array<i64: 32, 144>}, {pipeline_mode = #tpu.pipeline_mode<synchronous>, transform_indices = @transform_9, window_bounds = array<i64: 32, 1>}, {transform_indices = @transform_10, window_bounds = array<i64: 1, 32, 288>}]} {
    %cst = arith.constant 0.000000e+00 : bf16
    %0 = vector.broadcast %cst : bf16 to vector<8x128xbf16>
    %c0 = arith.constant 0 : index
    %c0_0 = arith.constant 0 : index
    %1 = vector.load %arg12[%c0, %c0_0] : memref<8x544xbf16, #tpu.memory_space<vmem>>, vector<8x128xbf16>
    tpu.vector_store %arg12[%c0, %c0_0], %0 {strides = array<i32>} : memref<8x544xbf16, #tpu.memory_space<vmem>>, vector<8x128xbf16>,
    %c0_1 = arith.constant 0 : index
    %c416 = arith.constant 416 : index
    %2 = vector.load %arg12[%c0_1, %c416] : memref<8x544xbf16, #tpu.memory_space<vmem>>, vector<8x128xbf16>
    tpu.vector_store %arg12[%c0_1, %c416], %0 {strides = array<i32>} : memref<8x544xbf16, #tpu.memory_space<vmem>>, vector<8x128xbf16>,
    %cst_2 = arith.constant 0.000000e+00 : bf16
    %3 = vector.broadcast %cst_2 : bf16 to vector<8x288xbf16>
    %c8 = arith.constant 8 : index
    %c0_3 = arith.constant 0 : index
    %4 = vector.load %arg13[%c8, %c0_3] : memref<144x288xbf16, #tpu.memory_space<vmem>>, vector<8x288xbf16>
    tpu.vector_store %arg13[%c8, %c0_3], %3 {strides = array<i32>} : memref<144x288xbf16, #tpu.memory_space<vmem>>, vector<8x288xbf16>,
    %c24 = arith.constant 24 : index
    %c0_4 = arith.constant 0 : index
    %5 = vector.load %arg13[%c24, %c0_4] : memref<144x288xbf16, #tpu.memory_space<vmem>>, vector<8x288xbf16>
    tpu.vector_store %arg13[%c24, %c0_4], %3 {strides = array<i32>} : memref<144x288xbf16, #tpu.memory_space<vmem>>, vector<8x288xbf16>,
    %c40 = arith.constant 40 : index
    %c0_5 = arith.constant 0 : index
    %6 = vector.load %arg13[%c40, %c0_5] : memref<144x288xbf16, #tpu.memory_space<vmem>>, vector<8x288xbf16>
    tpu.vector_store %arg13[%c40, %c0_5], %3 {strides = array<i32>} : memref<144x288xbf16, #tpu.memory_space<vmem>>, vector<8x288xbf16>,
    %c56 = arith.constant 56 : index
    %c0_6 = arith.constant 0 : index
    %7 = vector.load %arg13[%c56, %c0_6] : memref<144x288xbf16, #tpu.memory_space<vmem>>, vector<8x288xbf16>
    tpu.vector_store %arg13[%c56, %c0_6], %3 {strides = array<i32>} : memref<144x288xbf16, #tpu.memory_space<vmem>>, vector<8x288xbf16>,
    %c72 = arith.constant 72 : index
    %c0_7 = arith.constant 0 : index
    %8 = vector.load %arg13[%c72, %c0_7] : memref<144x288xbf16, #tpu.memory_space<vmem>>, vector<8x288xbf16>
    tpu.vector_store %arg13[%c72, %c0_7], %3 {strides = array<i32>} : memref<144x288xbf16, #tpu.memory_space<vmem>>, vector<8x288xbf16>,
    %c88 = arith.constant 88 : index
    %c0_8 = arith.constant 0 : index
    %9 = vector.load %arg13[%c88, %c0_8] : memref<144x288xbf16, #tpu.memory_space<vmem>>, vector<8x288xbf16>
    tpu.vector_store %arg13[%c88, %c0_8], %3 {strides = array<i32>} : memref<144x288xbf16, #tpu.memory_space<vmem>>, vector<8x288xbf16>,
    %c104 = arith.constant 104 : index
    %c0_9 = arith.constant 0 : index
    %10 = vector.load %arg13[%c104, %c0_9] : memref<144x288xbf16, #tpu.memory_space<vmem>>, vector<8x288xbf16>
    tpu.vector_store %arg13[%c104, %c0_9], %3 {strides = array<i32>} : memref<144x288xbf16, #tpu.memory_space<vmem>>, vector<8x288xbf16>,
    %c120 = arith.constant 120 : index
    %c0_10 = arith.constant 0 : index
    %11 = vector.load %arg13[%c120, %c0_10] : memref<144x288xbf16, #tpu.memory_space<vmem>>, vector<8x288xbf16>
    tpu.vector_store %arg13[%c120, %c0_10], %3 {strides = array<i32>} : memref<144x288xbf16, #tpu.memory_space<vmem>>, vector<8x288xbf16>,
    %c136 = arith.constant 136 : index
    %c0_11 = arith.constant 0 : index
    %12 = vector.load %arg13[%c136, %c0_11] : memref<144x288xbf16, #tpu.memory_space<vmem>>, vector<8x288xbf16>
    tpu.vector_store %arg13[%c136, %c0_11], %3 {strides = array<i32>} : memref<144x288xbf16, #tpu.memory_space<vmem>>, vector<8x288xbf16>,
    %13 = tpu.iota {dimensions = array<i32: 1>} : vector<1x288xi32>
    %c18_i32 = arith.constant 18 : i32
    %c0_i32 = arith.constant 0 : i32
    %14 = arith.cmpi eq, %c18_i32, %c0_i32 : i32
    %c1_i32 = arith.constant 1 : i32
    %15 = arith.select %14, %c1_i32, %c18_i32 : i32
    %16 = vector.broadcast %15 : i32 to vector<1x288xi32>
    %17 = arith.remsi %13, %16 : vector<1x288xi32>
    %c0_i32_12 = arith.constant 0 : i32
    %18 = vector.broadcast %c0_i32_12 : i32 to vector<1x288xi32>
    %19 = arith.cmpi ne, %17, %18 : vector<1x288xi32>
    %c0_i32_13 = arith.constant 0 : i32
    %20 = vector.broadcast %c0_i32_13 : i32 to vector<1x288xi32>
    %21 = arith.cmpi slt, %17, %20 : vector<1x288xi32>
    %c0_i32_14 = arith.constant 0 : i32
    %22 = arith.cmpi slt, %15, %c0_i32_14 : i32
    %23 = vector.broadcast %22 : i1 to vector<1x288xi1>
    %24 = vector.broadcast %23 : vector<1x288xi1> to vector<1x288xi1>
    %25 = arith.xori %21, %24 : vector<1x288xi1>
    %26 = arith.andi %25, %19 : vector<1x288xi1>
    %27 = vector.broadcast %15 : i32 to vector<1x288xi32>
    %28 = arith.addi %17, %27 : vector<1x288xi32>
    %29 = arith.select %26, %28, %17 : vector<1x288xi1>, vector<1x288xi32>
    %c16_i32 = arith.constant 16 : i32
    %30 = vector.broadcast %c16_i32 : i32 to vector<1x288xi32>
    %31 = arith.cmpi slt, %29, %30 : vector<1x288xi32>
    %c0_15 = arith.constant 0 : index
    %c0_16 = arith.constant 0 : index
    %c0_17 = arith.constant 0 : index
    %32 = vector.load %arg1[%c0_15, %c0_16, %c0_17] : memref<1x8x288xf32, #tpu.memory_space<vmem>>, vector<1x8x288xf32>
    %33 = vector.shape_cast %32 : vector<1x8x288xf32> to vector<8x288xf32>
    %c0_18 = arith.constant 0 : index
    %c0_19 = arith.constant 0 : index
    %34 = vector.load %arg2[%c0_18, %c0_19] : memref<8x1xf32, #tpu.memory_space<vmem>>, vector<8x1xf32>
    %35 = vector.broadcast %34 : vector<8x1xf32> to vector<8x288xf32>
    %36 = arith.subf %33, %35 : vector<8x288xf32>
    %c0_20 = arith.constant 0 : index
    %c0_21 = arith.constant 0 : index
    %37 = vector.load %arg3[%c0_20, %c0_21] : memref<8x144xbf16, #tpu.memory_space<vmem>>, vector<8x144xbf16>
    %c0_22 = arith.constant 0 : index
    %c0_23 = arith.constant 0 : index
    %38 = vector.load %arg4[%c0_22, %c0_23] : memref<8x1xf32, #tpu.memory_space<vmem>>, vector<8x1xf32>
    %cst_24 = arith.constant 0.000000e+00 : f32
    %39 = vector.shape_cast %31 : vector<1x288xi1> to vector<1x288xi1>
    %40 = vector.broadcast %39 : vector<1x288xi1> to vector<8x288xi1>
    %41 = vector.broadcast %cst_24 : f32 to vector<8x288xf32>
    %42 = arith.select %40, %36, %41 : vector<8x288xi1>, vector<8x288xf32>
    %43 = arith.truncf %42 : vector<8x288xf32> to vector<8x288xbf16>
    %c0_25 = arith.constant 0 : index
    %c128 = arith.constant 128 : index
    %44 = vector.load %arg12[%c0_25, %c128] : memref<8x544xbf16, #tpu.memory_space<vmem>>, vector<8x288xbf16>
    tpu.vector_store %arg12[%c0_25, %c128], %43 {strides = array<i32>} : memref<8x544xbf16, #tpu.memory_space<vmem>>, vector<8x288xbf16>,
    %c0_26 = arith.constant 0 : index
    %c109 = arith.constant 109 : index
    %45 = vector.load %arg12[%c0_26, %c109] : memref<8x544xbf16, #tpu.memory_space<vmem>>, vector<8x288xbf16>
    %c0_27 = arith.constant 0 : index
    %c0_28 = arith.constant 0 : index
    %46 = vector.load %arg13[%c0_27, %c0_28] : memref<144x288xbf16, #tpu.memory_space<vmem>>, vector<8x288xbf16>
    tpu.vector_store %arg13[%c0_27, %c0_28], %45 {strides = array<i32>} : memref<144x288xbf16, #tpu.memory_space<vmem>>, vector<8x288xbf16>,
    %c0_29 = arith.constant 0 : index
    %c110 = arith.constant 110 : index
    %47 = vector.load %arg12[%c0_29, %c110] : memref<8x544xbf16, #tpu.memory_space<vmem>>, vector<8x288xbf16>
    %c16 = arith.constant 16 : index
    %c0_30 = arith.constant 0 : index
    %48 = vector.load %arg13[%c16, %c0_30] : memref<144x288xbf16, #tpu.memory_space<vmem>>, vector<8x288xbf16>
    tpu.vector_store %arg13[%c16, %c0_30], %47 {strides = array<i32>} : memref<144x288xbf16, #tpu.memory_space<vmem>>, vector<8x288xbf16>,
    %c0_31 = arith.constant 0 : index
    %c111 = arith.constant 111 : index
    %49 = vector.load %arg12[%c0_31, %c111] : memref<8x544xbf16, #tpu.memory_space<vmem>>, vector<8x288xbf16>
    %c32 = arith.constant 32 : index
    %c0_32 = arith.constant 0 : index
    %50 = vector.load %arg13[%c32, %c0_32] : memref<144x288xbf16, #tpu.memory_space<vmem>>, vector<8x288xbf16>
    tpu.vector_store %arg13[%c32, %c0_32], %49 {strides = array<i32>} : memref<144x288xbf16, #tpu.memory_space<vmem>>, vector<8x288xbf16>,
    %c0_33 = arith.constant 0 : index
    %c127 = arith.constant 127 : index
    %51 = vector.load %arg12[%c0_33, %c127] : memref<8x544xbf16, #tpu.memory_space<vmem>>, vector<8x288xbf16>
    %c48 = arith.constant 48 : index
    %c0_34 = arith.constant 0 : index
    %52 = vector.load %arg13[%c48, %c0_34] : memref<144x288xbf16, #tpu.memory_space<vmem>>, vector<8x288xbf16>
    tpu.vector_store %arg13[%c48, %c0_34], %51 {strides = array<i32>} : memref<144x288xbf16, #tpu.memory_space<vmem>>, vector<8x288xbf16>,
    %c64 = arith.constant 64 : index
    %c0_35 = arith.constant 0 : index
    %53 = vector.load %arg13[%c64, %c0_35] : memref<144x288xbf16, #tpu.memory_space<vmem>>, vector<8x288xbf16>
    tpu.vector_store %arg13[%c64, %c0_35], %43 {strides = array<i32>} : memref<144x288xbf16, #tpu.memory_space<vmem>>, vector<8x288xbf16>,
    %c0_36 = arith.constant 0 : index
    %c129 = arith.constant 129 : index
    %54 = vector.load %arg12[%c0_36, %c129] : memref<8x544xbf16, #tpu.memory_space<vmem>>, vector<8x288xbf16>
    %c80 = arith.constant 80 : index
    %c0_37 = arith.constant 0 : index
    %55 = vector.load %arg13[%c80, %c0_37] : memref<144x288xbf16, #tpu.memory_space<vmem>>, vector<8x288xbf16>
    tpu.vector_store %arg13[%c80, %c0_37], %54 {strides = array<i32>} : memref<144x288xbf16, #tpu.memory_space<vmem>>, vector<8x288xbf16>,
    %c0_38 = arith.constant 0 : index
    %c145 = arith.constant 145 : index
    %56 = vector.load %arg12[%c0_38, %c145] : memref<8x544xbf16, #tpu.memory_space<vmem>>, vector<8x288xbf16>
    %c96 = arith.constant 96 : index
    %c0_39 = arith.constant 0 : index
    %57 = vector.load %arg13[%c96, %c0_39] : memref<144x288xbf16, #tpu.memory_space<vmem>>, vector<8x288xbf16>
    tpu.vector_store %arg13[%c96, %c0_39], %56 {strides = array<i32>} : memref<144x288xbf16, #tpu.memory_space<vmem>>, vector<8x288xbf16>,
    %c0_40 = arith.constant 0 : index
    %c146 = arith.constant 146 : index
    %58 = vector.load %arg12[%c0_40, %c146] : memref<8x544xbf16, #tpu.memory_space<vmem>>, vector<8x288xbf16>
    %c112 = arith.constant 112 : index
    %c0_41 = arith.constant 0 : index
    %59 = vector.load %arg13[%c112, %c0_41] : memref<144x288xbf16, #tpu.memory_space<vmem>>, vector<8x288xbf16>
    tpu.vector_store %arg13[%c112, %c0_41], %58 {strides = array<i32>} : memref<144x288xbf16, #tpu.memory_space<vmem>>, vector<8x288xbf16>,
    %c0_42 = arith.constant 0 : index
    %c147 = arith.constant 147 : index
    %60 = vector.load %arg12[%c0_42, %c147] : memref<8x544xbf16, #tpu.memory_space<vmem>>, vector<8x288xbf16>
    %c128_43 = arith.constant 128 : index
    %c0_44 = arith.constant 0 : index
    %61 = vector.load %arg13[%c128_43, %c0_44] : memref<144x288xbf16, #tpu.memory_space<vmem>>, vector<8x288xbf16>
    tpu.vector_store %arg13[%c128_43, %c0_44], %60 {strides = array<i32>} : memref<144x288xbf16, #tpu.memory_space<vmem>>, vector<8x288xbf16>,
    %c0_45 = arith.constant 0 : index
    %c0_46 = arith.constant 0 : index
    %62 = vector.load %arg13[%c0_45, %c0_46] : memref<144x288xbf16, #tpu.memory_space<vmem>>, vector<144x288xbf16>
    %cst_47 = arith.constant dense<0.000000e+00> : vector<8x288xf32>
    %63 = tpu.matmul %37, %62, %cst_47 {dimension_numbers = #tpu.dot_dimension_numbers<[1], [0], [0], [1], [0, 0, 1, 1], [], []>} : vector<8x144xbf16>, vector<144x288xbf16>, vector<8x288xf32> -> vector<8x288xf32>
    %64 = vector.broadcast %38 : vector<8x1xf32> to vector<8x288xf32>
    %65 = arith.addf %63, %64 : vector<8x288xf32>
    %c0_48 = arith.constant 0 : index
    %c0_49 = arith.constant 0 : index
    %c0_50 = arith.constant 0 : index
    %c0_51 = arith.constant 0 : index
    %66 = vector.load %arg5[%c0_48, %c0_49, %c0_50, %c0_51] : memref<2x2x8x144xbf16, #tpu.memory_space<vmem>>, vector<1x1x8x144xbf16>
    %67 = vector.shape_cast %66 : vector<1x1x8x144xbf16> to vector<8x144xbf16>
    %c0_52 = arith.constant 0 : index
    %c0_53 = arith.constant 0 : index
    %c0_54 = arith.constant 0 : index
    %c0_55 = arith.constant 0 : index
    %68 = vector.load %arg6[%c0_52, %c0_53, %c0_54, %c0_55] : memref<2x2x8x1xf32, #tpu.memory_space<vmem>>, vector<1x1x8x1xf32>
    %69 = vector.shape_cast %68 : vector<1x1x8x1xf32> to vector<8x1xf32>
    %cst_56 = arith.constant 0.000000e+00 : f32
    %70 = vector.shape_cast %31 : vector<1x288xi1> to vector<1x288xi1>
    %71 = vector.broadcast %70 : vector<1x288xi1> to vector<8x288xi1>
    %72 = vector.broadcast %cst_56 : f32 to vector<8x288xf32>
    %73 = arith.select %71, %65, %72 : vector<8x288xi1>, vector<8x288xf32>
    %74 = arith.truncf %73 : vector<8x288xf32> to vector<8x288xbf16>
    %c0_57 = arith.constant 0 : index
    %c128_58 = arith.constant 128 : index
    %75 = vector.load %arg12[%c0_57, %c128_58] : memref<8x544xbf16, #tpu.memory_space<vmem>>, vector<8x288xbf16>
    tpu.vector_store %arg12[%c0_57, %c128_58], %74 {strides = array<i32>} : memref<8x544xbf16, #tpu.memory_space<vmem>>, vector<8x288xbf16>,
    %c0_59 = arith.constant 0 : index
    %c109_60 = arith.constant 109 : index
    %76 = vector.load %arg12[%c0_59, %c109_60] : memref<8x544xbf16, #tpu.memory_space<vmem>>, vector<8x288xbf16>
    %c0_61 = arith.constant 0 : index
    %c0_62 = arith.constant 0 : index
    %77 = vector.load %arg13[%c0_61, %c0_62] : memref<144x288xbf16, #tpu.memory_space<vmem>>, vector<8x288xbf16>
    tpu.vector_store %arg13[%c0_61, %c0_62], %76 {strides = array<i32>} : memref<144x288xbf16, #tpu.memory_space<vmem>>, vector<8x288xbf16>,
    %c0_63 = arith.constant 0 : index
    %c110_64 = arith.constant 110 : index
    %78 = vector.load %arg12[%c0_63, %c110_64] : memref<8x544xbf16, #tpu.memory_space<vmem>>, vector<8x288xbf16>
    %c16_65 = arith.constant 16 : index
    %c0_66 = arith.constant 0 : index
    %79 = vector.load %arg13[%c16_65, %c0_66] : memref<144x288xbf16, #tpu.memory_space<vmem>>, vector<8x288xbf16>
    tpu.vector_store %arg13[%c16_65, %c0_66], %78 {strides = array<i32>} : memref<144x288xbf16, #tpu.memory_space<vmem>>, vector<8x288xbf16>,
    %c0_67 = arith.constant 0 : index
    %c111_68 = arith.constant 111 : index
    %80 = vector.load %arg12[%c0_67, %c111_68] : memref<8x544xbf16, #tpu.memory_space<vmem>>, vector<8x288xbf16>
    %c32_69 = arith.constant 32 : index
    %c0_70 = arith.constant 0 : index
    %81 = vector.load %arg13[%c32_69, %c0_70] : memref<144x288xbf16, #tpu.memory_space<vmem>>, vector<8x288xbf16>
    tpu.vector_store %arg13[%c32_69, %c0_70], %80 {strides = array<i32>} : memref<144x288xbf16, #tpu.memory_space<vmem>>, vector<8x288xbf16>,
    %c0_71 = arith.constant 0 : index
    %c127_72 = arith.constant 127 : index
    %82 = vector.load %arg12[%c0_71, %c127_72] : memref<8x544xbf16, #tpu.memory_space<vmem>>, vector<8x288xbf16>
    %c48_73 = arith.constant 48 : index
    %c0_74 = arith.constant 0 : index
    %83 = vector.load %arg13[%c48_73, %c0_74] : memref<144x288xbf16, #tpu.memory_space<vmem>>, vector<8x288xbf16>
    tpu.vector_store %arg13[%c48_73, %c0_74], %82 {strides = array<i32>} : memref<144x288xbf16, #tpu.memory_space<vmem>>, vector<8x288xbf16>,
    %c64_75 = arith.constant 64 : index
    %c0_76 = arith.constant 0 : index
    %84 = vector.load %arg13[%c64_75, %c0_76] : memref<144x288xbf16, #tpu.memory_space<vmem>>, vector<8x288xbf16>
    tpu.vector_store %arg13[%c64_75, %c0_76], %74 {strides = array<i32>} : memref<144x288xbf16, #tpu.memory_space<vmem>>, vector<8x288xbf16>,
    %c0_77 = arith.constant 0 : index
    %c129_78 = arith.constant 129 : index
    %85 = vector.load %arg12[%c0_77, %c129_78] : memref<8x544xbf16, #tpu.memory_space<vmem>>, vector<8x288xbf16>
    %c80_79 = arith.constant 80 : index
    %c0_80 = arith.constant 0 : index
    %86 = vector.load %arg13[%c80_79, %c0_80] : memref<144x288xbf16, #tpu.memory_space<vmem>>, vector<8x288xbf16>
    tpu.vector_store %arg13[%c80_79, %c0_80], %85 {strides = array<i32>} : memref<144x288xbf16, #tpu.memory_space<vmem>>, vector<8x288xbf16>,
    %c0_81 = arith.constant 0 : index
    %c145_82 = arith.constant 145 : index
    %87 = vector.load %arg12[%c0_81, %c145_82] : memref<8x544xbf16, #tpu.memory_space<vmem>>, vector<8x288xbf16>
    %c96_83 = arith.constant 96 : index
    %c0_84 = arith.constant 0 : index
    %88 = vector.load %arg13[%c96_83, %c0_84] : memref<144x288xbf16, #tpu.memory_space<vmem>>, vector<8x288xbf16>
    tpu.vector_store %arg13[%c96_83, %c0_84], %87 {strides = array<i32>} : memref<144x288xbf16, #tpu.memory_space<vmem>>, vector<8x288xbf16>,
    %c0_85 = arith.constant 0 : index
    %c146_86 = arith.constant 146 : index
    %89 = vector.load %arg12[%c0_85, %c146_86] : memref<8x544xbf16, #tpu.memory_space<vmem>>, vector<8x288xbf16>
    %c112_87 = arith.constant 112 : index
    %c0_88 = arith.constant 0 : index
    %90 = vector.load %arg13[%c112_87, %c0_88] : memref<144x288xbf16, #tpu.memory_space<vmem>>, vector<8x288xbf16>
    tpu.vector_store %arg13[%c112_87, %c0_88], %89 {strides = array<i32>} : memref<144x288xbf16, #tpu.memory_space<vmem>>, vector<8x288xbf16>,
    %c0_89 = arith.constant 0 : index
    %c147_90 = arith.constant 147 : index
    %91 = vector.load %arg12[%c0_89, %c147_90] : memref<8x544xbf16, #tpu.memory_space<vmem>>, vector<8x288xbf16>
    %c128_91 = arith.constant 128 : index
    %c0_92 = arith.constant 0 : index
    %92 = vector.load %arg13[%c128_91, %c0_92] : memref<144x288xbf16, #tpu.memory_space<vmem>>, vector<8x288xbf16>
    tpu.vector_store %arg13[%c128_91, %c0_92], %91 {strides = array<i32>} : memref<144x288xbf16, #tpu.memory_space<vmem>>, vector<8x288xbf16>,
    %c0_93 = arith.constant 0 : index
    %c0_94 = arith.constant 0 : index
    %93 = vector.load %arg13[%c0_93, %c0_94] : memref<144x288xbf16, #tpu.memory_space<vmem>>, vector<144x288xbf16>
    %cst_95 = arith.constant dense<0.000000e+00> : vector<8x288xf32>
    %94 = tpu.matmul %67, %93, %cst_95 {dimension_numbers = #tpu.dot_dimension_numbers<[1], [0], [0], [1], [0, 0, 1, 1], [], []>} : vector<8x144xbf16>, vector<144x288xbf16>, vector<8x288xf32> -> vector<8x288xf32>
    %95 = vector.broadcast %69 : vector<8x1xf32> to vector<8x288xf32>
    %96 = arith.addf %94, %95 : vector<8x288xf32>
    %cst_96 = arith.constant 0.000000e+00 : f32
    %97 = vector.broadcast %cst_96 : f32 to vector<8x288xf32>
    %98 = arith.maximumf %96, %97 : vector<8x288xf32>
    %c0_97 = arith.constant 0 : index
    %c1 = arith.constant 1 : index
    %c0_98 = arith.constant 0 : index
    %c0_99 = arith.constant 0 : index
    %99 = vector.load %arg5[%c0_97, %c1, %c0_98, %c0_99] : memref<2x2x8x144xbf16, #tpu.memory_space<vmem>>, vector<1x1x8x144xbf16>
    %100 = vector.shape_cast %99 : vector<1x1x8x144xbf16> to vector<8x144xbf16>
    %c0_100 = arith.constant 0 : index
    %c1_101 = arith.constant 1 : index
    %c0_102 = arith.constant 0 : index
    %c0_103 = arith.constant 0 : index
    %101 = vector.load %arg6[%c0_100, %c1_101, %c0_102, %c0_103] : memref<2x2x8x1xf32, #tpu.memory_space<vmem>>, vector<1x1x8x1xf32>
    %102 = vector.shape_cast %101 : vector<1x1x8x1xf32> to vector<8x1xf32>
    %cst_104 = arith.constant 0.000000e+00 : f32
    %103 = vector.shape_cast %31 : vector<1x288xi1> to vector<1x288xi1>
    %104 = vector.broadcast %103 : vector<1x288xi1> to vector<8x288xi1>
    %105 = vector.broadcast %cst_104 : f32 to vector<8x288xf32>
    %106 = arith.select %104, %98, %105 : vector<8x288xi1>, vector<8x288xf32>
    %107 = arith.truncf %106 : vector<8x288xf32> to vector<8x288xbf16>
    %c0_105 = arith.constant 0 : index
    %c128_106 = arith.constant 128 : index
    %108 = vector.load %arg12[%c0_105, %c128_106] : memref<8x544xbf16, #tpu.memory_space<vmem>>, vector<8x288xbf16>
    tpu.vector_store %arg12[%c0_105, %c128_106], %107 {strides = array<i32>} : memref<8x544xbf16, #tpu.memory_space<vmem>>, vector<8x288xbf16>,
    %c0_107 = arith.constant 0 : index
    %c109_108 = arith.constant 109 : index
    %109 = vector.load %arg12[%c0_107, %c109_108] : memref<8x544xbf16, #tpu.memory_space<vmem>>, vector<8x288xbf16>
    %c0_109 = arith.constant 0 : index
    %c0_110 = arith.constant 0 : index
    %110 = vector.load %arg13[%c0_109, %c0_110] : memref<144x288xbf16, #tpu.memory_space<vmem>>, vector<8x288xbf16>
    tpu.vector_store %arg13[%c0_109, %c0_110], %109 {strides = array<i32>} : memref<144x288xbf16, #tpu.memory_space<vmem>>, vector<8x288xbf16>,
    %c0_111 = arith.constant 0 : index
    %c110_112 = arith.constant 110 : index
    %111 = vector.load %arg12[%c0_111, %c110_112] : memref<8x544xbf16, #tpu.memory_space<vmem>>, vector<8x288xbf16>
    %c16_113 = arith.constant 16 : index
    %c0_114 = arith.constant 0 : index
    %112 = vector.load %arg13[%c16_113, %c0_114] : memref<144x288xbf16, #tpu.memory_space<vmem>>, vector<8x288xbf16>
    tpu.vector_store %arg13[%c16_113, %c0_114], %111 {strides = array<i32>} : memref<144x288xbf16, #tpu.memory_space<vmem>>, vector<8x288xbf16>,
    %c0_115 = arith.constant 0 : index
    %c111_116 = arith.constant 111 : index
    %113 = vector.load %arg12[%c0_115, %c111_116] : memref<8x544xbf16, #tpu.memory_space<vmem>>, vector<8x288xbf16>
    %c32_117 = arith.constant 32 : index
    %c0_118 = arith.constant 0 : index
    %114 = vector.load %arg13[%c32_117, %c0_118] : memref<144x288xbf16, #tpu.memory_space<vmem>>, vector<8x288xbf16>
    tpu.vector_store %arg13[%c32_117, %c0_118], %113 {strides = array<i32>} : memref<144x288xbf16, #tpu.memory_space<vmem>>, vector<8x288xbf16>,
    %c0_119 = arith.constant 0 : index
    %c127_120 = arith.constant 127 : index
    %115 = vector.load %arg12[%c0_119, %c127_120] : memref<8x544xbf16, #tpu.memory_space<vmem>>, vector<8x288xbf16>
    %c48_121 = arith.constant 48 : index
    %c0_122 = arith.constant 0 : index
    %116 = vector.load %arg13[%c48_121, %c0_122] : memref<144x288xbf16, #tpu.memory_space<vmem>>, vector<8x288xbf16>
    tpu.vector_store %arg13[%c48_121, %c0_122], %115 {strides = array<i32>} : memref<144x288xbf16, #tpu.memory_space<vmem>>, vector<8x288xbf16>,
    %c64_123 = arith.constant 64 : index
    %c0_124 = arith.constant 0 : index
    %117 = vector.load %arg13[%c64_123, %c0_124] : memref<144x288xbf16, #tpu.memory_space<vmem>>, vector<8x288xbf16>
    tpu.vector_store %arg13[%c64_123, %c0_124], %107 {strides = array<i32>} : memref<144x288xbf16, #tpu.memory_space<vmem>>, vector<8x288xbf16>,
    %c0_125 = arith.constant 0 : index
    %c129_126 = arith.constant 129 : index
    %118 = vector.load %arg12[%c0_125, %c129_126] : memref<8x544xbf16, #tpu.memory_space<vmem>>, vector<8x288xbf16>
    %c80_127 = arith.constant 80 : index
    %c0_128 = arith.constant 0 : index
    %119 = vector.load %arg13[%c80_127, %c0_128] : memref<144x288xbf16, #tpu.memory_space<vmem>>, vector<8x288xbf16>
    tpu.vector_store %arg13[%c80_127, %c0_128], %118 {strides = array<i32>} : memref<144x288xbf16, #tpu.memory_space<vmem>>, vector<8x288xbf16>,
    %c0_129 = arith.constant 0 : index
    %c145_130 = arith.constant 145 : index
    %120 = vector.load %arg12[%c0_129, %c145_130] : memref<8x544xbf16, #tpu.memory_space<vmem>>, vector<8x288xbf16>
    %c96_131 = arith.constant 96 : index
    %c0_132 = arith.constant 0 : index
    %121 = vector.load %arg13[%c96_131, %c0_132] : memref<144x288xbf16, #tpu.memory_space<vmem>>, vector<8x288xbf16>
    tpu.vector_store %arg13[%c96_131, %c0_132], %120 {strides = array<i32>} : memref<144x288xbf16, #tpu.memory_space<vmem>>, vector<8x288xbf16>,
    %c0_133 = arith.constant 0 : index
    %c146_134 = arith.constant 146 : index
    %122 = vector.load %arg12[%c0_133, %c146_134] : memref<8x544xbf16, #tpu.memory_space<vmem>>, vector<8x288xbf16>
    %c112_135 = arith.constant 112 : index
    %c0_136 = arith.constant 0 : index
    %123 = vector.load %arg13[%c112_135, %c0_136] : memref<144x288xbf16, #tpu.memory_space<vmem>>, vector<8x288xbf16>
    tpu.vector_store %arg13[%c112_135, %c0_136], %122 {strides = array<i32>} : memref<144x288xbf16, #tpu.memory_space<vmem>>, vector<8x288xbf16>,
    %c0_137 = arith.constant 0 : index
    %c147_138 = arith.constant 147 : index
    %124 = vector.load %arg12[%c0_137, %c147_138] : memref<8x544xbf16, #tpu.memory_space<vmem>>, vector<8x288xbf16>
    %c128_139 = arith.constant 128 : index
    %c0_140 = arith.constant 0 : index
    %125 = vector.load %arg13[%c128_139, %c0_140] : memref<144x288xbf16, #tpu.memory_space<vmem>>, vector<8x288xbf16>
    tpu.vector_store %arg13[%c128_139, %c0_140], %124 {strides = array<i32>} : memref<144x288xbf16, #tpu.memory_space<vmem>>, vector<8x288xbf16>,
    %c0_141 = arith.constant 0 : index
    %c0_142 = arith.constant 0 : index
    %126 = vector.load %arg13[%c0_141, %c0_142] : memref<144x288xbf16, #tpu.memory_space<vmem>>, vector<144x288xbf16>
    %cst_143 = arith.constant dense<0.000000e+00> : vector<8x288xf32>
    %127 = tpu.matmul %100, %126, %cst_143 {dimension_numbers = #tpu.dot_dimension_numbers<[1], [0], [0], [1], [0, 0, 1, 1], [], []>} : vector<8x144xbf16>, vector<144x288xbf16>, vector<8x288xf32> -> vector<8x288xf32>
    %128 = vector.broadcast %102 : vector<8x1xf32> to vector<8x288xf32>
    %129 = arith.addf %127, %128 : vector<8x288xf32>
    %cst_144 = arith.constant 1.000000e-01 : f32
    %130 = vector.broadcast %cst_144 : f32 to vector<8x288xf32>
    %131 = arith.mulf %129, %130 : vector<8x288xf32>
    %132 = arith.addf %131, %65 : vector<8x288xf32>
    %c1_145 = arith.constant 1 : index
    %c0_146 = arith.constant 0 : index
    %c0_147 = arith.constant 0 : index
    %c0_148 = arith.constant 0 : index
    %133 = vector.load %arg5[%c1_145, %c0_146, %c0_147, %c0_148] : memref<2x2x8x144xbf16, #tpu.memory_space<vmem>>, vector<1x1x8x144xbf16>
    %134 = vector.shape_cast %133 : vector<1x1x8x144xbf16> to vector<8x144xbf16>
    %c1_149 = arith.constant 1 : index
    %c0_150 = arith.constant 0 : index
    %c0_151 = arith.constant 0 : index
    %c0_152 = arith.constant 0 : index
    %135 = vector.load %arg6[%c1_149, %c0_150, %c0_151, %c0_152] : memref<2x2x8x1xf32, #tpu.memory_space<vmem>>, vector<1x1x8x1xf32>
    %136 = vector.shape_cast %135 : vector<1x1x8x1xf32> to vector<8x1xf32>
    %cst_153 = arith.constant 0.000000e+00 : f32
    %137 = vector.shape_cast %31 : vector<1x288xi1> to vector<1x288xi1>
    %138 = vector.broadcast %137 : vector<1x288xi1> to vector<8x288xi1>
    %139 = vector.broadcast %cst_153 : f32 to vector<8x288xf32>
    %140 = arith.select %138, %132, %139 : vector<8x288xi1>, vector<8x288xf32>
    %141 = arith.truncf %140 : vector<8x288xf32> to vector<8x288xbf16>
    %c0_154 = arith.constant 0 : index
    %c128_155 = arith.constant 128 : index
    %142 = vector.load %arg12[%c0_154, %c128_155] : memref<8x544xbf16, #tpu.memory_space<vmem>>, vector<8x288xbf16>
    tpu.vector_store %arg12[%c0_154, %c128_155], %141 {strides = array<i32>} : memref<8x544xbf16, #tpu.memory_space<vmem>>, vector<8x288xbf16>,
    %c0_156 = arith.constant 0 : index
    %c109_157 = arith.constant 109 : index
    %143 = vector.load %arg12[%c0_156, %c109_157] : memref<8x544xbf16, #tpu.memory_space<vmem>>, vector<8x288xbf16>
    %c0_158 = arith.constant 0 : index
    %c0_159 = arith.constant 0 : index
    %144 = vector.load %arg13[%c0_158, %c0_159] : memref<144x288xbf16, #tpu.memory_space<vmem>>, vector<8x288xbf16>
    tpu.vector_store %arg13[%c0_158, %c0_159], %143 {strides = array<i32>} : memref<144x288xbf16, #tpu.memory_space<vmem>>, vector<8x288xbf16>,
    %c0_160 = arith.constant 0 : index
    %c110_161 = arith.constant 110 : index
    %145 = vector.load %arg12[%c0_160, %c110_161] : memref<8x544xbf16, #tpu.memory_space<vmem>>, vector<8x288xbf16>
    %c16_162 = arith.constant 16 : index
    %c0_163 = arith.constant 0 : index
    %146 = vector.load %arg13[%c16_162, %c0_163] : memref<144x288xbf16, #tpu.memory_space<vmem>>, vector<8x288xbf16>
    tpu.vector_store %arg13[%c16_162, %c0_163], %145 {strides = array<i32>} : memref<144x288xbf16, #tpu.memory_space<vmem>>, vector<8x288xbf16>,
    %c0_164 = arith.constant 0 : index
    %c111_165 = arith.constant 111 : index
    %147 = vector.load %arg12[%c0_164, %c111_165] : memref<8x544xbf16, #tpu.memory_space<vmem>>, vector<8x288xbf16>
    %c32_166 = arith.constant 32 : index
    %c0_167 = arith.constant 0 : index
    %148 = vector.load %arg13[%c32_166, %c0_167] : memref<144x288xbf16, #tpu.memory_space<vmem>>, vector<8x288xbf16>
    tpu.vector_store %arg13[%c32_166, %c0_167], %147 {strides = array<i32>} : memref<144x288xbf16, #tpu.memory_space<vmem>>, vector<8x288xbf16>,
    %c0_168 = arith.constant 0 : index
    %c127_169 = arith.constant 127 : index
    %149 = vector.load %arg12[%c0_168, %c127_169] : memref<8x544xbf16, #tpu.memory_space<vmem>>, vector<8x288xbf16>
    %c48_170 = arith.constant 48 : index
    %c0_171 = arith.constant 0 : index
    %150 = vector.load %arg13[%c48_170, %c0_171] : memref<144x288xbf16, #tpu.memory_space<vmem>>, vector<8x288xbf16>
    tpu.vector_store %arg13[%c48_170, %c0_171], %149 {strides = array<i32>} : memref<144x288xbf16, #tpu.memory_space<vmem>>, vector<8x288xbf16>,
    %c64_172 = arith.constant 64 : index
    %c0_173 = arith.constant 0 : index
    %151 = vector.load %arg13[%c64_172, %c0_173] : memref<144x288xbf16, #tpu.memory_space<vmem>>, vector<8x288xbf16>
    tpu.vector_store %arg13[%c64_172, %c0_173], %141 {strides = array<i32>} : memref<144x288xbf16, #tpu.memory_space<vmem>>, vector<8x288xbf16>,
    %c0_174 = arith.constant 0 : index
    %c129_175 = arith.constant 129 : index
    %152 = vector.load %arg12[%c0_174, %c129_175] : memref<8x544xbf16, #tpu.memory_space<vmem>>, vector<8x288xbf16>
    %c80_176 = arith.constant 80 : index
    %c0_177 = arith.constant 0 : index
    %153 = vector.load %arg13[%c80_176, %c0_177] : memref<144x288xbf16, #tpu.memory_space<vmem>>, vector<8x288xbf16>
    tpu.vector_store %arg13[%c80_176, %c0_177], %152 {strides = array<i32>} : memref<144x288xbf16, #tpu.memory_space<vmem>>, vector<8x288xbf16>,
    %c0_178 = arith.constant 0 : index
    %c145_179 = arith.constant 145 : index
    %154 = vector.load %arg12[%c0_178, %c145_179] : memref<8x544xbf16, #tpu.memory_space<vmem>>, vector<8x288xbf16>
    %c96_180 = arith.constant 96 : index
    %c0_181 = arith.constant 0 : index
    %155 = vector.load %arg13[%c96_180, %c0_181] : memref<144x288xbf16, #tpu.memory_space<vmem>>, vector<8x288xbf16>
    tpu.vector_store %arg13[%c96_180, %c0_181], %154 {strides = array<i32>} : memref<144x288xbf16, #tpu.memory_space<vmem>>, vector<8x288xbf16>,
    %c0_182 = arith.constant 0 : index
    %c146_183 = arith.constant 146 : index
    %156 = vector.load %arg12[%c0_182, %c146_183] : memref<8x544xbf16, #tpu.memory_space<vmem>>, vector<8x288xbf16>
    %c112_184 = arith.constant 112 : index
    %c0_185 = arith.constant 0 : index
    %157 = vector.load %arg13[%c112_184, %c0_185] : memref<144x288xbf16, #tpu.memory_space<vmem>>, vector<8x288xbf16>
    tpu.vector_store %arg13[%c112_184, %c0_185], %156 {strides = array<i32>} : memref<144x288xbf16, #tpu.memory_space<vmem>>, vector<8x288xbf16>,
    %c0_186 = arith.constant 0 : index
    %c147_187 = arith.constant 147 : index
    %158 = vector.load %arg12[%c0_186, %c147_187] : memref<8x544xbf16, #tpu.memory_space<vmem>>, vector<8x288xbf16>
    %c128_188 = arith.constant 128 : index
    %c0_189 = arith.constant 0 : index
    %159 = vector.load %arg13[%c128_188, %c0_189] : memref<144x288xbf16, #tpu.memory_space<vmem>>, vector<8x288xbf16>
    tpu.vector_store %arg13[%c128_188, %c0_189], %158 {strides = array<i32>} : memref<144x288xbf16, #tpu.memory_space<vmem>>, vector<8x288xbf16>,
    %c0_190 = arith.constant 0 : index
    %c0_191 = arith.constant 0 : index
    %160 = vector.load %arg13[%c0_190, %c0_191] : memref<144x288xbf16, #tpu.memory_space<vmem>>, vector<144x288xbf16>
    %cst_192 = arith.constant dense<0.000000e+00> : vector<8x288xf32>
    %161 = tpu.matmul %134, %160, %cst_192 {dimension_numbers = #tpu.dot_dimension_numbers<[1], [0], [0], [1], [0, 0, 1, 1], [], []>} : vector<8x144xbf16>, vector<144x288xbf16>, vector<8x288xf32> -> vector<8x288xf32>
    %162 = vector.broadcast %136 : vector<8x1xf32> to vector<8x288xf32>
    %163 = arith.addf %161, %162 : vector<8x288xf32>
    %cst_193 = arith.constant 0.000000e+00 : f32
    %164 = vector.broadcast %cst_193 : f32 to vector<8x288xf32>
    %165 = arith.maximumf %163, %164 : vector<8x288xf32>
    %c1_194 = arith.constant 1 : index
    %c1_195 = arith.constant 1 : index
    %c0_196 = arith.constant 0 : index
    %c0_197 = arith.constant 0 : index
    %166 = vector.load %arg5[%c1_194, %c1_195, %c0_196, %c0_197] : memref<2x2x8x144xbf16, #tpu.memory_space<vmem>>, vector<1x1x8x144xbf16>
    %167 = vector.shape_cast %166 : vector<1x1x8x144xbf16> to vector<8x144xbf16>
    %c1_198 = arith.constant 1 : index
    %c1_199 = arith.constant 1 : index
    %c0_200 = arith.constant 0 : index
    %c0_201 = arith.constant 0 : index
    %168 = vector.load %arg6[%c1_198, %c1_199, %c0_200, %c0_201] : memref<2x2x8x1xf32, #tpu.memory_space<vmem>>, vector<1x1x8x1xf32>
    %169 = vector.shape_cast %168 : vector<1x1x8x1xf32> to vector<8x1xf32>
    %cst_202 = arith.constant 0.000000e+00 : f32
    %170 = vector.shape_cast %31 : vector<1x288xi1> to vector<1x288xi1>
    %171 = vector.broadcast %170 : vector<1x288xi1> to vector<8x288xi1>
    %172 = vector.broadcast %cst_202 : f32 to vector<8x288xf32>
    %173 = arith.select %171, %165, %172 : vector<8x288xi1>, vector<8x288xf32>
    %174 = arith.truncf %173 : vector<8x288xf32> to vector<8x288xbf16>
    %c0_203 = arith.constant 0 : index
    %c128_204 = arith.constant 128 : index
    %175 = vector.load %arg12[%c0_203, %c128_204] : memref<8x544xbf16, #tpu.memory_space<vmem>>, vector<8x288xbf16>
    tpu.vector_store %arg12[%c0_203, %c128_204], %174 {strides = array<i32>} : memref<8x544xbf16, #tpu.memory_space<vmem>>, vector<8x288xbf16>,
    %c0_205 = arith.constant 0 : index
    %c109_206 = arith.constant 109 : index
    %176 = vector.load %arg12[%c0_205, %c109_206] : memref<8x544xbf16, #tpu.memory_space<vmem>>, vector<8x288xbf16>
    %c0_207 = arith.constant 0 : index
    %c0_208 = arith.constant 0 : index
    %177 = vector.load %arg13[%c0_207, %c0_208] : memref<144x288xbf16, #tpu.memory_space<vmem>>, vector<8x288xbf16>
    tpu.vector_store %arg13[%c0_207, %c0_208], %176 {strides = array<i32>} : memref<144x288xbf16, #tpu.memory_space<vmem>>, vector<8x288xbf16>,
    %c0_209 = arith.constant 0 : index
    %c110_210 = arith.constant 110 : index
    %178 = vector.load %arg12[%c0_209, %c110_210] : memref<8x544xbf16, #tpu.memory_space<vmem>>, vector<8x288xbf16>
    %c16_211 = arith.constant 16 : index
    %c0_212 = arith.constant 0 : index
    %179 = vector.load %arg13[%c16_211, %c0_212] : memref<144x288xbf16, #tpu.memory_space<vmem>>, vector<8x288xbf16>
    tpu.vector_store %arg13[%c16_211, %c0_212], %178 {strides = array<i32>} : memref<144x288xbf16, #tpu.memory_space<vmem>>, vector<8x288xbf16>,
    %c0_213 = arith.constant 0 : index
    %c111_214 = arith.constant 111 : index
    %180 = vector.load %arg12[%c0_213, %c111_214] : memref<8x544xbf16, #tpu.memory_space<vmem>>, vector<8x288xbf16>
    %c32_215 = arith.constant 32 : index
    %c0_216 = arith.constant 0 : index
    %181 = vector.load %arg13[%c32_215, %c0_216] : memref<144x288xbf16, #tpu.memory_space<vmem>>, vector<8x288xbf16>
    tpu.vector_store %arg13[%c32_215, %c0_216], %180 {strides = array<i32>} : memref<144x288xbf16, #tpu.memory_space<vmem>>, vector<8x288xbf16>,
    %c0_217 = arith.constant 0 : index
    %c127_218 = arith.constant 127 : index
    %182 = vector.load %arg12[%c0_217, %c127_218] : memref<8x544xbf16, #tpu.memory_space<vmem>>, vector<8x288xbf16>
    %c48_219 = arith.constant 48 : index
    %c0_220 = arith.constant 0 : index
    %183 = vector.load %arg13[%c48_219, %c0_220] : memref<144x288xbf16, #tpu.memory_space<vmem>>, vector<8x288xbf16>
    tpu.vector_store %arg13[%c48_219, %c0_220], %182 {strides = array<i32>} : memref<144x288xbf16, #tpu.memory_space<vmem>>, vector<8x288xbf16>,
    %c64_221 = arith.constant 64 : index
    %c0_222 = arith.constant 0 : index
    %184 = vector.load %arg13[%c64_221, %c0_222] : memref<144x288xbf16, #tpu.memory_space<vmem>>, vector<8x288xbf16>
    tpu.vector_store %arg13[%c64_221, %c0_222], %174 {strides = array<i32>} : memref<144x288xbf16, #tpu.memory_space<vmem>>, vector<8x288xbf16>,
    %c0_223 = arith.constant 0 : index
    %c129_224 = arith.constant 129 : index
    %185 = vector.load %arg12[%c0_223, %c129_224] : memref<8x544xbf16, #tpu.memory_space<vmem>>, vector<8x288xbf16>
    %c80_225 = arith.constant 80 : index
    %c0_226 = arith.constant 0 : index
    %186 = vector.load %arg13[%c80_225, %c0_226] : memref<144x288xbf16, #tpu.memory_space<vmem>>, vector<8x288xbf16>
    tpu.vector_store %arg13[%c80_225, %c0_226], %185 {strides = array<i32>} : memref<144x288xbf16, #tpu.memory_space<vmem>>, vector<8x288xbf16>,
    %c0_227 = arith.constant 0 : index
    %c145_228 = arith.constant 145 : index
    %187 = vector.load %arg12[%c0_227, %c145_228] : memref<8x544xbf16, #tpu.memory_space<vmem>>, vector<8x288xbf16>
    %c96_229 = arith.constant 96 : index
    %c0_230 = arith.constant 0 : index
    %188 = vector.load %arg13[%c96_229, %c0_230] : memref<144x288xbf16, #tpu.memory_space<vmem>>, vector<8x288xbf16>
    tpu.vector_store %arg13[%c96_229, %c0_230], %187 {strides = array<i32>} : memref<144x288xbf16, #tpu.memory_space<vmem>>, vector<8x288xbf16>,
    %c0_231 = arith.constant 0 : index
    %c146_232 = arith.constant 146 : index
    %189 = vector.load %arg12[%c0_231, %c146_232] : memref<8x544xbf16, #tpu.memory_space<vmem>>, vector<8x288xbf16>
    %c112_233 = arith.constant 112 : index
    %c0_234 = arith.constant 0 : index
    %190 = vector.load %arg13[%c112_233, %c0_234] : memref<144x288xbf16, #tpu.memory_space<vmem>>, vector<8x288xbf16>
    tpu.vector_store %arg13[%c112_233, %c0_234], %189 {strides = array<i32>} : memref<144x288xbf16, #tpu.memory_space<vmem>>, vector<8x288xbf16>,
    %c0_235 = arith.constant 0 : index
    %c147_236 = arith.constant 147 : index
    %191 = vector.load %arg12[%c0_235, %c147_236] : memref<8x544xbf16, #tpu.memory_space<vmem>>, vector<8x288xbf16>
    %c128_237 = arith.constant 128 : index
    %c0_238 = arith.constant 0 : index
    %192 = vector.load %arg13[%c128_237, %c0_238] : memref<144x288xbf16, #tpu.memory_space<vmem>>, vector<8x288xbf16>
    tpu.vector_store %arg13[%c128_237, %c0_238], %191 {strides = array<i32>} : memref<144x288xbf16, #tpu.memory_space<vmem>>, vector<8x288xbf16>,
    %c0_239 = arith.constant 0 : index
    %c0_240 = arith.constant 0 : index
    %193 = vector.load %arg13[%c0_239, %c0_240] : memref<144x288xbf16, #tpu.memory_space<vmem>>, vector<144x288xbf16>
    %cst_241 = arith.constant dense<0.000000e+00> : vector<8x288xf32>
    %194 = tpu.matmul %167, %193, %cst_241 {dimension_numbers = #tpu.dot_dimension_numbers<[1], [0], [0], [1], [0, 0, 1, 1], [], []>} : vector<8x144xbf16>, vector<144x288xbf16>, vector<8x288xf32> -> vector<8x288xf32>
    %195 = vector.broadcast %169 : vector<8x1xf32> to vector<8x288xf32>
    %196 = arith.addf %194, %195 : vector<8x288xf32>
    %cst_242 = arith.constant 1.000000e-01 : f32
    %197 = vector.broadcast %cst_242 : f32 to vector<8x288xf32>
    %198 = arith.mulf %196, %197 : vector<8x288xf32>
    %199 = arith.addf %198, %132 : vector<8x288xf32>
    %c0_243 = arith.constant 0 : index
    %c0_244 = arith.constant 0 : index
    %200 = vector.load %arg7[%c0_243, %c0_244] : memref<8x144xbf16, #tpu.memory_space<vmem>>, vector<8x144xbf16>
    %c0_245 = arith.constant 0 : index
    %c0_246 = arith.constant 0 : index
    %201 = vector.load %arg8[%c0_245, %c0_246] : memref<8x1xf32, #tpu.memory_space<vmem>>, vector<8x1xf32>
    %cst_247 = arith.constant 0.000000e+00 : f32
    %202 = vector.shape_cast %31 : vector<1x288xi1> to vector<1x288xi1>
    %203 = vector.broadcast %202 : vector<1x288xi1> to vector<8x288xi1>
    %204 = vector.broadcast %cst_247 : f32 to vector<8x288xf32>
    %205 = arith.select %203, %199, %204 : vector<8x288xi1>, vector<8x288xf32>
    %206 = arith.truncf %205 : vector<8x288xf32> to vector<8x288xbf16>
    %c0_248 = arith.constant 0 : index
    %c128_249 = arith.constant 128 : index
    %207 = vector.load %arg12[%c0_248, %c128_249] : memref<8x544xbf16, #tpu.memory_space<vmem>>, vector<8x288xbf16>
    tpu.vector_store %arg12[%c0_248, %c128_249], %206 {strides = array<i32>} : memref<8x544xbf16, #tpu.memory_space<vmem>>, vector<8x288xbf16>,
    %c0_250 = arith.constant 0 : index
    %c109_251 = arith.constant 109 : index
    %208 = vector.load %arg12[%c0_250, %c109_251] : memref<8x544xbf16, #tpu.memory_space<vmem>>, vector<8x288xbf16>
    %c0_252 = arith.constant 0 : index
    %c0_253 = arith.constant 0 : index
    %209 = vector.load %arg13[%c0_252, %c0_253] : memref<144x288xbf16, #tpu.memory_space<vmem>>, vector<8x288xbf16>
    tpu.vector_store %arg13[%c0_252, %c0_253], %208 {strides = array<i32>} : memref<144x288xbf16, #tpu.memory_space<vmem>>, vector<8x288xbf16>,
    %c0_254 = arith.constant 0 : index
    %c110_255 = arith.constant 110 : index
    %210 = vector.load %arg12[%c0_254, %c110_255] : memref<8x544xbf16, #tpu.memory_space<vmem>>, vector<8x288xbf16>
    %c16_256 = arith.constant 16 : index
    %c0_257 = arith.constant 0 : index
    %211 = vector.load %arg13[%c16_256, %c0_257] : memref<144x288xbf16, #tpu.memory_space<vmem>>, vector<8x288xbf16>
    tpu.vector_store %arg13[%c16_256, %c0_257], %210 {strides = array<i32>} : memref<144x288xbf16, #tpu.memory_space<vmem>>, vector<8x288xbf16>,
    %c0_258 = arith.constant 0 : index
    %c111_259 = arith.constant 111 : index
    %212 = vector.load %arg12[%c0_258, %c111_259] : memref<8x544xbf16, #tpu.memory_space<vmem>>, vector<8x288xbf16>
    %c32_260 = arith.constant 32 : index
    %c0_261 = arith.constant 0 : index
    %213 = vector.load %arg13[%c32_260, %c0_261] : memref<144x288xbf16, #tpu.memory_space<vmem>>, vector<8x288xbf16>
    tpu.vector_store %arg13[%c32_260, %c0_261], %212 {strides = array<i32>} : memref<144x288xbf16, #tpu.memory_space<vmem>>, vector<8x288xbf16>,
    %c0_262 = arith.constant 0 : index
    %c127_263 = arith.constant 127 : index
    %214 = vector.load %arg12[%c0_262, %c127_263] : memref<8x544xbf16, #tpu.memory_space<vmem>>, vector<8x288xbf16>
    %c48_264 = arith.constant 48 : index
    %c0_265 = arith.constant 0 : index
    %215 = vector.load %arg13[%c48_264, %c0_265] : memref<144x288xbf16, #tpu.memory_space<vmem>>, vector<8x288xbf16>
    tpu.vector_store %arg13[%c48_264, %c0_265], %214 {strides = array<i32>} : memref<144x288xbf16, #tpu.memory_space<vmem>>, vector<8x288xbf16>,
    %c64_266 = arith.constant 64 : index
    %c0_267 = arith.constant 0 : index
    %216 = vector.load %arg13[%c64_266, %c0_267] : memref<144x288xbf16, #tpu.memory_space<vmem>>, vector<8x288xbf16>
    tpu.vector_store %arg13[%c64_266, %c0_267], %206 {strides = array<i32>} : memref<144x288xbf16, #tpu.memory_space<vmem>>, vector<8x288xbf16>,
    %c0_268 = arith.constant 0 : index
    %c129_269 = arith.constant 129 : index
    %217 = vector.load %arg12[%c0_268, %c129_269] : memref<8x544xbf16, #tpu.memory_space<vmem>>, vector<8x288xbf16>
    %c80_270 = arith.constant 80 : index
    %c0_271 = arith.constant 0 : index
    %218 = vector.load %arg13[%c80_270, %c0_271] : memref<144x288xbf16, #tpu.memory_space<vmem>>, vector<8x288xbf16>
    tpu.vector_store %arg13[%c80_270, %c0_271], %217 {strides = array<i32>} : memref<144x288xbf16, #tpu.memory_space<vmem>>, vector<8x288xbf16>,
    %c0_272 = arith.constant 0 : index
    %c145_273 = arith.constant 145 : index
    %219 = vector.load %arg12[%c0_272, %c145_273] : memref<8x544xbf16, #tpu.memory_space<vmem>>, vector<8x288xbf16>
    %c96_274 = arith.constant 96 : index
    %c0_275 = arith.constant 0 : index
    %220 = vector.load %arg13[%c96_274, %c0_275] : memref<144x288xbf16, #tpu.memory_space<vmem>>, vector<8x288xbf16>
    tpu.vector_store %arg13[%c96_274, %c0_275], %219 {strides = array<i32>} : memref<144x288xbf16, #tpu.memory_space<vmem>>, vector<8x288xbf16>,
    %c0_276 = arith.constant 0 : index
    %c146_277 = arith.constant 146 : index
    %221 = vector.load %arg12[%c0_276, %c146_277] : memref<8x544xbf16, #tpu.memory_space<vmem>>, vector<8x288xbf16>
    %c112_278 = arith.constant 112 : index
    %c0_279 = arith.constant 0 : index
    %222 = vector.load %arg13[%c112_278, %c0_279] : memref<144x288xbf16, #tpu.memory_space<vmem>>, vector<8x288xbf16>
    tpu.vector_store %arg13[%c112_278, %c0_279], %221 {strides = array<i32>} : memref<144x288xbf16, #tpu.memory_space<vmem>>, vector<8x288xbf16>,
    %c0_280 = arith.constant 0 : index
    %c147_281 = arith.constant 147 : index
    %223 = vector.load %arg12[%c0_280, %c147_281] : memref<8x544xbf16, #tpu.memory_space<vmem>>, vector<8x288xbf16>
    %c128_282 = arith.constant 128 : index
    %c0_283 = arith.constant 0 : index
    %224 = vector.load %arg13[%c128_282, %c0_283] : memref<144x288xbf16, #tpu.memory_space<vmem>>, vector<8x288xbf16>
    tpu.vector_store %arg13[%c128_282, %c0_283], %223 {strides = array<i32>} : memref<144x288xbf16, #tpu.memory_space<vmem>>, vector<8x288xbf16>,
    %c0_284 = arith.constant 0 : index
    %c0_285 = arith.constant 0 : index
    %225 = vector.load %arg13[%c0_284, %c0_285] : memref<144x288xbf16, #tpu.memory_space<vmem>>, vector<144x288xbf16>
    %cst_286 = arith.constant dense<0.000000e+00> : vector<8x288xf32>
    %226 = tpu.matmul %200, %225, %cst_286 {dimension_numbers = #tpu.dot_dimension_numbers<[1], [0], [0], [1], [0, 0, 1, 1], [], []>} : vector<8x144xbf16>, vector<144x288xbf16>, vector<8x288xf32> -> vector<8x288xf32>
    %227 = vector.broadcast %201 : vector<8x1xf32> to vector<8x288xf32>
    %228 = arith.addf %226, %227 : vector<8x288xf32>
    %229 = arith.addf %228, %65 : vector<8x288xf32>
    %c0_287 = arith.constant 0 : index
    %c0_288 = arith.constant 0 : index
    %230 = vector.load %arg9[%c0_287, %c0_288] : memref<32x144xbf16, #tpu.memory_space<vmem>>, vector<32x144xbf16>
    %c0_289 = arith.constant 0 : index
    %c0_290 = arith.constant 0 : index
    %231 = vector.load %arg10[%c0_289, %c0_290] : memref<32x1xf32, #tpu.memory_space<vmem>>, vector<32x1xf32>
    %cst_291 = arith.constant 0.000000e+00 : f32
    %232 = vector.shape_cast %31 : vector<1x288xi1> to vector<1x288xi1>
    %233 = vector.broadcast %232 : vector<1x288xi1> to vector<8x288xi1>
    %234 = vector.broadcast %cst_291 : f32 to vector<8x288xf32>
    %235 = arith.select %233, %229, %234 : vector<8x288xi1>, vector<8x288xf32>
    %236 = arith.truncf %235 : vector<8x288xf32> to vector<8x288xbf16>
    %c0_292 = arith.constant 0 : index
    %c128_293 = arith.constant 128 : index
    %237 = vector.load %arg12[%c0_292, %c128_293] : memref<8x544xbf16, #tpu.memory_space<vmem>>, vector<8x288xbf16>
    tpu.vector_store %arg12[%c0_292, %c128_293], %236 {strides = array<i32>} : memref<8x544xbf16, #tpu.memory_space<vmem>>, vector<8x288xbf16>,
    %c0_294 = arith.constant 0 : index
    %c109_295 = arith.constant 109 : index
    %238 = vector.load %arg12[%c0_294, %c109_295] : memref<8x544xbf16, #tpu.memory_space<vmem>>, vector<8x288xbf16>
    %c0_296 = arith.constant 0 : index
    %c0_297 = arith.constant 0 : index
    %239 = vector.load %arg13[%c0_296, %c0_297] : memref<144x288xbf16, #tpu.memory_space<vmem>>, vector<8x288xbf16>
    tpu.vector_store %arg13[%c0_296, %c0_297], %238 {strides = array<i32>} : memref<144x288xbf16, #tpu.memory_space<vmem>>, vector<8x288xbf16>,
    %c0_298 = arith.constant 0 : index
    %c110_299 = arith.constant 110 : index
    %240 = vector.load %arg12[%c0_298, %c110_299] : memref<8x544xbf16, #tpu.memory_space<vmem>>, vector<8x288xbf16>
    %c16_300 = arith.constant 16 : index
    %c0_301 = arith.constant 0 : index
    %241 = vector.load %arg13[%c16_300, %c0_301] : memref<144x288xbf16, #tpu.memory_space<vmem>>, vector<8x288xbf16>
    tpu.vector_store %arg13[%c16_300, %c0_301], %240 {strides = array<i32>} : memref<144x288xbf16, #tpu.memory_space<vmem>>, vector<8x288xbf16>,
    %c0_302 = arith.constant 0 : index
    %c111_303 = arith.constant 111 : index
    %242 = vector.load %arg12[%c0_302, %c111_303] : memref<8x544xbf16, #tpu.memory_space<vmem>>, vector<8x288xbf16>
    %c32_304 = arith.constant 32 : index
    %c0_305 = arith.constant 0 : index
    %243 = vector.load %arg13[%c32_304, %c0_305] : memref<144x288xbf16, #tpu.memory_space<vmem>>, vector<8x288xbf16>
    tpu.vector_store %arg13[%c32_304, %c0_305], %242 {strides = array<i32>} : memref<144x288xbf16, #tpu.memory_space<vmem>>, vector<8x288xbf16>,
    %c0_306 = arith.constant 0 : index
    %c127_307 = arith.constant 127 : index
    %244 = vector.load %arg12[%c0_306, %c127_307] : memref<8x544xbf16, #tpu.memory_space<vmem>>, vector<8x288xbf16>
    %c48_308 = arith.constant 48 : index
    %c0_309 = arith.constant 0 : index
    %245 = vector.load %arg13[%c48_308, %c0_309] : memref<144x288xbf16, #tpu.memory_space<vmem>>, vector<8x288xbf16>
    tpu.vector_store %arg13[%c48_308, %c0_309], %244 {strides = array<i32>} : memref<144x288xbf16, #tpu.memory_space<vmem>>, vector<8x288xbf16>,
    %c64_310 = arith.constant 64 : index
    %c0_311 = arith.constant 0 : index
    %246 = vector.load %arg13[%c64_310, %c0_311] : memref<144x288xbf16, #tpu.memory_space<vmem>>, vector<8x288xbf16>
    tpu.vector_store %arg13[%c64_310, %c0_311], %236 {strides = array<i32>} : memref<144x288xbf16, #tpu.memory_space<vmem>>, vector<8x288xbf16>,
    %c0_312 = arith.constant 0 : index
    %c129_313 = arith.constant 129 : index
    %247 = vector.load %arg12[%c0_312, %c129_313] : memref<8x544xbf16, #tpu.memory_space<vmem>>, vector<8x288xbf16>
    %c80_314 = arith.constant 80 : index
    %c0_315 = arith.constant 0 : index
    %248 = vector.load %arg13[%c80_314, %c0_315] : memref<144x288xbf16, #tpu.memory_space<vmem>>, vector<8x288xbf16>
    tpu.vector_store %arg13[%c80_314, %c0_315], %247 {strides = array<i32>} : memref<144x288xbf16, #tpu.memory_space<vmem>>, vector<8x288xbf16>,
    %c0_316 = arith.constant 0 : index
    %c145_317 = arith.constant 145 : index
    %249 = vector.load %arg12[%c0_316, %c145_317] : memref<8x544xbf16, #tpu.memory_space<vmem>>, vector<8x288xbf16>
    %c96_318 = arith.constant 96 : index
    %c0_319 = arith.constant 0 : index
    %250 = vector.load %arg13[%c96_318, %c0_319] : memref<144x288xbf16, #tpu.memory_space<vmem>>, vector<8x288xbf16>
    tpu.vector_store %arg13[%c96_318, %c0_319], %249 {strides = array<i32>} : memref<144x288xbf16, #tpu.memory_space<vmem>>, vector<8x288xbf16>,
    %c0_320 = arith.constant 0 : index
    %c146_321 = arith.constant 146 : index
    %251 = vector.load %arg12[%c0_320, %c146_321] : memref<8x544xbf16, #tpu.memory_space<vmem>>, vector<8x288xbf16>
    %c112_322 = arith.constant 112 : index
    %c0_323 = arith.constant 0 : index
    %252 = vector.load %arg13[%c112_322, %c0_323] : memref<144x288xbf16, #tpu.memory_space<vmem>>, vector<8x288xbf16>
    tpu.vector_store %arg13[%c112_322, %c0_323], %251 {strides = array<i32>} : memref<144x288xbf16, #tpu.memory_space<vmem>>, vector<8x288xbf16>,
    %c0_324 = arith.constant 0 : index
    %c147_325 = arith.constant 147 : index
    %253 = vector.load %arg12[%c0_324, %c147_325] : memref<8x544xbf16, #tpu.memory_space<vmem>>, vector<8x288xbf16>
    %c128_326 = arith.constant 128 : index
    %c0_327 = arith.constant 0 : index
    %254 = vector.load %arg13[%c128_326, %c0_327] : memref<144x288xbf16, #tpu.memory_space<vmem>>, vector<8x288xbf16>
    tpu.vector_store %arg13[%c128_326, %c0_327], %253 {strides = array<i32>} : memref<144x288xbf16, #tpu.memory_space<vmem>>, vector<8x288xbf16>,
    %c0_328 = arith.constant 0 : index
    %c0_329 = arith.constant 0 : index
    %255 = vector.load %arg13[%c0_328, %c0_329] : memref<144x288xbf16, #tpu.memory_space<vmem>>, vector<144x288xbf16>
    %cst_330 = arith.constant dense<0.000000e+00> : vector<32x288xf32>
    %256 = tpu.matmul %230, %255, %cst_330 {dimension_numbers = #tpu.dot_dimension_numbers<[1], [0], [0], [1], [0, 0, 1, 1], [], []>} : vector<32x144xbf16>, vector<144x288xbf16>, vector<32x288xf32> -> vector<32x288xf32>
    %257 = vector.broadcast %231 : vector<32x1xf32> to vector<32x288xf32>
    %258 = arith.addf %256, %257 : vector<32x288xf32>
    %259 = arith.truncf %258 : vector<32x288xf32> to vector<32x288xbf16>
    %c0_331 = arith.constant 0 : index
    %c0_332 = arith.constant 0 : index
    %c0_333 = arith.constant 0 : index
    %260 = vector.load %arg11[%c0_331, %c0_332, %c0_333] : memref<1x32x288xbf16, #tpu.memory_space<vmem>>, vector<1x32x288xbf16>
    %261 = vector.shape_cast %260 : vector<1x32x288xbf16> to vector<32x288xbf16>
    %262 = vector.shape_cast %259 : vector<32x288xbf16> to vector<1x32x288xbf16>
    tpu.vector_store %arg11[%c0_331, %c0_332, %c0_333], %262 {strides = array<i32>} : memref<1x32x288xbf16, #tpu.memory_space<vmem>>, vector<1x32x288xbf16>,
    return
  }
  func.func @transform_0(%arg0: i32) -> (i32, i32, i32) {
    %c0_i32 = arith.constant 0 : i32
    %c0_i32_0 = arith.constant 0 : i32
    %c0_i32_1 = arith.constant 0 : i32
    return %arg0, %c0_i32, %c0_i32_0 : i32, i32, i32
  }
  func.func @transform_1(%arg0: i32) -> (i32, i32) {
    %c0_i32 = arith.constant 0 : i32
    %c0_i32_0 = arith.constant 0 : i32
    %c0_i32_1 = arith.constant 0 : i32
    return %c0_i32, %c0_i32_0 : i32, i32
  }
  func.func @transform_2(%arg0: i32) -> (i32, i32) {
    %c0_i32 = arith.constant 0 : i32
    %c0_i32_0 = arith.constant 0 : i32
    %c0_i32_1 = arith.constant 0 : i32
    return %c0_i32, %c0_i32_0 : i32, i32
  }
  func.func @transform_3(%arg0: i32) -> (i32, i32) {
    %c0_i32 = arith.constant 0 : i32
    %c0_i32_0 = arith.constant 0 : i32
    %c0_i32_1 = arith.constant 0 : i32
    return %c0_i32, %c0_i32_0 : i32, i32
  }
  func.func @transform_4(%arg0: i32) -> (i32, i32, i32, i32) {
    %c0_i32 = arith.constant 0 : i32
    %c0_i32_0 = arith.constant 0 : i32
    %c0_i32_1 = arith.constant 0 : i32
    %c0_i32_2 = arith.constant 0 : i32
    %c0_i32_3 = arith.constant 0 : i32
    return %c0_i32, %c0_i32_0, %c0_i32_1, %c0_i32_2 : i32, i32, i32, i32
  }
  func.func @transform_5(%arg0: i32) -> (i32, i32, i32, i32) {
    %c0_i32 = arith.constant 0 : i32
    %c0_i32_0 = arith.constant 0 : i32
    %c0_i32_1 = arith.constant 0 : i32
    %c0_i32_2 = arith.constant 0 : i32
    %c0_i32_3 = arith.constant 0 : i32
    return %c0_i32, %c0_i32_0, %c0_i32_1, %c0_i32_2 : i32, i32, i32, i32
  }
  func.func @transform_6(%arg0: i32) -> (i32, i32) {
    %c0_i32 = arith.constant 0 : i32
    %c0_i32_0 = arith.constant 0 : i32
    %c0_i32_1 = arith.constant 0 : i32
    return %c0_i32, %c0_i32_0 : i32, i32
  }
  func.func @transform_7(%arg0: i32) -> (i32, i32) {
    %c0_i32 = arith.constant 0 : i32
    %c0_i32_0 = arith.constant 0 : i32
    %c0_i32_1 = arith.constant 0 : i32
    return %c0_i32, %c0_i32_0 : i32, i32
  }
  func.func @transform_8(%arg0: i32) -> (i32, i32) {
    %c0_i32 = arith.constant 0 : i32
    %c0_i32_0 = arith.constant 0 : i32
    %c0_i32_1 = arith.constant 0 : i32
    return %c0_i32, %c0_i32_0 : i32, i32
  }
  func.func @transform_9(%arg0: i32) -> (i32, i32) {
    %c0_i32 = arith.constant 0 : i32
    %c0_i32_0 = arith.constant 0 : i32
    %c0_i32_1 = arith.constant 0 : i32
    return %c0_i32, %c0_i32_0 : i32, i32
  }
  func.func @transform_10(%arg0: i32) -> (i32, i32, i32) {
    %c0_i32 = arith.constant 0 : i32
    %c0_i32_0 = arith.constant 0 : i32
    %c0_i32_1 = arith.constant 0 : i32
    return %arg0, %c0_i32, %c0_i32_0 : i32, i32, i32
  }
}

module attributes {stable_mosaic.version = 11 : i64} {
  func.func @kernel(%arg0: i32, %arg1: memref<1x8x1088xbf16, #tpu.memory_space<vmem>>, %arg2: memref<3x1xf32, #tpu.memory_space<vmem>>, %arg3: memref<3x144xbf16, #tpu.memory_space<vmem>>, %arg4: memref<3x1xf32, #tpu.memory_space<vmem>>, %arg5: memref<1x3x1088xf32, #tpu.memory_space<vmem>>, %arg6: memref<8x1344xbf16, #tpu.memory_space<vmem>>, %arg7: memref<144x1088xbf16, #tpu.memory_space<vmem>>) attributes {dimension_semantics = [#tpu.dimension_semantics<parallel>], iteration_bounds = array<i64: 2>, scalar_prefetch = 0 : i64, scratch_operands = 2 : i64, tpu.core_type = #tpu.core_type<tc>, window_params = [{transform_indices = @transform_0, window_bounds = array<i64: 1, 8, 1088>}, {pipeline_mode = #tpu.pipeline_mode<synchronous>, transform_indices = @transform_1, window_bounds = array<i64: 3, 1>}, {pipeline_mode = #tpu.pipeline_mode<synchronous>, transform_indices = @transform_2, window_bounds = array<i64: 3, 144>}, {pipeline_mode = #tpu.pipeline_mode<synchronous>, transform_indices = @transform_3, window_bounds = array<i64: 3, 1>}, {transform_indices = @transform_4, window_bounds = array<i64: 1, 3, 1088>}]} {
    %cst = arith.constant 0.000000e+00 : bf16
    %0 = vector.broadcast %cst : bf16 to vector<8x128xbf16>
    %c0 = arith.constant 0 : index
    %c0_0 = arith.constant 0 : index
    %1 = vector.load %arg6[%c0, %c0_0] : memref<8x1344xbf16, #tpu.memory_space<vmem>>, vector<8x128xbf16>
    tpu.vector_store %arg6[%c0, %c0_0], %0 {strides = array<i32>} : memref<8x1344xbf16, #tpu.memory_space<vmem>>, vector<8x128xbf16>,
    %c0_1 = arith.constant 0 : index
    %c1216 = arith.constant 1216 : index
    %2 = vector.load %arg6[%c0_1, %c1216] : memref<8x1344xbf16, #tpu.memory_space<vmem>>, vector<8x128xbf16>
    tpu.vector_store %arg6[%c0_1, %c1216], %0 {strides = array<i32>} : memref<8x1344xbf16, #tpu.memory_space<vmem>>, vector<8x128xbf16>,
    %cst_2 = arith.constant 0.000000e+00 : bf16
    %3 = vector.broadcast %cst_2 : bf16 to vector<8x1088xbf16>
    %c8 = arith.constant 8 : index
    %c0_3 = arith.constant 0 : index
    %4 = vector.load %arg7[%c8, %c0_3] : memref<144x1088xbf16, #tpu.memory_space<vmem>>, vector<8x1088xbf16>
    tpu.vector_store %arg7[%c8, %c0_3], %3 {strides = array<i32>} : memref<144x1088xbf16, #tpu.memory_space<vmem>>, vector<8x1088xbf16>,
    %c24 = arith.constant 24 : index
    %c0_4 = arith.constant 0 : index
    %5 = vector.load %arg7[%c24, %c0_4] : memref<144x1088xbf16, #tpu.memory_space<vmem>>, vector<8x1088xbf16>
    tpu.vector_store %arg7[%c24, %c0_4], %3 {strides = array<i32>} : memref<144x1088xbf16, #tpu.memory_space<vmem>>, vector<8x1088xbf16>,
    %c40 = arith.constant 40 : index
    %c0_5 = arith.constant 0 : index
    %6 = vector.load %arg7[%c40, %c0_5] : memref<144x1088xbf16, #tpu.memory_space<vmem>>, vector<8x1088xbf16>
    tpu.vector_store %arg7[%c40, %c0_5], %3 {strides = array<i32>} : memref<144x1088xbf16, #tpu.memory_space<vmem>>, vector<8x1088xbf16>,
    %c56 = arith.constant 56 : index
    %c0_6 = arith.constant 0 : index
    %7 = vector.load %arg7[%c56, %c0_6] : memref<144x1088xbf16, #tpu.memory_space<vmem>>, vector<8x1088xbf16>
    tpu.vector_store %arg7[%c56, %c0_6], %3 {strides = array<i32>} : memref<144x1088xbf16, #tpu.memory_space<vmem>>, vector<8x1088xbf16>,
    %c72 = arith.constant 72 : index
    %c0_7 = arith.constant 0 : index
    %8 = vector.load %arg7[%c72, %c0_7] : memref<144x1088xbf16, #tpu.memory_space<vmem>>, vector<8x1088xbf16>
    tpu.vector_store %arg7[%c72, %c0_7], %3 {strides = array<i32>} : memref<144x1088xbf16, #tpu.memory_space<vmem>>, vector<8x1088xbf16>,
    %c88 = arith.constant 88 : index
    %c0_8 = arith.constant 0 : index
    %9 = vector.load %arg7[%c88, %c0_8] : memref<144x1088xbf16, #tpu.memory_space<vmem>>, vector<8x1088xbf16>
    tpu.vector_store %arg7[%c88, %c0_8], %3 {strides = array<i32>} : memref<144x1088xbf16, #tpu.memory_space<vmem>>, vector<8x1088xbf16>,
    %c104 = arith.constant 104 : index
    %c0_9 = arith.constant 0 : index
    %10 = vector.load %arg7[%c104, %c0_9] : memref<144x1088xbf16, #tpu.memory_space<vmem>>, vector<8x1088xbf16>
    tpu.vector_store %arg7[%c104, %c0_9], %3 {strides = array<i32>} : memref<144x1088xbf16, #tpu.memory_space<vmem>>, vector<8x1088xbf16>,
    %c120 = arith.constant 120 : index
    %c0_10 = arith.constant 0 : index
    %11 = vector.load %arg7[%c120, %c0_10] : memref<144x1088xbf16, #tpu.memory_space<vmem>>, vector<8x1088xbf16>
    tpu.vector_store %arg7[%c120, %c0_10], %3 {strides = array<i32>} : memref<144x1088xbf16, #tpu.memory_space<vmem>>, vector<8x1088xbf16>,
    %c136 = arith.constant 136 : index
    %c0_11 = arith.constant 0 : index
    %12 = vector.load %arg7[%c136, %c0_11] : memref<144x1088xbf16, #tpu.memory_space<vmem>>, vector<8x1088xbf16>
    tpu.vector_store %arg7[%c136, %c0_11], %3 {strides = array<i32>} : memref<144x1088xbf16, #tpu.memory_space<vmem>>, vector<8x1088xbf16>,
    %13 = tpu.iota {dimensions = array<i32: 1>} : vector<1x1088xi32>
    %c34_i32 = arith.constant 34 : i32
    %c0_i32 = arith.constant 0 : i32
    %14 = arith.cmpi eq, %c34_i32, %c0_i32 : i32
    %c1_i32 = arith.constant 1 : i32
    %15 = arith.select %14, %c1_i32, %c34_i32 : i32
    %16 = vector.broadcast %15 : i32 to vector<1x1088xi32>
    %17 = arith.remsi %13, %16 : vector<1x1088xi32>
    %c0_i32_12 = arith.constant 0 : i32
    %18 = vector.broadcast %c0_i32_12 : i32 to vector<1x1088xi32>
    %19 = arith.cmpi ne, %17, %18 : vector<1x1088xi32>
    %c0_i32_13 = arith.constant 0 : i32
    %20 = vector.broadcast %c0_i32_13 : i32 to vector<1x1088xi32>
    %21 = arith.cmpi slt, %17, %20 : vector<1x1088xi32>
    %c0_i32_14 = arith.constant 0 : i32
    %22 = arith.cmpi slt, %15, %c0_i32_14 : i32
    %23 = vector.broadcast %22 : i1 to vector<1x1088xi1>
    %24 = vector.broadcast %23 : vector<1x1088xi1> to vector<1x1088xi1>
    %25 = arith.xori %21, %24 : vector<1x1088xi1>
    %26 = arith.andi %25, %19 : vector<1x1088xi1>
    %27 = vector.broadcast %15 : i32 to vector<1x1088xi32>
    %28 = arith.addi %17, %27 : vector<1x1088xi32>
    %29 = arith.select %26, %28, %17 : vector<1x1088xi1>, vector<1x1088xi32>
    %c32_i32 = arith.constant 32 : i32
    %30 = vector.broadcast %c32_i32 : i32 to vector<1x1088xi32>
    %31 = arith.cmpi slt, %29, %30 : vector<1x1088xi32>
    %c0_15 = arith.constant 0 : index
    %c0_16 = arith.constant 0 : index
    %c0_17 = arith.constant 0 : index
    %32 = vector.load %arg1[%c0_15, %c0_16, %c0_17] : memref<1x8x1088xbf16, #tpu.memory_space<vmem>>, vector<1x8x1088xbf16>
    %33 = vector.shape_cast %32 : vector<1x8x1088xbf16> to vector<8x1088xbf16>
    %c0_18 = arith.constant 0 : index
    %c0_19 = arith.constant 0 : index
    %34 = vector.load %arg3[%c0_18, %c0_19] : memref<3x144xbf16, #tpu.memory_space<vmem>>, vector<3x144xbf16>
    %c0_20 = arith.constant 0 : index
    %c0_21 = arith.constant 0 : index
    %35 = vector.load %arg4[%c0_20, %c0_21] : memref<3x1xf32, #tpu.memory_space<vmem>>, vector<3x1xf32>
    %cst_22 = arith.constant 0.000000e+00 : f32
    %36 = arith.truncf %cst_22 : f32 to bf16
    %37 = vector.shape_cast %31 : vector<1x1088xi1> to vector<1x1088xi1>
    %38 = vector.broadcast %37 : vector<1x1088xi1> to vector<8x1088xi1>
    %39 = vector.broadcast %36 : bf16 to vector<8x1088xbf16>
    %40 = arith.select %38, %33, %39 : vector<8x1088xi1>, vector<8x1088xbf16>
    %c0_23 = arith.constant 0 : index
    %c128 = arith.constant 128 : index
    %41 = vector.load %arg6[%c0_23, %c128] : memref<8x1344xbf16, #tpu.memory_space<vmem>>, vector<8x1088xbf16>
    tpu.vector_store %arg6[%c0_23, %c128], %40 {strides = array<i32>} : memref<8x1344xbf16, #tpu.memory_space<vmem>>, vector<8x1088xbf16>,
    %c0_24 = arith.constant 0 : index
    %c93 = arith.constant 93 : index
    %42 = vector.load %arg6[%c0_24, %c93] : memref<8x1344xbf16, #tpu.memory_space<vmem>>, vector<8x1088xbf16>
    %c0_25 = arith.constant 0 : index
    %c0_26 = arith.constant 0 : index
    %43 = vector.load %arg7[%c0_25, %c0_26] : memref<144x1088xbf16, #tpu.memory_space<vmem>>, vector<8x1088xbf16>
    tpu.vector_store %arg7[%c0_25, %c0_26], %42 {strides = array<i32>} : memref<144x1088xbf16, #tpu.memory_space<vmem>>, vector<8x1088xbf16>,
    %c0_27 = arith.constant 0 : index
    %c94 = arith.constant 94 : index
    %44 = vector.load %arg6[%c0_27, %c94] : memref<8x1344xbf16, #tpu.memory_space<vmem>>, vector<8x1088xbf16>
    %c16 = arith.constant 16 : index
    %c0_28 = arith.constant 0 : index
    %45 = vector.load %arg7[%c16, %c0_28] : memref<144x1088xbf16, #tpu.memory_space<vmem>>, vector<8x1088xbf16>
    tpu.vector_store %arg7[%c16, %c0_28], %44 {strides = array<i32>} : memref<144x1088xbf16, #tpu.memory_space<vmem>>, vector<8x1088xbf16>,
    %c0_29 = arith.constant 0 : index
    %c95 = arith.constant 95 : index
    %46 = vector.load %arg6[%c0_29, %c95] : memref<8x1344xbf16, #tpu.memory_space<vmem>>, vector<8x1088xbf16>
    %c32 = arith.constant 32 : index
    %c0_30 = arith.constant 0 : index
    %47 = vector.load %arg7[%c32, %c0_30] : memref<144x1088xbf16, #tpu.memory_space<vmem>>, vector<8x1088xbf16>
    tpu.vector_store %arg7[%c32, %c0_30], %46 {strides = array<i32>} : memref<144x1088xbf16, #tpu.memory_space<vmem>>, vector<8x1088xbf16>,
    %c0_31 = arith.constant 0 : index
    %c127 = arith.constant 127 : index
    %48 = vector.load %arg6[%c0_31, %c127] : memref<8x1344xbf16, #tpu.memory_space<vmem>>, vector<8x1088xbf16>
    %c48 = arith.constant 48 : index
    %c0_32 = arith.constant 0 : index
    %49 = vector.load %arg7[%c48, %c0_32] : memref<144x1088xbf16, #tpu.memory_space<vmem>>, vector<8x1088xbf16>
    tpu.vector_store %arg7[%c48, %c0_32], %48 {strides = array<i32>} : memref<144x1088xbf16, #tpu.memory_space<vmem>>, vector<8x1088xbf16>,
    %c64 = arith.constant 64 : index
    %c0_33 = arith.constant 0 : index
    %50 = vector.load %arg7[%c64, %c0_33] : memref<144x1088xbf16, #tpu.memory_space<vmem>>, vector<8x1088xbf16>
    tpu.vector_store %arg7[%c64, %c0_33], %40 {strides = array<i32>} : memref<144x1088xbf16, #tpu.memory_space<vmem>>, vector<8x1088xbf16>,
    %c0_34 = arith.constant 0 : index
    %c129 = arith.constant 129 : index
    %51 = vector.load %arg6[%c0_34, %c129] : memref<8x1344xbf16, #tpu.memory_space<vmem>>, vector<8x1088xbf16>
    %c80 = arith.constant 80 : index
    %c0_35 = arith.constant 0 : index
    %52 = vector.load %arg7[%c80, %c0_35] : memref<144x1088xbf16, #tpu.memory_space<vmem>>, vector<8x1088xbf16>
    tpu.vector_store %arg7[%c80, %c0_35], %51 {strides = array<i32>} : memref<144x1088xbf16, #tpu.memory_space<vmem>>, vector<8x1088xbf16>,
    %c0_36 = arith.constant 0 : index
    %c161 = arith.constant 161 : index
    %53 = vector.load %arg6[%c0_36, %c161] : memref<8x1344xbf16, #tpu.memory_space<vmem>>, vector<8x1088xbf16>
    %c96 = arith.constant 96 : index
    %c0_37 = arith.constant 0 : index
    %54 = vector.load %arg7[%c96, %c0_37] : memref<144x1088xbf16, #tpu.memory_space<vmem>>, vector<8x1088xbf16>
    tpu.vector_store %arg7[%c96, %c0_37], %53 {strides = array<i32>} : memref<144x1088xbf16, #tpu.memory_space<vmem>>, vector<8x1088xbf16>,
    %c0_38 = arith.constant 0 : index
    %c162 = arith.constant 162 : index
    %55 = vector.load %arg6[%c0_38, %c162] : memref<8x1344xbf16, #tpu.memory_space<vmem>>, vector<8x1088xbf16>
    %c112 = arith.constant 112 : index
    %c0_39 = arith.constant 0 : index
    %56 = vector.load %arg7[%c112, %c0_39] : memref<144x1088xbf16, #tpu.memory_space<vmem>>, vector<8x1088xbf16>
    tpu.vector_store %arg7[%c112, %c0_39], %55 {strides = array<i32>} : memref<144x1088xbf16, #tpu.memory_space<vmem>>, vector<8x1088xbf16>,
    %c0_40 = arith.constant 0 : index
    %c163 = arith.constant 163 : index
    %57 = vector.load %arg6[%c0_40, %c163] : memref<8x1344xbf16, #tpu.memory_space<vmem>>, vector<8x1088xbf16>
    %c128_41 = arith.constant 128 : index
    %c0_42 = arith.constant 0 : index
    %58 = vector.load %arg7[%c128_41, %c0_42] : memref<144x1088xbf16, #tpu.memory_space<vmem>>, vector<8x1088xbf16>
    tpu.vector_store %arg7[%c128_41, %c0_42], %57 {strides = array<i32>} : memref<144x1088xbf16, #tpu.memory_space<vmem>>, vector<8x1088xbf16>,
    %c0_43 = arith.constant 0 : index
    %c0_44 = arith.constant 0 : index
    %59 = vector.load %arg7[%c0_43, %c0_44] : memref<144x1088xbf16, #tpu.memory_space<vmem>>, vector<144x1088xbf16>
    %cst_45 = arith.constant dense<0.000000e+00> : vector<3x1088xf32>
    %60 = tpu.matmul %34, %59, %cst_45 {dimension_numbers = #tpu.dot_dimension_numbers<[1], [0], [0], [1], [0, 0, 1, 1], [], []>} : vector<3x144xbf16>, vector<144x1088xbf16>, vector<3x1088xf32> -> vector<3x1088xf32>
    %61 = vector.broadcast %35 : vector<3x1xf32> to vector<3x1088xf32>
    %62 = arith.addf %60, %61 : vector<3x1088xf32>
    %c0_46 = arith.constant 0 : index
    %c0_47 = arith.constant 0 : index
    %63 = vector.load %arg2[%c0_46, %c0_47] : memref<3x1xf32, #tpu.memory_space<vmem>>, vector<3x1xf32>
    %64 = vector.broadcast %63 : vector<3x1xf32> to vector<3x1088xf32>
    %65 = arith.addf %62, %64 : vector<3x1088xf32>
    %c0_48 = arith.constant 0 : index
    %c0_49 = arith.constant 0 : index
    %c0_50 = arith.constant 0 : index
    %66 = vector.load %arg5[%c0_48, %c0_49, %c0_50] : memref<1x3x1088xf32, #tpu.memory_space<vmem>>, vector<1x3x1088xf32>
    %67 = vector.shape_cast %66 : vector<1x3x1088xf32> to vector<3x1088xf32>
    %68 = vector.shape_cast %65 : vector<3x1088xf32> to vector<1x3x1088xf32>
    tpu.vector_store %arg5[%c0_48, %c0_49, %c0_50], %68 {strides = array<i32>} : memref<1x3x1088xf32, #tpu.memory_space<vmem>>, vector<1x3x1088xf32>,
    return
  }
  func.func @transform_0(%arg0: i32) -> (i32, i32, i32) {
    %c0_i32 = arith.constant 0 : i32
    %c0_i32_0 = arith.constant 0 : i32
    %c0_i32_1 = arith.constant 0 : i32
    return %arg0, %c0_i32, %c0_i32_0 : i32, i32, i32
  }
  func.func @transform_1(%arg0: i32) -> (i32, i32) {
    %c0_i32 = arith.constant 0 : i32
    %c0_i32_0 = arith.constant 0 : i32
    %c0_i32_1 = arith.constant 0 : i32
    return %c0_i32, %c0_i32_0 : i32, i32
  }
  func.func @transform_2(%arg0: i32) -> (i32, i32) {
    %c0_i32 = arith.constant 0 : i32
    %c0_i32_0 = arith.constant 0 : i32
    %c0_i32_1 = arith.constant 0 : i32
    return %c0_i32, %c0_i32_0 : i32, i32
  }
  func.func @transform_3(%arg0: i32) -> (i32, i32) {
    %c0_i32 = arith.constant 0 : i32
    %c0_i32_0 = arith.constant 0 : i32
    %c0_i32_1 = arith.constant 0 : i32
    return %c0_i32, %c0_i32_0 : i32, i32
  }
  func.func @transform_4(%arg0: i32) -> (i32, i32, i32) {
    %c0_i32 = arith.constant 0 : i32
    %c0_i32_0 = arith.constant 0 : i32
    %c0_i32_1 = arith.constant 0 : i32
    return %arg0, %c0_i32, %c0_i32_0 : i32, i32, i32
  }
}

</mosaic_0001>

<bundles_post_ra>
// kernel: edsr_forward.2
= control target key start
LH: loop header
LB: loop body
LE: loop exit
PB: predicated region body
PF: predicated region fallthrough
CT: control target
= control target key end

     0   :  { %s3634_s13 = smov 0   ;;  %s4440_s0 = inlined_call_operand.vmem [shape: f32[2,8,288], index: 0, kind: input, shape index: {}]   ;;  %s4441_s1 = inlined_call_operand.vmem [shape: f32[8,1], index: 1, kind: input, shape index: {}]   ;;  %s4442_s2 = inlined_call_operand.vmem [shape: bf16[8,144], index: 2, kind: input, shape index: {}]   ;;  %s4443_s3 = inlined_call_operand.vmem [shape: f32[8,1], index: 3, kind: input, shape index: {}]   ;;  %s4444_s4 = inlined_call_operand.vmem [shape: bf16[2,2,8,144], index: 4, kind: input, shape index: {}]   ;;  %s4445_s5 = inlined_call_operand.vmem [shape: f32[2,2,8,1], index: 5, kind: input, shape index: {}]   ;;  %s4446_s6 = inlined_call_operand.vmem [shape: bf16[8,144], index: 6, kind: input, shape index: {}]   ;;  %s4447_s7 = inlined_call_operand.vmem [shape: f32[8,1], index: 7, kind: input, shape index: {}]   ;;  %s4448_s8 = inlined_call_operand.vmem [shape: bf16[32,144], index: 8, kind: input, shape index: {}]   ;;  %s4449_s9 = inlined_call_operand.vmem [shape: f32[32,1], index: 9, kind: input, shape index: {}]   ;;  %s4450_s10 = inlined_call_operand.vmem [shape: bf16[2,32,288], index: 10, kind: output, shape index: {}]  }
   0x1 LB: > { %s3162_s14 = sadd.s32 4294967295, %s3568_s13   ;;  %p3166_p0 = scmp.ge.s32.totalorder %s3568_s13, 1  ;;  %s3568_s13 = sphi %s3634_s13, %s20_s13  }
   0x2   : > { %p312_p1 = scmp.lt.s32.totalorder %s3568_s13, 3 }
   0x4   : > { %p313_p2 = pnand %p3166_p0, %p312_p1 }
   0x5   : > { %v451_v0 = vld [vmem:[%s4441_s1] sm:$0xff] (!%p313_p2)  ;;  %vm362_vm0 = vcmask (!%p313_p2), 1043712   ;;  %vm363_vm1 = vcmask (!%p313_p2), 261124   ;;  %v3570_v1 = vmov (!%p313_p2), 0   ;;  %v393_v2 = vlaneseq (!%p313_p2)  ;;  %p350_p3 = scmp.lt.s32.totalorder (!%p313_p2), %s3162_s14, 1  ;;  %s3571_s21 = smov (!%p313_p2), 19  }
   0x6   : > { %316 = sbr.rel (%p313_p2) target bundleno = 3000 (0xbb8), region = 60  ;;  %3474 = vset.pattern.permute.xlu0 (!%p313_p2), %v3570_v1  ;;  %361 = vst [vmem:[#allocation2] sm:$0xf] (!%p313_p2), %v3570_v1  ;;  %366 = vst [vmem:[#allocation3] sm:$0xf0] (!%p313_p2), %v3570_v1  ;;  %793 = vmatprep.subr.bf16.mxu1 (!%p313_p2), %v3570_v1  ;;  %vm485_vm15 = vcmask (!%p313_p2), 257024  }
   0x7   : > { %367 = vst [vmem:[#allocation3 + $0x8] sm:$0xf0] (!%p313_p2), %v3570_v1  ;;  %369 = vst [vmem:[#allocation3 + $0x18] sm:$0xf0] (!%p313_p2), %v3570_v1  ;;  %454 = vperm.xlu0 (!%p313_p2), %3474, %v451_v0   ;;  %3475 = vset.pattern.permute.xlu1 (!%p313_p2), %v3570_v1  ;;  %v394_v3 = vand.u32 (!%p313_p2), 127, %v393_v2  ;;  %s3572_s22 = smov (!%p313_p2), 18  }
   0x8   : > { %370 = vst [vmem:[#allocation3 + $0x20] sm:$0xf0] (!%p313_p2), %v3570_v1  ;;  %372 = vst [vmem:[#allocation3 + $0x30] sm:$0xf0] (!%p313_p2), %v3570_v1  ;;  %s3573_s23 = smov (!%p313_p2), 17   ;;  %s3574_s24 = smov (!%p313_p2), 1  }
   0x9   : > { %373 = vst [vmem:[#allocation3 + $0x38] sm:$0xf0] (!%p313_p2), %v3570_v1  ;;  %375 = vst [vmem:[#allocation3 + $0x48] sm:$0xf0] (!%p313_p2), %v3570_v1  ;;  %v395_v4 = vadd.s32 (!%p313_p2), 128, %v394_v3  ;;  %v396_v5 = vadd.s32 (!%p313_p2), 256, %v394_v3 }
   0xa   : > { %376 = vst [vmem:[#allocation3 + $0x50] sm:$0xf0] (!%p313_p2), %v3570_v1  ;;  %378 = vst [vmem:[#allocation3 + $0x60] sm:$0xf0] (!%p313_p2), %v3570_v1  ;;  %v3688_v6 = vmul.u32.u64.low (!%p313_p2), 3817748708, %v394_v3  ;;  %v3689_v7 = vmul.u32.u64.high 3817748708, %v394_v3, %v3688_v6 }
   0xb   : > { %379 = vst [vmem:[#allocation3 + $0x68] sm:$0xf0] (!%p313_p2), %v3570_v1  ;;  %381 = vst [vmem:[#allocation3 + $0x78] sm:$0xf0] (!%p313_p2), %v3570_v1  ;;  %v3691_v8 = vmul.u32.u64.low (!%p313_p2), 3817748708, %v395_v4  ;;  %v3692_v9 = vmul.u32.u64.high 3817748708, %v395_v4, %v3691_v8 }
   0xc   : > { %382 = vst [vmem:[#allocation3 + $0x80] sm:$0xf0] (!%p313_p2), %v3570_v1  ;;  %384 = vst [vmem:[#allocation3 + $0x90] sm:$0xf0] (!%p313_p2), %v3570_v1  ;;  %v3694_v10 = vmul.u32.u64.low (!%p313_p2), 3817748708, %v396_v5  ;;  %v3695_v11 = vmul.u32.u64.high 3817748708, %v396_v5, %v3694_v10 }
   0xd   : > { %385 = vst [vmem:[#allocation3 + $0x98] sm:$0xf0] %v3570_v1  ;;  %387 = vst [vmem:[#allocation3 + $0xa8] sm:$0xf0] %v3570_v1  ;;  %v403_v12 = vshrl.u32 %v3689_v7, 4  ;;  %v414_v13 = vshrl.u32 %v3692_v9, 4 }
   0xe   : > { %388 = vst [vmem:[#allocation3 + $0xb0] sm:$0xf0] %v3570_v1  ;;  %390 = vst [vmem:[#allocation3 + $0xc0] sm:$0xf0] %v3570_v1  ;;  %v425_v14 = vshrl.u32 %v3695_v11, 4  ;;  %s4458_s14 = smov (!%p350_p3, %s3162_s14), 1 }
   0xf   : > { %391 = vst [vmem:[#allocation3 + $0xc8] sm:$0xf0] %v3570_v1  ;;  %vm364_vm2 = vmor %vm363_vm1, %vm362_vm0  ;;  %v404_v15 = vmul.u32 18, %v403_v12  ;;  %v415_v16 = vmul.u32 18, %v414_v13  ;;  %s3449_s17 = smul.u32 24, %s4458_s14  ;;  %s3575_s25 = smov 127  }
  0x10   : > { %368 = vst.msk [vmem:[#allocation3 + $0x10] sm:$0xf0] %vm363_vm1, %v3570_v1  ;;  %371 = vst.msk [vmem:[#allocation3 + $0x28] sm:$0xf0] %vm363_vm1, %v3570_v1  ;;  %v426_v17 = vmul.u32 18, %v425_v14  ;;  %s3576_s26 = smov 111  }
  0x11   : > { %374 = vst.msk [vmem:[#allocation3 + $0x40] sm:$0xf0] %vm363_vm1, %v3570_v1  ;;  %377 = vst.msk [vmem:[#allocation3 + $0x58] sm:$0xf0] %vm363_vm1, %v3570_v1  ;;  %v405_v18 = vsub.s32 %v394_v3, %v404_v15  ;;  %v416_v19 = vsub.s32 %v395_v4, %v415_v16  ;;  %s354_s20 = scalar_lea.vmem %s4440_s0, %s3449_s17  ;;  %s3577_s27 = smov 110   ;;  %v3759_v53 = vld [vmem:[%s4442_s2] sm:$0xff] }
  0x12   : > { %380 = vst.msk [vmem:[#allocation3 + $0x70] sm:$0xf0] %vm363_vm1, %v3570_v1  ;;  %383 = vst.msk [vmem:[#allocation3 + $0x88] sm:$0xf0] %vm363_vm1, %v3570_v1  ;;  %v427_v20 = vsub.s32 %v396_v5, %v426_v17  ;;  %v448_v27 = vld [vmem:[%s354_s20] sm:$0xff]  ;;  %v449_v28 = vld [vmem:[%s354_s20 + $0x8] sm:$0xff]  ;;  %v3200_v55 = vcombine.high %v3759_v53, %v3759_v53 }
  0x13   : > { %386 = vst.msk [vmem:[#allocation3 + $0xa0] sm:$0xf0] %vm363_vm1, %v3570_v1  ;;  %389 = vst.msk [vmem:[#allocation3 + $0xb8] sm:$0xf0] %vm363_vm1, %v3570_v1  ;;  %vm430_vm3 = vcmp.ne.s32.totalorder %v405_v18, 0  ;;  %vm433_vm4 = vcmp.lt.s32.totalorder %v405_v18, 0 }
  0x14   : > { %392 = vst.msk [vmem:[#allocation3 + $0xd0] sm:$0xf0] %vm363_vm1, %v3570_v1  ;;  %vm431_vm5 = vcmp.ne.s32.totalorder %v416_v19, 0  ;;  %vm434_vm6 = vcmp.lt.s32.totalorder %v416_v19, 0  ;;  %vm432_vm7 = vcmp.ne.s32.totalorder %v427_v20, 0  ;;  %vm435_vm8 = vcmp.lt.s32.totalorder %v427_v20, 0  ;;  %vm436_vm9 = vmand %vm433_vm4, %vm430_vm3 }
  0x15   : > { %365 = vst.msk [vmem:[#allocation2 + $0xc] sm:$0xff] %vm364_vm2, %v3570_v1  ;;  %vm437_vm10 = vmand %vm434_vm6, %vm431_vm5  ;;  %v439_v21 = vadd.s32 18, %v405_v18  ;;  %v440_v22 = vadd.s32 18, %v416_v19  ;;  %v441_v23 = vadd.s32 18, %v427_v20  ;;  %v450_v29 = vld [vmem:[%s354_s20 + $0x10] sm:$0xff]  ;;  %s3578_s28 = smov 109  }
  0x16   : > { %vm438_vm11 = vmand %vm435_vm8, %vm432_vm7  ;;  %vm748_vm0 = vcmask 130048   ;;  %v461_v56 = vld [vmem:[%s4443_s3] sm:$0xff]  ;;  %vm507_vm1 = vcmask 154624   ;;  %vm537_vm2 = vcmask 146432   ;;  %vm567_vm3 = vcmask 138240   ;;  %s3450_s11 = smul.u32 48, %s4458_s14 }
  0x17   : > { %v442_v24 = vsel %vm436_vm9, %v439_v21, %v405_v18  ;;  %v443_v25 = vsel %vm437_vm10, %v440_v22, %v416_v19  ;;  %v444_v26 = vsel %vm438_vm11, %v441_v23, %v427_v20  ;;  %3202 = vmatprep.mubr.msk.bf16.mxu1 %vm748_vm0, %v3200_v55  ;;  %3201 = vmatprep.mubr.msk.bf16.mxu0 %vm748_vm0, %v3200_v55  ;;  %vm597_vm4 = vcmask 7168  }
  0x18   : > { %vm3710_vm12 = vcmp.lt.s32.totalorder %v442_v24, 16  ;;  %vm3714_vm13 = vcmp.lt.s32.totalorder %v443_v25, 16  ;;  %vm3718_vm14 = vcmp.lt.s32.totalorder %v444_v26, 16  ;;  %vm626_vm5 = vcmask 1039360  }
  0x19   : > { %vm651_vm6 = vcmask 908288   ;;  %vm676_vm7 = vcmask 900096   ;;  %vm701_vm8 = vcmask 891904  }
  0x86   : > { %v455_v33 = vpop.permute.xlu0 %454 }
  0x87   : > { %v457_v34 = vsub.f32 %v448_v27, %v455_v33  ;;  %v458_v35 = vsub.f32 %v449_v28, %v455_v33  ;;  %v459_v36 = vsub.f32 %v450_v29, %v455_v33 }
  0x89   : > { %v468_v37 = vsel %vm3710_vm12, %v457_v34, 0.0  ;;  %v469_v38 = vsel %vm3714_vm13, %v458_v35, 0.0  ;;  %v470_v39 = vsel %vm3718_vm14, %v459_v36, 0.0 }
  0x8a   : > { %v471_v40 = vpack.c.bf16 %v468_v37, %v468_v37  ;;  %v472_v41 = vpack.c.bf16 %v469_v38, %v469_v38  ;;  %v473_v42 = vpack.c.bf16 %v470_v39, %v470_v39  ;;  %v3427_v43 = vpack.c.bf16 %v469_v38, %v468_v37 }
  0x8c   : > { %484 = vst [vmem:[#allocation2 + $0x4] sm:$0xff] %v3427_v43  ;;  %486 = vst.msk [vmem:[#allocation2 + $0xc] sm:$0xf] %vm485_vm15, %v473_v42 }
  0x8d   : > { %607 = vst [vmem:[#allocation3 + $0x60] sm:$0xf] %v471_v40  ;;  %608 = vst [vmem:[#allocation3 + $0x68] sm:$0xf] %v472_v41 }
  0x8e   : > { %609 = vst.msk [vmem:[#allocation3 + $0x70] sm:$0xf] %vm485_vm15, %v473_v42 }
  0x93   : > { %v488_v44 = vld [vmem:[#allocation2 + $0x8] sm:$0xff]  ;;  %v487_v45 = vld [vmem:[#allocation2] sm:$0xff] }
  0x94   : > { %v3173_v46 = vcombine.low %v488_v44, %v488_v44  ;;  %v3172_v47 = vcombine.high %v487_v45, %v487_v45  ;;  %v3174_v48 = vcombine.high %v488_v44, %v488_v44  ;;  %v3171_v49 = vcombine.low %v487_v45, %v487_v45  ;;  %v3478_v50 = vld [vmem:[#allocation2 + $0xc] ss:$0 sps:$4 sm:$0xff]   ;;  %v723_v43 = vld [vmem:[#allocation3 + $0x68] sm:$0xff] }
  0x95   : > { %v3479_v51 = vld [vmem:[#allocation2 + $0xc] ss:$0 sps:$4 sm:$0xff]  }
  0x96   : > { %503 = vrot.lane.b32.xlu1 %v3173_v46, %s3571_s21  ;;  %501 = vrot.lane.b32.xlu0 %v3172_v47, %s3571_s21  ;;  %v3480_v52 = vld [vmem:[#allocation2 + $0xc] ss:$0 sps:$4 sm:$0xff]  }
  0x97   : > { %v3481_v54 = vld [vmem:[#allocation2 + $0xc] ss:$0 sps:$4 sm:$0xff]  }
  0x9a   : > { %505 = vrot.lane.b32.xlu0 %v3174_v48, %s3571_s21  ;;  %499 = vrot.lane.b32.xlu1 %v3171_v49, %s3571_s21 }
  0x9e   : > { %533 = vrot.lane.b32.xlu0 %v3173_v46, %s3572_s22  ;;  %531 = vrot.lane.b32.xlu1 %v3172_v47, %s3572_s22 }
  0xa2   : > { %535 = vrot.lane.b32.xlu0 %v3174_v48, %s3572_s22  ;;  %529 = vrot.lane.b32.xlu1 %v3171_v49, %s3572_s22 }
  0xa6   : > { %563 = vrot.lane.b32.xlu0 %v3173_v46, %s3573_s23  ;;  %561 = vrot.lane.b32.xlu1 %v3172_v47, %s3573_s23 }
  0xaa   : > { %565 = vrot.lane.b32.xlu0 %v3174_v48, %s3573_s23  ;;  %559 = vrot.lane.b32.xlu1 %v3171_v49, %s3573_s23 }
  0xae   : > { %593 = vrot.lane.b32.xlu0 %v3173_v46, %s3574_s24  ;;  %591 = vrot.lane.b32.xlu1 %v3172_v47, %s3574_s24 }
  0xb2   : > { %595 = vrot.lane.b32.xlu0 %v3174_v48, %s3574_s24  ;;  %589 = vrot.lane.b32.xlu1 %v3171_v49, %s3574_s24  ;;  %v722_v48 = vld [vmem:[#allocation3 + $0x60] sm:$0xff]  ;;  %v724_v49 = vld [vmem:[#allocation3 + $0x70] sm:$0xff] }
  0xb6   : > { %624 = vrot.lane.b32.xlu0 %v3478_v50, %s3575_s25  ;;  %622 = vrot.lane.b32.xlu1 %v472_v41, %s3575_s25 }
  0xba   : > { %647 = vrot.lane.b32.xlu0 %v472_v41, %s3576_s26  ;;  %620 = vrot.lane.b32.xlu1 %v471_v40, %s3575_s25 }
  0xbe   : > { %645 = vrot.lane.b32.xlu0 %v471_v40, %s3576_s26  ;;  %649 = vrot.lane.b32.xlu1 %v3479_v51, %s3576_s26 }
  0xc2   : > { %674 = vrot.lane.b32.xlu0 %v3480_v52, %s3577_s27  ;;  %672 = vrot.lane.b32.xlu1 %v472_v41, %s3577_s27 }
  0xc6   : > { %697 = vrot.lane.b32.xlu0 %v472_v41, %s3578_s28  ;;  %670 = vrot.lane.b32.xlu1 %v471_v40, %s3577_s27 }
  0xca   : > { %695 = vrot.lane.b32.xlu0 %v471_v40, %s3578_s28  ;;  %699 = vrot.lane.b32.xlu1 %v3481_v54, %s3578_s28 }
  0xce   : > { %739 = vperm.xlu1 %3475, %v461_v56  }
 0x108   : > { %v504_v57 = vpop.permute.xlu1 %503  ;;  %v502_v58 = vpop.permute.xlu0 %501 }
 0x109   : > { %v509_v59 = vsel %vm507_vm1, %v502_v58, %v504_v57 }
 0x10a   : > { %515 = vst [vmem:[#allocation3 + $0x8] sm:$0xf] %v509_v59 }
 0x10c   : > { %v506_v60 = vpop.permute.xlu0 %505  ;;  %v500_v61 = vpop.permute.xlu1 %499 }
 0x10d   : > { %v510_v62 = vsel %vm507_vm1, %v504_v57, %v506_v60  ;;  %v508_v63 = vsel %vm507_vm1, %v500_v61, %v502_v58 }
 0x10e   : > { %516 = vst.msk [vmem:[#allocation3 + $0x10] sm:$0xf] %vm485_vm15, %v510_v62  ;;  %514 = vst [vmem:[#allocation3] sm:$0xf] %v508_v63 }
 0x110   : > { %v534_v0 = vpop.permute.xlu0 %533  ;;  %v532_v2 = vpop.permute.xlu1 %531 }
 0x111   : > { %v539_v3 = vsel %vm537_vm2, %v532_v2, %v534_v0  ;;  %v711_v4 = vld [vmem:[#allocation3 + $0x8] sm:$0xff] }
 0x112   : > { %545 = vst [vmem:[#allocation3 + $0x20] sm:$0xf] %v539_v3  ;;  %752 = vmatprep.subr.bf16.mxu0 %v711_v4 }
 0x114   : > { %v536_v5 = vpop.permute.xlu0 %535  ;;  %v530_v6 = vpop.permute.xlu1 %529 }
 0x115   : > { %v540_v7 = vsel %vm537_vm2, %v534_v0, %v536_v5  ;;  %v538_v8 = vsel %vm537_vm2, %v530_v6, %v532_v2  ;;  %v710_v9 = vld [vmem:[#allocation3] sm:$0xff]  ;;  %v712_v10 = vld [vmem:[#allocation3 + $0x10] sm:$0xff] }
 0x116   : > { %546 = vst.msk [vmem:[#allocation3 + $0x28] sm:$0xf] %vm485_vm15, %v540_v7  ;;  %544 = vst [vmem:[#allocation3 + $0x18] sm:$0xf] %v538_v8  ;;  %753 = vmatpush1.bf16.msra.mxu0 %v710_v9  ;;  %794 = vmatpush1.bf16.msra.mxu1 %v712_v10  ;;  %v3199_v8 = vcombine.low %v3759_v53, %v3759_v53 }
 0x117   : > { %795 = vmatprep.subr.bf16.mxu1 %v3570_v1 }
 0x118   : > { %v564_v11 = vpop.permute.xlu0 %563  ;;  %v562_v12 = vpop.permute.xlu1 %561 }
 0x119   : > { %v569_v13 = vsel %vm567_vm3, %v562_v12, %v564_v11  ;;  %v714_v14 = vld [vmem:[#allocation3 + $0x20] sm:$0xff] }
 0x11a   : > { %575 = vst [vmem:[#allocation3 + $0x38] sm:$0xf] %v569_v13  ;;  %754 = vmatprep.subr.bf16.mxu0 %v714_v14 }
 0x11c   : > { %v566_v15 = vpop.permute.xlu0 %565  ;;  %v560_v16 = vpop.permute.xlu1 %559 }
 0x11d   : > { %v570_v17 = vsel %vm567_vm3, %v564_v11, %v566_v15  ;;  %v568_v18 = vsel %vm567_vm3, %v560_v16, %v562_v12  ;;  %v713_v19 = vld [vmem:[#allocation3 + $0x18] sm:$0xff]  ;;  %v715_v20 = vld [vmem:[#allocation3 + $0x28] sm:$0xff] }
 0x11e   : > { %576 = vst.msk [vmem:[#allocation3 + $0x40] sm:$0xf] %vm485_vm15, %v570_v17  ;;  %574 = vst [vmem:[#allocation3 + $0x30] sm:$0xf] %v568_v18  ;;  %755 = vmatpush1.bf16.msra.mxu0 %v713_v19  ;;  %796 = vmatpush1.bf16.msra.mxu1 %v715_v20 }
 0x11f   : > { %797 = vmatprep.subr.bf16.mxu1 %v3570_v1 }
 0x120   : > { %v594_v21 = vpop.permute.xlu0 %593  ;;  %v592_v22 = vpop.permute.xlu1 %591 }
 0x121   : > { %v599_v23 = vsel %vm597_vm4, %v592_v22, %v594_v21  ;;  %v717_v24 = vld [vmem:[#allocation3 + $0x38] sm:$0xff] }
 0x122   : > { %605 = vst [vmem:[#allocation3 + $0x50] sm:$0xf] %v599_v23  ;;  %756 = vmatprep.subr.bf16.mxu0 %v717_v24 }
 0x124   : > { %v596_v25 = vpop.permute.xlu0 %595  ;;  %v590_v26 = vpop.permute.xlu1 %589 }
 0x125   : > { %v600_v27 = vsel %vm597_vm4, %v594_v21, %v596_v25  ;;  %v598_v28 = vsel %vm597_vm4, %v590_v26, %v592_v22  ;;  %v716_v29 = vld [vmem:[#allocation3 + $0x30] sm:$0xff]  ;;  %v718_v33 = vld [vmem:[#allocation3 + $0x40] sm:$0xff] }
 0x126   : > { %606 = vst.msk [vmem:[#allocation3 + $0x58] sm:$0xf] %vm485_vm15, %v600_v27  ;;  %604 = vst [vmem:[#allocation3 + $0x48] sm:$0xf] %v598_v28  ;;  %757 = vmatpush1.bf16.msra.mxu0 %v716_v29  ;;  %798 = vmatpush1.bf16.msra.mxu1 %v718_v33 }
 0x127   : > { %799 = vmatprep.subr.bf16.mxu1 %v3570_v1 }
 0x128   : > { %v625_v34 = vpop.permute.xlu0 %624  ;;  %v623_v35 = vpop.permute.xlu1 %622 }
 0x129   : > { %634 = vst.msk [vmem:[#allocation3 + $0x88] sm:$0xf] %vm485_vm15, %v625_v34  ;;  %v628_v36 = vsel %vm626_vm5, %v623_v35, %v625_v34  ;;  %v720_v37 = vld [vmem:[#allocation3 + $0x50] sm:$0xff] }
 0x12a   : > { %633 = vst [vmem:[#allocation3 + $0x80] sm:$0xf] %v628_v36  ;;  %758 = vmatprep.subr.bf16.mxu0 %v720_v37 }
 0x12c   : > { %v648_v38 = vpop.permute.xlu0 %647  ;;  %v621_v39 = vpop.permute.xlu1 %620 }
 0x12d   : > { %v627_v40 = vsel %vm626_vm5, %v621_v39, %v623_v35  ;;  %v719_v41 = vld [vmem:[#allocation3 + $0x48] sm:$0xff]  ;;  %v721_v42 = vld [vmem:[#allocation3 + $0x58] sm:$0xff] }
 0x12e   : > { %632 = vst [vmem:[#allocation3 + $0x78] sm:$0xf] %v627_v40  ;;  %759 = vmatpush1.bf16.msra.mxu0 %v719_v41  ;;  %800 = vmatpush1.bf16.msra.mxu1 %v721_v42  ;;  %v3855_v41 = vld [vmem:[%s4444_s4] sm:$0xff] }
 0x12f   : > { %760 = vmatprep.subr.bf16.mxu0 %v723_v43  ;;  %801 = vmatprep.subr.bf16.mxu1 %v3570_v1  ;;  %v3234_v43 = vcombine.high %v3855_v41, %v3855_v41 }
 0x130   : > { %v646_v44 = vpop.permute.xlu0 %645  ;;  %v650_v45 = vpop.permute.xlu1 %649  ;;  %v727_v56 = vld [vmem:[#allocation3 + $0x88] sm:$0xff] }
 0x131   : > { %v652_v46 = vsel %vm651_vm6, %v646_v44, %v648_v38  ;;  %v653_v47 = vsel %vm651_vm6, %v648_v38, %v650_v45  ;;  %659 = vst.msk [vmem:[#allocation3 + $0xa0] sm:$0xf] %vm485_vm15, %v650_v45  ;;  %v726_v50 = vld [vmem:[#allocation3 + $0x80] sm:$0xff]  ;;  %v834_v44 = vld [vmem:[%s4445_s5] sm:$0xff] }
 0x132   : > { %657 = vst [vmem:[#allocation3 + $0x90] sm:$0xf] %v652_v46  ;;  %658 = vst [vmem:[#allocation3 + $0x98] sm:$0xf] %v653_v47  ;;  %761 = vmatpush1.bf16.msra.mxu0 %v722_v48  ;;  %802 = vmatpush1.bf16.msra.mxu1 %v724_v49 }
 0x133   : > { %762 = vmatprep.subr.bf16.mxu0 %v726_v50  ;;  %803 = vmatprep.subr.bf16.mxu1 %v3570_v1 }
 0x134   : > { %v675_v51 = vpop.permute.xlu0 %674  ;;  %v673_v52 = vpop.permute.xlu1 %672 }
 0x135   : > { %684 = vst.msk [vmem:[#allocation3 + $0xb8] sm:$0xf] %vm485_vm15, %v675_v51  ;;  %v678_v54 = vsel %vm676_vm7, %v673_v52, %v675_v51  ;;  %v725_v55 = vld [vmem:[#allocation3 + $0x78] sm:$0xff] }
 0x136   : > { %683 = vst [vmem:[#allocation3 + $0xb0] sm:$0xf] %v678_v54  ;;  %763 = vmatpush1.bf16.msra.mxu0 %v725_v55  ;;  %804 = vmatpush1.bf16.msra.mxu1 %v727_v56 }
 0x137   : > { %805 = vmatprep.subr.bf16.mxu1 %v3570_v1 }
 0x138   : > { %v698_v57 = vpop.permute.xlu0 %697  ;;  %v671_v58 = vpop.permute.xlu1 %670  ;;  %v730_v59 = vld [vmem:[#allocation3 + $0xa0] sm:$0xff] }
 0x139   : > { %v677_v60 = vsel %vm676_vm7, %v671_v58, %v673_v52  ;;  %v729_v61 = vld [vmem:[#allocation3 + $0x98] sm:$0xff]  ;;  %v728_v62 = vld [vmem:[#allocation3 + $0x90] sm:$0xff] }
 0x13a   : > { %682 = vst [vmem:[#allocation3 + $0xa8] sm:$0xf] %v677_v60  ;;  %764 = vmatprep.subr.bf16.mxu0 %v729_v61  ;;  %806 = vmatpush1.bf16.msra.mxu1 %v730_v59 }
 0x13b   : > { %765 = vmatpush1.bf16.msra.mxu0 %v728_v62  ;;  %807 = vmatprep.subr.bf16.mxu1 %v3570_v1 }
 0x13c   : > { %v696_v63 = vpop.permute.xlu0 %695  ;;  %v700_v0 = vpop.permute.xlu1 %699  ;;  %v733_v2 = vld [vmem:[#allocation3 + $0xb8] sm:$0xff] }
 0x13d   : > { %v702_v3 = vsel %vm701_vm8, %v696_v63, %v698_v57  ;;  %v703_v4 = vsel %vm701_vm8, %v698_v57, %v700_v0  ;;  %709 = vst.msk [vmem:[#allocation3 + $0xd0] sm:$0xf] %vm485_vm15, %v700_v0  ;;  %v732_v5 = vld [vmem:[#allocation3 + $0xb0] sm:$0xff] }
 0x13e   : > { %707 = vst [vmem:[#allocation3 + $0xc0] sm:$0xf] %v702_v3  ;;  %708 = vst [vmem:[#allocation3 + $0xc8] sm:$0xf] %v703_v4  ;;  %766 = vmatprep.subr.bf16.mxu0 %v732_v5  ;;  %808 = vmatpush1.bf16.msra.mxu1 %v733_v2 }
 0x13f   : > { %809 = vmatprep.subr.bf16.mxu1 %v3570_v1 }
 0x141   : > { %v731_v6 = vld [vmem:[#allocation3 + $0xa8] sm:$0xff] }
 0x142   : > { %767 = vmatpush1.bf16.msra.mxu0 %v731_v6 }
 0x144   : > { %v736_v7 = vld [vmem:[#allocation3 + $0xd0] sm:$0xff] }
 0x145   : > { %810 = vmatpush1.bf16.msra.mxu1 %v736_v7  ;;  %v735_v9 = vld [vmem:[#allocation3 + $0xc8] sm:$0xff]  ;;  %v734_v10 = vld [vmem:[#allocation3 + $0xc0] sm:$0xff] }
 0x146   : > { %768 = vmatprep.subr.bf16.mxu0 %v735_v9  ;;  %1150 = vmatprep.subr.bf16.mxu1 %v3570_v1 }
 0x147   : > { %769 = vmatpush1.bf16.msra.mxu0 %v734_v10 }
 0x148   : > { %826 = vmatmul.mubr.bf16.vlgmr.msra.gmra.mrb[0].mxu1 %v3199_v8 }
 0x149   : > { %3236 = vmatprep.mubr.msk.bf16.mxu1 %vm748_vm0, %v3234_v43 }
 0x14a   : > { %785 = vmatmul.mubr.bf16.vlgmr.msra.gmra.mrb[0].mxu0 %v3199_v8 }
 0x14b   : > { %3235 = vmatprep.mubr.msk.bf16.mxu0 %vm748_vm0, %v3234_v43 }
 0x14d   : > { %v740_v11 = vpop.permute.xlu1 %739 }
 0x21b   : > { %v827_v12 = vpop.f32.mrb[0].mxu1 }
 0x21c   : > { %v3809_v13 = vadd.f32 %v827_v12, %v740_v11  ;;  %v829_v14 = vpop.f32.mrb[1].mxu1 }
 0x21d   : > { %v786_v15 = vpop.f32.mrb[0].mxu0  ;;  %v830_v16 = vpop.f32.mrb[2].mxu1 }
 0x21e   : > { %v837_v53 = vsel %vm3718_vm14, %v3809_v13, 0.0  ;;  %v3814_v17 = vadd.f32 %v786_v15, %v740_v11  ;;  %v788_v18 = vpop.f32.mrb[1].mxu0  ;;  %v831_v19 = vpop.f32.mrb[3].mxu1 }
 0x21f   : > { %v840_v20 = vpack.c.bf16 %v837_v53, %v837_v53  ;;  %v3816_v21 = vadd.f32 %v788_v18, %v740_v11  ;;  %v790_v22 = vpop.f32.mrb[2].mxu0 }
 0x220   : > { %v835_v23 = vsel %vm3710_vm12, %v3814_v17, 0.0  ;;  %v791_v24 = vpop.f32.mrb[3].mxu0 }
 0x221   : > { %971 = vst.msk [vmem:[#allocation3 + $0x70] sm:$0xf] %vm485_vm15, %v840_v20  ;;  %852 = vst.msk [vmem:[#allocation2 + $0xc] sm:$0xf] %vm485_vm15, %v840_v20  ;;  %v838_v25 = vpack.c.bf16 %v835_v23, %v835_v23  ;;  %v836_v26 = vsel %vm3714_vm13, %v3816_v21, 0.0 }
 0x222   : > { %v839_v27 = vpack.c.bf16 %v836_v26, %v836_v26  ;;  %v3429_v28 = vpack.c.bf16 %v836_v26, %v835_v23 }
 0x223   : > { %969 = vst [vmem:[#allocation3 + $0x60] sm:$0xf] %v838_v25 }
 0x224   : > { %970 = vst [vmem:[#allocation3 + $0x68] sm:$0xf] %v839_v27  ;;  %851 = vst [vmem:[#allocation2 + $0x4] sm:$0xff] %v3429_v28 }
 0x228   : > { %v3484_v29 = vld [vmem:[#allocation2 + $0xc] ss:$0 sps:$4 sm:$0xff]  }
 0x229   : > { %v3485_v33 = vld [vmem:[#allocation2 + $0xc] ss:$0 sps:$4 sm:$0xff]   ;;  %1010 = vrot.lane.b32.xlu0 %v3484_v29, %s3576_s26 }
 0x22a   : > { %986 = vrot.lane.b32.xlu1 %v3485_v33, %s3575_s25  ;;  %v3490_v40 = vld [vmem:[#allocation2 + $0xc] ss:$0 sps:$4 sm:$0xff]  }
 0x22b   : > { %v854_v34 = vld [vmem:[#allocation2 + $0x8] sm:$0xff]  ;;  %v853_v35 = vld [vmem:[#allocation2] sm:$0xff] }
 0x22c   : > { %v3207_v36 = vcombine.low %v854_v34, %v854_v34  ;;  %v3206_v37 = vcombine.high %v853_v35, %v853_v35  ;;  %v3205_v38 = vcombine.low %v853_v35, %v853_v35  ;;  %v3208_v39 = vcombine.high %v854_v34, %v854_v34  ;;  %v3491_v42 = vld [vmem:[#allocation2 + $0xc] ss:$0 sps:$4 sm:$0xff]  }
 0x22e   : > { %867 = vrot.lane.b32.xlu0 %v3206_v37, %s3571_s21  ;;  %869 = vrot.lane.b32.xlu1 %v3207_v36, %s3571_s21 }
 0x232   : > { %865 = vrot.lane.b32.xlu0 %v3205_v38, %s3571_s21  ;;  %871 = vrot.lane.b32.xlu1 %v3208_v39, %s3571_s21 }
 0x236   : > { %896 = vrot.lane.b32.xlu0 %v3206_v37, %s3572_s22  ;;  %898 = vrot.lane.b32.xlu1 %v3207_v36, %s3572_s22 }
 0x23a   : > { %894 = vrot.lane.b32.xlu0 %v3205_v38, %s3572_s22  ;;  %900 = vrot.lane.b32.xlu1 %v3208_v39, %s3572_s22 }
 0x23e   : > { %925 = vrot.lane.b32.xlu0 %v3206_v37, %s3573_s23  ;;  %927 = vrot.lane.b32.xlu1 %v3207_v36, %s3573_s23 }
 0x242   : > { %923 = vrot.lane.b32.xlu0 %v3205_v38, %s3573_s23  ;;  %929 = vrot.lane.b32.xlu1 %v3208_v39, %s3573_s23 }
 0x246   : > { %954 = vrot.lane.b32.xlu0 %v3206_v37, %s3574_s24  ;;  %956 = vrot.lane.b32.xlu1 %v3207_v36, %s3574_s24  ;;  %v1081_v37 = vld [vmem:[#allocation3 + $0x68] sm:$0xff] }
 0x24a   : > { %952 = vrot.lane.b32.xlu0 %v3205_v38, %s3574_s24  ;;  %958 = vrot.lane.b32.xlu1 %v3208_v39, %s3574_s24 }
 0x24e   : > { %984 = vrot.lane.b32.xlu0 %v839_v27, %s3575_s25  ;;  %1034 = vrot.lane.b32.xlu1 %v3490_v40, %s3577_s27 }
 0x252   : > { %982 = vrot.lane.b32.xlu0 %v838_v25, %s3575_s25  ;;  %1008 = vrot.lane.b32.xlu1 %v839_v27, %s3576_s26 }
 0x256   : > { %1032 = vrot.lane.b32.xlu0 %v839_v27, %s3577_s27  ;;  %1006 = vrot.lane.b32.xlu1 %v838_v25, %s3576_s26 }
 0x25a   : > { %1030 = vrot.lane.b32.xlu0 %v838_v25, %s3577_s27  ;;  %1056 = vrot.lane.b32.xlu1 %v839_v27, %s3578_s28 }
 0x25e   : > { %1058 = vrot.lane.b32.xlu0 %v3491_v42, %s3578_s28  ;;  %1054 = vrot.lane.b32.xlu1 %v838_v25, %s3578_s28  ;;  %v1080_v42 = vld [vmem:[#allocation3 + $0x60] sm:$0xff] }
 0x262   : > { %1097 = vperm.xlu0 %3474, %v834_v44  }
 0x29b   : > { %v3866_v45 = vpop.permute.xlu0 %1010 }
 0x29c   : > { %1019 = vst.msk [vmem:[#allocation3 + $0xa0] sm:$0xf] %vm485_vm15, %v3866_v45  ;;  %v3870_v46 = vpop.permute.xlu1 %986 }
 0x29d   : > { %995 = vst.msk [vmem:[#allocation3 + $0x88] sm:$0xf] %vm485_vm15, %v3870_v46 }
 0x2a0   : > { %v868_v47 = vpop.permute.xlu0 %867  ;;  %v870_v48 = vpop.permute.xlu1 %869 }
 0x2a1   : > { %v874_v49 = vsel %vm507_vm1, %v868_v47, %v870_v48 }
 0x2a2   : > { %880 = vst [vmem:[#allocation3 + $0x8] sm:$0xf] %v874_v49 }
 0x2a4   : > { %v866_v50 = vpop.permute.xlu0 %865  ;;  %v872_v51 = vpop.permute.xlu1 %871 }
 0x2a5   : > { %v873_v52 = vsel %vm507_vm1, %v866_v50, %v868_v47  ;;  %v875_v54 = vsel %vm507_vm1, %v870_v48, %v872_v51  ;;  %v1085_v50 = vld [vmem:[#allocation3 + $0x88] sm:$0xff] }
 0x2a6   : > { %879 = vst [vmem:[#allocation3] sm:$0xf] %v873_v52  ;;  %881 = vst.msk [vmem:[#allocation3 + $0x10] sm:$0xf] %vm485_vm15, %v875_v54 }
 0x2a8   : > { %v897_v55 = vpop.permute.xlu0 %896  ;;  %v899_v56 = vpop.permute.xlu1 %898 }
 0x2a9   : > { %v903_v57 = vsel %vm537_vm2, %v897_v55, %v899_v56  ;;  %v1069_v58 = vld [vmem:[#allocation3 + $0x8] sm:$0xff] }
 0x2aa   : > { %909 = vst [vmem:[#allocation3 + $0x20] sm:$0xf] %v903_v57  ;;  %1109 = vmatprep.subr.bf16.mxu0 %v1069_v58 }
 0x2ac   : > { %v895_v59 = vpop.permute.xlu0 %894  ;;  %v901_v60 = vpop.permute.xlu1 %900 }
 0x2ad   : > { %v902_v61 = vsel %vm537_vm2, %v895_v59, %v897_v55  ;;  %v1068_v62 = vld [vmem:[#allocation3] sm:$0xff]  ;;  %v904_v63 = vsel %vm537_vm2, %v899_v56, %v901_v60  ;;  %v1070_v0 = vld [vmem:[#allocation3 + $0x10] sm:$0xff] }
 0x2ae   : > { %908 = vst [vmem:[#allocation3 + $0x18] sm:$0xf] %v902_v61  ;;  %1110 = vmatpush1.bf16.msra.mxu0 %v1068_v62  ;;  %910 = vst.msk [vmem:[#allocation3 + $0x28] sm:$0xf] %vm485_vm15, %v904_v63  ;;  %1151 = vmatpush1.bf16.msra.mxu1 %v1070_v0  ;;  %v1088_v59 = vld [vmem:[#allocation3 + $0xa0] sm:$0xff] }
 0x2af   : > { %1152 = vmatprep.subr.bf16.mxu1 %v3570_v1 }
 0x2b0   : > { %v926_v2 = vpop.permute.xlu0 %925  ;;  %v928_v3 = vpop.permute.xlu1 %927 }
 0x2b1   : > { %v932_v4 = vsel %vm567_vm3, %v926_v2, %v928_v3  ;;  %v1072_v5 = vld [vmem:[#allocation3 + $0x20] sm:$0xff] }
 0x2b2   : > { %938 = vst [vmem:[#allocation3 + $0x38] sm:$0xf] %v932_v4  ;;  %1111 = vmatprep.subr.bf16.mxu0 %v1072_v5 }
 0x2b4   : > { %v924_v6 = vpop.permute.xlu0 %923  ;;  %v930_v7 = vpop.permute.xlu1 %929 }
 0x2b5   : > { %v931_v8 = vsel %vm567_vm3, %v924_v6, %v926_v2  ;;  %v1071_v9 = vld [vmem:[#allocation3 + $0x18] sm:$0xff]  ;;  %v933_v10 = vsel %vm567_vm3, %v928_v3, %v930_v7  ;;  %v1073_v11 = vld [vmem:[#allocation3 + $0x28] sm:$0xff]  ;;  %v3233_v2 = vcombine.low %v3855_v41, %v3855_v41 }
 0x2b6   : > { %937 = vst [vmem:[#allocation3 + $0x30] sm:$0xf] %v931_v8  ;;  %1112 = vmatpush1.bf16.msra.mxu0 %v1071_v9  ;;  %939 = vst.msk [vmem:[#allocation3 + $0x40] sm:$0xf] %vm485_vm15, %v933_v10  ;;  %1153 = vmatpush1.bf16.msra.mxu1 %v1073_v11 }
 0x2b7   : > { %1154 = vmatprep.subr.bf16.mxu1 %v3570_v1 }
 0x2b8   : > { %v955_v12 = vpop.permute.xlu0 %954  ;;  %v957_v14 = vpop.permute.xlu1 %956 }
 0x2b9   : > { %v961_v15 = vsel %vm597_vm4, %v955_v12, %v957_v14  ;;  %v1075_v16 = vld [vmem:[#allocation3 + $0x38] sm:$0xff] }
 0x2ba   : > { %967 = vst [vmem:[#allocation3 + $0x50] sm:$0xf] %v961_v15  ;;  %1113 = vmatprep.subr.bf16.mxu0 %v1075_v16 }
 0x2bc   : > { %v953_v53 = vpop.permute.xlu0 %952  ;;  %v959_v18 = vpop.permute.xlu1 %958 }
 0x2bd   : > { %v960_v19 = vsel %vm597_vm4, %v953_v53, %v955_v12  ;;  %v1074_v20 = vld [vmem:[#allocation3 + $0x30] sm:$0xff]  ;;  %v962_v22 = vsel %vm597_vm4, %v957_v14, %v959_v18  ;;  %v1076_v23 = vld [vmem:[#allocation3 + $0x40] sm:$0xff] }
 0x2be   : > { %966 = vst [vmem:[#allocation3 + $0x48] sm:$0xf] %v960_v19  ;;  %1114 = vmatpush1.bf16.msra.mxu0 %v1074_v20  ;;  %968 = vst.msk [vmem:[#allocation3 + $0x58] sm:$0xf] %vm485_vm15, %v962_v22  ;;  %1155 = vmatpush1.bf16.msra.mxu1 %v1076_v23 }
 0x2bf   : > { %1156 = vmatprep.subr.bf16.mxu1 %v3570_v1 }
 0x2c0   : > { %v985_v24 = vpop.permute.xlu0 %984  ;;  %v1035_v25 = vpop.permute.xlu1 %1034 }
 0x2c1   : > { %v989_v26 = vsel %vm626_vm5, %v985_v24, %v3870_v46  ;;  %1043 = vst.msk [vmem:[#allocation3 + $0xb8] sm:$0xf] %vm485_vm15, %v1035_v25  ;;  %v1078_v27 = vld [vmem:[#allocation3 + $0x50] sm:$0xff] }
 0x2c2   : > { %994 = vst [vmem:[#allocation3 + $0x80] sm:$0xf] %v989_v26  ;;  %1115 = vmatprep.subr.bf16.mxu0 %v1078_v27 }
 0x2c4   : > { %v983_v28 = vpop.permute.xlu0 %982  ;;  %v1009_v29 = vpop.permute.xlu1 %1008 }
 0x2c5   : > { %v988_v33 = vsel %vm626_vm5, %v983_v28, %v985_v24  ;;  %v1077_v34 = vld [vmem:[#allocation3 + $0x48] sm:$0xff]  ;;  %v1013_v35 = vsel %vm651_vm6, %v1009_v29, %v3866_v45  ;;  %v1079_v36 = vld [vmem:[#allocation3 + $0x58] sm:$0xff]  ;;  %v1082_v45 = vld [vmem:[#allocation3 + $0x70] sm:$0xff] }
 0x2c6   : > { %993 = vst [vmem:[#allocation3 + $0x78] sm:$0xf] %v988_v33  ;;  %1116 = vmatpush1.bf16.msra.mxu0 %v1077_v34  ;;  %1018 = vst [vmem:[#allocation3 + $0x98] sm:$0xf] %v1013_v35  ;;  %1157 = vmatpush1.bf16.msra.mxu1 %v1079_v36 }
 0x2c7   : > { %1117 = vmatprep.subr.bf16.mxu0 %v1081_v37  ;;  %1158 = vmatprep.subr.bf16.mxu1 %v3570_v1 }
 0x2c8   : > { %v1033_v38 = vpop.permute.xlu0 %1032  ;;  %v1007_v39 = vpop.permute.xlu1 %1006  ;;  %v1091_v61 = vld [vmem:[#allocation3 + $0xb8] sm:$0xff] }
 0x2c9   : > { %v1037_v40 = vsel %vm676_vm7, %v1033_v38, %v1035_v25  ;;  %v1084_v43 = vld [vmem:[#allocation3 + $0x80] sm:$0xff]  ;;  %v1012_v44 = vsel %vm651_vm6, %v1007_v39, %v1009_v29 }
 0x2ca   : > { %1042 = vst [vmem:[#allocation3 + $0xb0] sm:$0xf] %v1037_v40  ;;  %1118 = vmatpush1.bf16.msra.mxu0 %v1080_v42  ;;  %1017 = vst [vmem:[#allocation3 + $0x90] sm:$0xf] %v1012_v44  ;;  %1159 = vmatpush1.bf16.msra.mxu1 %v1082_v45  ;;  %v3238_v42 = vld [vmem:[%s4445_s5 + $0x8] sm:$0xff] }
 0x2cb   : > { %1119 = vmatprep.subr.bf16.mxu0 %v1084_v43  ;;  %1160 = vmatprep.subr.bf16.mxu1 %v3570_v1 }
 0x2cc   : > { %v1031_v46 = vpop.permute.xlu0 %1030  ;;  %v1057_v47 = vpop.permute.xlu1 %1056 }
 0x2cd   : > { %v1036_v48 = vsel %vm676_vm7, %v1031_v46, %v1033_v38  ;;  %v1083_v49 = vld [vmem:[#allocation3 + $0x78] sm:$0xff] }
 0x2ce   : > { %1041 = vst [vmem:[#allocation3 + $0xa8] sm:$0xf] %v1036_v48  ;;  %1120 = vmatpush1.bf16.msra.mxu0 %v1083_v49  ;;  %v1087_v51 = vld [vmem:[#allocation3 + $0x98] sm:$0xff]  ;;  %1161 = vmatpush1.bf16.msra.mxu1 %v1085_v50 }
 0x2cf   : > { %1121 = vmatprep.subr.bf16.mxu0 %v1087_v51  ;;  %1162 = vmatprep.subr.bf16.mxu1 %v3570_v1  ;;  %v3950_v38 = vld [vmem:[%s4444_s4 + $0x8] sm:$0xff] }
 0x2d0   : > { %v1059_v52 = vpop.permute.xlu0 %1058  ;;  %v1055_v54 = vpop.permute.xlu1 %1054  ;;  %v3270_v40 = vcombine.high %v3950_v38, %v3950_v38 }
 0x2d1   : > { %v1061_v55 = vsel %vm701_vm8, %v1057_v47, %v1059_v52  ;;  %1067 = vst.msk [vmem:[#allocation3 + $0xd0] sm:$0xf] %vm485_vm15, %v1059_v52  ;;  %v1090_v56 = vld [vmem:[#allocation3 + $0xb0] sm:$0xff]  ;;  %v1060_v57 = vsel %vm701_vm8, %v1055_v54, %v1057_v47 }
 0x2d2   : > { %1066 = vst [vmem:[#allocation3 + $0xc8] sm:$0xf] %v1061_v55  ;;  %v1086_v58 = vld [vmem:[#allocation3 + $0x90] sm:$0xff]  ;;  %1065 = vst [vmem:[#allocation3 + $0xc0] sm:$0xf] %v1060_v57  ;;  %1163 = vmatpush1.bf16.msra.mxu1 %v1088_v59 }
 0x2d3   : > { %1122 = vmatpush1.bf16.msra.mxu0 %v1086_v58  ;;  %1164 = vmatprep.subr.bf16.mxu1 %v3570_v1 }
 0x2d4   : > { %1123 = vmatprep.subr.bf16.mxu0 %v1090_v56 }
 0x2d5   : > { %v1089_v60 = vld [vmem:[#allocation3 + $0xa8] sm:$0xff] }
 0x2d6   : > { %1165 = vmatpush1.bf16.msra.mxu1 %v1091_v61 }
 0x2d7   : > { %1124 = vmatpush1.bf16.msra.mxu0 %v1089_v60  ;;  %1166 = vmatprep.subr.bf16.mxu1 %v3570_v1 }
 0x2d8   : > { %v1094_v62 = vld [vmem:[#allocation3 + $0xd0] sm:$0xff] }
 0x2d9   : > { %v1093_v63 = vld [vmem:[#allocation3 + $0xc8] sm:$0xff]  ;;  %v1092_v0 = vld [vmem:[#allocation3 + $0xc0] sm:$0xff] }
 0x2da   : > { %1125 = vmatprep.subr.bf16.mxu0 %v1093_v63  ;;  %1167 = vmatpush1.bf16.msra.mxu1 %v1094_v62 }
 0x2db   : > { %1126 = vmatpush1.bf16.msra.mxu0 %v1092_v0  ;;  %1512 = vmatprep.subr.bf16.mxu1 %v3570_v1 }
 0x2dd   : > { %1183 = vmatmul.mubr.bf16.vlgmr.msra.gmra.mrb[4].mxu1 %v3233_v2 }
 0x2de   : > { %1142 = vmatmul.mubr.bf16.vlgmr.msra.gmra.mrb[4].mxu0 %v3233_v2  ;;  %3272 = vmatprep.mubr.msk.bf16.mxu1 %vm748_vm0, %v3270_v40 }
 0x2df   : > { %3271 = vmatprep.mubr.msk.bf16.mxu0 %vm748_vm0, %v3270_v40 }
 0x2e1   : > { %v1098_v3 = vpop.permute.xlu0 %1097 }
 0x3b0   : > { %v1184_v4 = vpop.f32.mrb[4].mxu1 }
 0x3b1   : > { %v1143_v5 = vpop.f32.mrb[4].mxu0  ;;  %v1185_v6 = vadd.f32 %v1184_v4, %v1098_v3  ;;  %v1186_v8 = vpop.f32.mrb[5].mxu1 }
 0x3b2   : > { %v1144_v7 = vadd.f32 %v1143_v5, %v1098_v3  ;;  %v1145_v9 = vpop.f32.mrb[5].mxu0  ;;  %v1187_v11 = vpop.f32.mrb[6].mxu1 }
 0x3b3   : > { %v1146_v10 = vadd.f32 %v1145_v9, %v1098_v3  ;;  %v1147_v12 = vpop.f32.mrb[6].mxu0  ;;  %v1192_v14 = vmax.f32 %v1185_v6, 0.0  ;;  %v1188_v16 = vpop.f32.mrb[7].mxu1 }
 0x3b4   : > { %v1190_v15 = vmax.f32 %v1144_v7, 0.0  ;;  %v1148_v41 = vpop.f32.mrb[7].mxu0 }
 0x3b5   : > { %v1191_v53 = vmax.f32 %v1146_v10, 0.0  ;;  %v1199_v18 = vsel %vm3718_vm14, %v1192_v14, 0.0 }
 0x3b6   : > { %v1197_v19 = vsel %vm3710_vm12, %v1190_v15, 0.0  ;;  %v1202_v20 = vpack.c.bf16 %v1199_v18, %v1199_v18 }
 0x3b7   : > { %v1200_v22 = vpack.c.bf16 %v1197_v19, %v1197_v19  ;;  %v1198_v23 = vsel %vm3714_vm13, %v1191_v53, 0.0 }
 0x3b8   : > { %v1201_v24 = vpack.c.bf16 %v1198_v23, %v1198_v23  ;;  %v3431_v25 = vpack.c.bf16 %v1198_v23, %v1197_v19  ;;  %1333 = vst.msk [vmem:[#allocation3 + $0x70] sm:$0xf] %vm485_vm15, %v1202_v20  ;;  %1214 = vst.msk [vmem:[#allocation2 + $0xc] sm:$0xf] %vm485_vm15, %v1202_v20 }
 0x3b9   : > { %1331 = vst [vmem:[#allocation3 + $0x60] sm:$0xf] %v1200_v22 }
 0x3ba   : > { %1332 = vst [vmem:[#allocation3 + $0x68] sm:$0xf] %v1201_v24  ;;  %1213 = vst [vmem:[#allocation2 + $0x4] sm:$0xff] %v3431_v25 }
 0x3bf   : > { %v3494_v26 = vld [vmem:[#allocation2 + $0xc] ss:$0 sps:$4 sm:$0xff]  }
 0x3c0   : > { %v3495_v27 = vld [vmem:[#allocation2 + $0xc] ss:$0 sps:$4 sm:$0xff]   ;;  %1372 = vrot.lane.b32.xlu1 %v3494_v26, %s3576_s26 }
 0x3c1   : > { %v1216_v28 = vld [vmem:[#allocation2 + $0x8] sm:$0xff]  ;;  %v1215_v29 = vld [vmem:[#allocation2] sm:$0xff]  ;;  %1348 = vrot.lane.b32.xlu0 %v3495_v27, %s3575_s25 }
 0x3c2   : > { %v3242_v33 = vcombine.high %v1215_v29, %v1215_v29  ;;  %v3243_v34 = vcombine.low %v1216_v28, %v1216_v28  ;;  %v3241_v35 = vcombine.low %v1215_v29, %v1215_v29  ;;  %v3244_v36 = vcombine.high %v1216_v28, %v1216_v28  ;;  %v3500_v37 = vld [vmem:[#allocation2 + $0xc] ss:$0 sps:$4 sm:$0xff]  }
 0x3c3   : > { %v3501_v39 = vld [vmem:[#allocation2 + $0xc] ss:$0 sps:$4 sm:$0xff]  }
 0x3c4   : > { %1229 = vrot.lane.b32.xlu1 %v3242_v33, %s3571_s21 }
 0x3c5   : > { %1231 = vrot.lane.b32.xlu0 %v3243_v34, %s3571_s21 }
 0x3c8   : > { %1227 = vrot.lane.b32.xlu1 %v3241_v35, %s3571_s21 }
 0x3c9   : > { %1233 = vrot.lane.b32.xlu0 %v3244_v36, %s3571_s21 }
 0x3cc   : > { %1258 = vrot.lane.b32.xlu1 %v3242_v33, %s3572_s22 }
 0x3cd   : > { %1260 = vrot.lane.b32.xlu0 %v3243_v34, %s3572_s22 }
 0x3d0   : > { %1256 = vrot.lane.b32.xlu1 %v3241_v35, %s3572_s22 }
 0x3d1   : > { %1262 = vrot.lane.b32.xlu0 %v3244_v36, %s3572_s22 }
 0x3d4   : > { %1287 = vrot.lane.b32.xlu1 %v3242_v33, %s3573_s23 }
 0x3d5   : > { %1289 = vrot.lane.b32.xlu0 %v3243_v34, %s3573_s23 }
 0x3d8   : > { %1285 = vrot.lane.b32.xlu1 %v3241_v35, %s3573_s23 }
 0x3d9   : > { %1291 = vrot.lane.b32.xlu0 %v3244_v36, %s3573_s23 }
 0x3dc   : > { %1316 = vrot.lane.b32.xlu1 %v3242_v33, %s3574_s24 }
 0x3dd   : > { %1318 = vrot.lane.b32.xlu0 %v3243_v34, %s3574_s24  ;;  %v1443_v34 = vld [vmem:[#allocation3 + $0x68] sm:$0xff] }
 0x3e0   : > { %1314 = vrot.lane.b32.xlu1 %v3241_v35, %s3574_s24 }
 0x3e1   : > { %1320 = vrot.lane.b32.xlu0 %v3244_v36, %s3574_s24 }
 0x3e4   : > { %1346 = vrot.lane.b32.xlu1 %v1201_v24, %s3575_s25 }
 0x3e5   : > { %1396 = vrot.lane.b32.xlu0 %v3500_v37, %s3577_s27 }
 0x3e8   : > { %1344 = vrot.lane.b32.xlu1 %v1200_v22, %s3575_s25 }
 0x3e9   : > { %1370 = vrot.lane.b32.xlu0 %v1201_v24, %s3576_s26 }
 0x3ec   : > { %1394 = vrot.lane.b32.xlu1 %v1201_v24, %s3577_s27 }
 0x3ed   : > { %1368 = vrot.lane.b32.xlu0 %v1200_v22, %s3576_s26 }
 0x3f0   : > { %1392 = vrot.lane.b32.xlu1 %v1200_v22, %s3577_s27 }
 0x3f1   : > { %1418 = vrot.lane.b32.xlu0 %v1201_v24, %s3578_s28 }
 0x3f4   : > { %1420 = vrot.lane.b32.xlu1 %v3501_v39, %s3578_s28  ;;  %v1442_v39 = vld [vmem:[#allocation3 + $0x60] sm:$0xff] }
 0x3f5   : > { %1416 = vrot.lane.b32.xlu0 %v1200_v22, %s3578_s28 }
 0x3f8   : > { %1459 = vperm.xlu1 %3475, %v3238_v42  }
 0x432   : > { %v3961_v43 = vpop.permute.xlu1 %1372 }
 0x433   : > { %1381 = vst.msk [vmem:[#allocation3 + $0xa0] sm:$0xf] %vm485_vm15, %v3961_v43  ;;  %v3965_v44 = vpop.permute.xlu0 %1348 }
 0x434   : > { %1357 = vst.msk [vmem:[#allocation3 + $0x88] sm:$0xf] %vm485_vm15, %v3965_v44 }
 0x436   : > { %v1230_v45 = vpop.permute.xlu1 %1229 }
 0x437   : > { %v1232_v46 = vpop.permute.xlu0 %1231 }
 0x438   : > { %v1236_v47 = vsel %vm507_vm1, %v1230_v45, %v1232_v46 }
 0x439   : > { %1242 = vst [vmem:[#allocation3 + $0x8] sm:$0xf] %v1236_v47 }
 0x43a   : > { %v1228_v48 = vpop.permute.xlu1 %1227 }
 0x43b   : > { %v1234_v49 = vpop.permute.xlu0 %1233  ;;  %v1235_v50 = vsel %vm507_vm1, %v1228_v48, %v1230_v45  ;;  %v1447_v48 = vld [vmem:[#allocation3 + $0x88] sm:$0xff] }
 0x43c   : > { %v1237_v51 = vsel %vm507_vm1, %v1232_v46, %v1234_v49  ;;  %1241 = vst [vmem:[#allocation3] sm:$0xf] %v1235_v50 }
 0x43d   : > { %1243 = vst.msk [vmem:[#allocation3 + $0x10] sm:$0xf] %vm485_vm15, %v1237_v51 }
 0x43e   : > { %v1259_v52 = vpop.permute.xlu1 %1258 }
 0x43f   : > { %v1261_v54 = vpop.permute.xlu0 %1260 }
 0x440   : > { %v1265_v55 = vsel %vm537_vm2, %v1259_v52, %v1261_v54  ;;  %v1431_v56 = vld [vmem:[#allocation3 + $0x8] sm:$0xff] }
 0x441   : > { %1271 = vst [vmem:[#allocation3 + $0x20] sm:$0xf] %v1265_v55  ;;  %1471 = vmatprep.subr.bf16.mxu0 %v1431_v56 }
 0x442   : > { %v1257_v57 = vpop.permute.xlu1 %1256 }
 0x443   : > { %v1263_v58 = vpop.permute.xlu0 %1262  ;;  %v1264_v59 = vsel %vm537_vm2, %v1257_v57, %v1259_v52  ;;  %v1430_v60 = vld [vmem:[#allocation3] sm:$0xff] }
 0x444   : > { %v1266_v61 = vsel %vm537_vm2, %v1261_v54, %v1263_v58  ;;  %1270 = vst [vmem:[#allocation3 + $0x18] sm:$0xf] %v1264_v59  ;;  %1472 = vmatpush1.bf16.msra.mxu0 %v1430_v60  ;;  %v1432_v62 = vld [vmem:[#allocation3 + $0x10] sm:$0xff]  ;;  %v1450_v57 = vld [vmem:[#allocation3 + $0xa0] sm:$0xff] }
 0x445   : > { %1272 = vst.msk [vmem:[#allocation3 + $0x28] sm:$0xf] %vm485_vm15, %v1266_v61  ;;  %1513 = vmatpush1.bf16.msra.mxu1 %v1432_v62 }
 0x446   : > { %v1288_v63 = vpop.permute.xlu1 %1287  ;;  %1514 = vmatprep.subr.bf16.mxu1 %v3570_v1 }
 0x447   : > { %v1290_v0 = vpop.permute.xlu0 %1289 }
 0x448   : > { %v1294_v2 = vsel %vm567_vm3, %v1288_v63, %v1290_v0  ;;  %v1434_v3 = vld [vmem:[#allocation3 + $0x20] sm:$0xff] }
 0x449   : > { %1300 = vst [vmem:[#allocation3 + $0x38] sm:$0xf] %v1294_v2  ;;  %1473 = vmatprep.subr.bf16.mxu0 %v1434_v3 }
 0x44a   : > { %v1286_v4 = vpop.permute.xlu1 %1285 }
 0x44b   : > { %v1292_v5 = vpop.permute.xlu0 %1291  ;;  %v1293_v6 = vsel %vm567_vm3, %v1286_v4, %v1288_v63  ;;  %v1433_v7 = vld [vmem:[#allocation3 + $0x18] sm:$0xff]  ;;  %v3269_v63 = vcombine.low %v3950_v38, %v3950_v38 }
 0x44c   : > { %v1295_v8 = vsel %vm567_vm3, %v1290_v0, %v1292_v5  ;;  %1299 = vst [vmem:[#allocation3 + $0x30] sm:$0xf] %v1293_v6  ;;  %1474 = vmatpush1.bf16.msra.mxu0 %v1433_v7  ;;  %v1435_v9 = vld [vmem:[#allocation3 + $0x28] sm:$0xff] }
 0x44d   : > { %1301 = vst.msk [vmem:[#allocation3 + $0x40] sm:$0xf] %vm485_vm15, %v1295_v8  ;;  %1515 = vmatpush1.bf16.msra.mxu1 %v1435_v9 }
 0x44e   : > { %v1317_v10 = vpop.permute.xlu1 %1316  ;;  %1516 = vmatprep.subr.bf16.mxu1 %v3570_v1 }
 0x44f   : > { %v1319_v11 = vpop.permute.xlu0 %1318 }
 0x450   : > { %v1323_v12 = vsel %vm597_vm4, %v1317_v10, %v1319_v11  ;;  %v1437_v14 = vld [vmem:[#allocation3 + $0x38] sm:$0xff] }
 0x451   : > { %1329 = vst [vmem:[#allocation3 + $0x50] sm:$0xf] %v1323_v12  ;;  %1475 = vmatprep.subr.bf16.mxu0 %v1437_v14 }
 0x452   : > { %v1315_v15 = vpop.permute.xlu1 %1314 }
 0x453   : > { %v1321_v16 = vpop.permute.xlu0 %1320  ;;  %v1322_v41 = vsel %vm597_vm4, %v1315_v15, %v1317_v10  ;;  %v1436_v53 = vld [vmem:[#allocation3 + $0x30] sm:$0xff] }
 0x454   : > { %v1324_v18 = vsel %vm597_vm4, %v1319_v11, %v1321_v16  ;;  %1328 = vst [vmem:[#allocation3 + $0x48] sm:$0xf] %v1322_v41  ;;  %1476 = vmatpush1.bf16.msra.mxu0 %v1436_v53  ;;  %v1438_v19 = vld [vmem:[#allocation3 + $0x40] sm:$0xff] }
 0x455   : > { %1330 = vst.msk [vmem:[#allocation3 + $0x58] sm:$0xf] %vm485_vm15, %v1324_v18  ;;  %1517 = vmatpush1.bf16.msra.mxu1 %v1438_v19 }
 0x456   : > { %v1347_v20 = vpop.permute.xlu1 %1346  ;;  %1518 = vmatprep.subr.bf16.mxu1 %v3570_v1 }
 0x457   : > { %v1397_v22 = vpop.permute.xlu0 %1396  ;;  %v1351_v23 = vsel %vm626_vm5, %v1347_v20, %v3965_v44 }
 0x458   : > { %1405 = vst.msk [vmem:[#allocation3 + $0xb8] sm:$0xf] %vm485_vm15, %v1397_v22  ;;  %1356 = vst [vmem:[#allocation3 + $0x80] sm:$0xf] %v1351_v23  ;;  %v1440_v24 = vld [vmem:[#allocation3 + $0x50] sm:$0xff] }
 0x459   : > { %1477 = vmatprep.subr.bf16.mxu0 %v1440_v24 }
 0x45a   : > { %v1345_v25 = vpop.permute.xlu1 %1344 }
 0x45b   : > { %v1371_v26 = vpop.permute.xlu0 %1370  ;;  %v1350_v27 = vsel %vm626_vm5, %v1345_v25, %v1347_v20  ;;  %v1439_v28 = vld [vmem:[#allocation3 + $0x48] sm:$0xff] }
 0x45c   : > { %v1375_v29 = vsel %vm651_vm6, %v1371_v26, %v3961_v43  ;;  %1355 = vst [vmem:[#allocation3 + $0x78] sm:$0xf] %v1350_v27  ;;  %1478 = vmatpush1.bf16.msra.mxu0 %v1439_v28  ;;  %v1441_v33 = vld [vmem:[#allocation3 + $0x58] sm:$0xff]  ;;  %v1444_v43 = vld [vmem:[#allocation3 + $0x70] sm:$0xff] }
 0x45d   : > { %1380 = vst [vmem:[#allocation3 + $0x98] sm:$0xf] %v1375_v29  ;;  %1519 = vmatpush1.bf16.msra.mxu1 %v1441_v33  ;;  %1479 = vmatprep.subr.bf16.mxu0 %v1443_v34 }
 0x45e   : > { %v1395_v35 = vpop.permute.xlu1 %1394  ;;  %1520 = vmatprep.subr.bf16.mxu1 %v3570_v1 }
 0x45f   : > { %v1369_v36 = vpop.permute.xlu0 %1368  ;;  %v1399_v37 = vsel %vm676_vm7, %v1395_v35, %v1397_v22  ;;  %v1446_v40 = vld [vmem:[#allocation3 + $0x80] sm:$0xff]  ;;  %v1453_v59 = vld [vmem:[#allocation3 + $0xb8] sm:$0xff] }
 0x460   : > { %v1374_v42 = vsel %vm651_vm6, %v1369_v36, %v1371_v26  ;;  %1404 = vst [vmem:[#allocation3 + $0xb0] sm:$0xf] %v1399_v37  ;;  %1480 = vmatpush1.bf16.msra.mxu0 %v1442_v39  ;;  %v4057_v39 = vld [vmem:[%s4444_s4 + $0x10] sm:$0xff] }
 0x461   : > { %1379 = vst [vmem:[#allocation3 + $0x90] sm:$0xf] %v1374_v42  ;;  %1521 = vmatpush1.bf16.msra.mxu1 %v1444_v43  ;;  %1481 = vmatprep.subr.bf16.mxu0 %v1446_v40  ;;  %v3306_v42 = vcombine.high %v4057_v39, %v4057_v39  ;;  %v3274_v43 = vld [vmem:[%s4445_s5 + $0x10] sm:$0xff] }
 0x462   : > { %v1393_v44 = vpop.permute.xlu1 %1392  ;;  %1522 = vmatprep.subr.bf16.mxu1 %v3570_v1 }
 0x463   : > { %v1419_v45 = vpop.permute.xlu0 %1418  ;;  %v1398_v46 = vsel %vm676_vm7, %v1393_v44, %v1395_v35  ;;  %v1445_v47 = vld [vmem:[#allocation3 + $0x78] sm:$0xff] }
 0x464   : > { %1403 = vst [vmem:[#allocation3 + $0xa8] sm:$0xf] %v1398_v46  ;;  %1482 = vmatpush1.bf16.msra.mxu0 %v1445_v47  ;;  %v1449_v49 = vld [vmem:[#allocation3 + $0x98] sm:$0xff] }
 0x465   : > { %1523 = vmatpush1.bf16.msra.mxu1 %v1447_v48  ;;  %1483 = vmatprep.subr.bf16.mxu0 %v1449_v49 }
 0x466   : > { %v1421_v50 = vpop.permute.xlu1 %1420  ;;  %1524 = vmatprep.subr.bf16.mxu1 %v3570_v1 }
 0x467   : > { %v1417_v51 = vpop.permute.xlu0 %1416  ;;  %v1423_v52 = vsel %vm701_vm8, %v1419_v45, %v1421_v50  ;;  %1429 = vst.msk [vmem:[#allocation3 + $0xd0] sm:$0xf] %vm485_vm15, %v1421_v50  ;;  %v1452_v54 = vld [vmem:[#allocation3 + $0xb0] sm:$0xff] }
 0x468   : > { %v1422_v55 = vsel %vm701_vm8, %v1417_v51, %v1419_v45  ;;  %1428 = vst [vmem:[#allocation3 + $0xc8] sm:$0xf] %v1423_v52  ;;  %v1448_v56 = vld [vmem:[#allocation3 + $0x90] sm:$0xff] }
 0x469   : > { %1427 = vst [vmem:[#allocation3 + $0xc0] sm:$0xf] %v1422_v55  ;;  %1484 = vmatpush1.bf16.msra.mxu0 %v1448_v56  ;;  %1525 = vmatpush1.bf16.msra.mxu1 %v1450_v57 }
 0x46a   : > { %1485 = vmatprep.subr.bf16.mxu0 %v1452_v54  ;;  %1526 = vmatprep.subr.bf16.mxu1 %v3570_v1 }
 0x46b   : > { %v1451_v58 = vld [vmem:[#allocation3 + $0xa8] sm:$0xff] }
 0x46d   : > { %1486 = vmatpush1.bf16.msra.mxu0 %v1451_v58  ;;  %1527 = vmatpush1.bf16.msra.mxu1 %v1453_v59 }
 0x46e   : > { %1528 = vmatprep.subr.bf16.mxu1 %v3570_v1  ;;  %v1456_v60 = vld [vmem:[#allocation3 + $0xd0] sm:$0xff] }
 0x46f   : > { %v1455_v61 = vld [vmem:[#allocation3 + $0xc8] sm:$0xff] }
 0x470   : > { %1487 = vmatprep.subr.bf16.mxu0 %v1455_v61  ;;  %v1454_v62 = vld [vmem:[#allocation3 + $0xc0] sm:$0xff] }
 0x471   : > { %1529 = vmatpush1.bf16.msra.mxu1 %v1456_v60  ;;  %1488 = vmatpush1.bf16.msra.mxu0 %v1454_v62 }
 0x472   : > { %1877 = vmatprep.subr.bf16.mxu1 %v3570_v1 }
 0x474   : > { %1545 = vmatmul.mubr.bf16.vlgmr.msra.gmra.mrb[8].mxu1 %v3269_v63  ;;  %1504 = vmatmul.mubr.bf16.vlgmr.msra.gmra.mrb[8].mxu0 %v3269_v63 }
 0x475   : > { %3308 = vmatprep.mubr.msk.bf16.mxu1 %vm748_vm0, %v3306_v42  ;;  %3307 = vmatprep.mubr.msk.bf16.mxu0 %vm748_vm0, %v3306_v42 }
 0x477   : > { %v1460_v0 = vpop.permute.xlu1 %1459 }
 0x547   : > { %v1546_v2 = vpop.f32.mrb[8].mxu1  ;;  %v1505_v3 = vpop.f32.mrb[8].mxu0 }
 0x548   : > { %v1547_v4 = vadd.f32 %v1546_v2, %v1460_v0  ;;  %v1506_v5 = vadd.f32 %v1505_v3, %v1460_v0  ;;  %v1548_v6 = vpop.f32.mrb[9].mxu1  ;;  %v1507_v7 = vpop.f32.mrb[9].mxu0 }
 0x549   : > { %v1508_v8 = vadd.f32 %v1507_v7, %v1460_v0  ;;  %v1549_v9 = vpop.f32.mrb[10].mxu1  ;;  %v1509_v10 = vpop.f32.mrb[10].mxu0 }
 0x54a   : > { %v1554_v11 = vmul.f32 0.1, %v1547_v4  ;;  %v1552_v12 = vmul.f32 0.1, %v1506_v5  ;;  %v1550_v14 = vpop.f32.mrb[11].mxu1  ;;  %v1510_v38 = vpop.f32.mrb[11].mxu0 }
 0x54b   : > { %v1553_v15 = vmul.f32 0.1, %v1508_v8 }
 0x54c   : > { %v4009_v16 = vadd.f32 %v1554_v11, %v3809_v13  ;;  %v4012_v41 = vadd.f32 %v1552_v12, %v3814_v17 }
 0x54d   : > { %v4015_v53 = vadd.f32 %v1553_v15, %v3816_v21 }
 0x54e   : > { %v1564_v18 = vsel %vm3718_vm14, %v4009_v16, 0.0  ;;  %v1562_v19 = vsel %vm3710_vm12, %v4012_v41, 0.0 }
 0x54f   : > { %v1567_v20 = vpack.c.bf16 %v1564_v18, %v1564_v18  ;;  %v1565_v22 = vpack.c.bf16 %v1562_v19, %v1562_v19  ;;  %v1563_v23 = vsel %vm3714_vm13, %v4015_v53, 0.0 }
 0x550   : > { %v1566_v24 = vpack.c.bf16 %v1563_v23, %v1563_v23  ;;  %v3433_v25 = vpack.c.bf16 %v1563_v23, %v1562_v19 }
 0x551   : > { %1698 = vst.msk [vmem:[#allocation3 + $0x70] sm:$0xf] %vm485_vm15, %v1567_v20  ;;  %1579 = vst.msk [vmem:[#allocation2 + $0xc] sm:$0xf] %vm485_vm15, %v1567_v20 }
 0x552   : > { %1696 = vst [vmem:[#allocation3 + $0x60] sm:$0xf] %v1565_v22  ;;  %1697 = vst [vmem:[#allocation3 + $0x68] sm:$0xf] %v1566_v24 }
 0x553   : > { %1578 = vst [vmem:[#allocation2 + $0x4] sm:$0xff] %v3433_v25 }
 0x558   : > { %v3504_v26 = vld [vmem:[#allocation2 + $0xc] ss:$0 sps:$4 sm:$0xff]  }
 0x559   : > { %v3505_v27 = vld [vmem:[#allocation2 + $0xc] ss:$0 sps:$4 sm:$0xff]   ;;  %1737 = vrot.lane.b32.xlu0 %v3504_v26, %s3576_s26 }
 0x55a   : > { %v1581_v28 = vld [vmem:[#allocation2 + $0x8] sm:$0xff]  ;;  %v1580_v29 = vld [vmem:[#allocation2] sm:$0xff]  ;;  %1713 = vrot.lane.b32.xlu1 %v3505_v27, %s3575_s25 }
 0x55b   : > { %v3278_v33 = vcombine.high %v1580_v29, %v1580_v29  ;;  %v3279_v34 = vcombine.low %v1581_v28, %v1581_v28  ;;  %v3277_v35 = vcombine.low %v1580_v29, %v1580_v29  ;;  %v3280_v36 = vcombine.high %v1581_v28, %v1581_v28  ;;  %v3510_v37 = vld [vmem:[#allocation2 + $0xc] ss:$0 sps:$4 sm:$0xff]  }
 0x55c   : > { %v3511_v40 = vld [vmem:[#allocation2 + $0xc] ss:$0 sps:$4 sm:$0xff]  }
 0x55d   : > { %1594 = vrot.lane.b32.xlu0 %v3278_v33, %s3571_s21 }
 0x55e   : > { %1596 = vrot.lane.b32.xlu1 %v3279_v34, %s3571_s21 }
 0x561   : > { %1592 = vrot.lane.b32.xlu0 %v3277_v35, %s3571_s21 }
 0x562   : > { %1598 = vrot.lane.b32.xlu1 %v3280_v36, %s3571_s21 }
 0x565   : > { %1623 = vrot.lane.b32.xlu0 %v3278_v33, %s3572_s22 }
 0x566   : > { %1625 = vrot.lane.b32.xlu1 %v3279_v34, %s3572_s22 }
 0x569   : > { %1621 = vrot.lane.b32.xlu0 %v3277_v35, %s3572_s22 }
 0x56a   : > { %1627 = vrot.lane.b32.xlu1 %v3280_v36, %s3572_s22 }
 0x56d   : > { %1652 = vrot.lane.b32.xlu0 %v3278_v33, %s3573_s23 }
 0x56e   : > { %1654 = vrot.lane.b32.xlu1 %v3279_v34, %s3573_s23 }
 0x571   : > { %1650 = vrot.lane.b32.xlu0 %v3277_v35, %s3573_s23 }
 0x572   : > { %1656 = vrot.lane.b32.xlu1 %v3280_v36, %s3573_s23 }
 0x575   : > { %1681 = vrot.lane.b32.xlu0 %v3278_v33, %s3574_s24 }
 0x576   : > { %1683 = vrot.lane.b32.xlu1 %v3279_v34, %s3574_s24 }
 0x579   : > { %1679 = vrot.lane.b32.xlu0 %v3277_v35, %s3574_s24 }
 0x57a   : > { %1685 = vrot.lane.b32.xlu1 %v3280_v36, %s3574_s24 }
 0x57d   : > { %1711 = vrot.lane.b32.xlu0 %v1566_v24, %s3575_s25 }
 0x57e   : > { %1761 = vrot.lane.b32.xlu1 %v3510_v37, %s3577_s27  ;;  %v1808_v37 = vld [vmem:[#allocation3 + $0x68] sm:$0xff] }
 0x581   : > { %1709 = vrot.lane.b32.xlu0 %v1565_v22, %s3575_s25 }
 0x582   : > { %1735 = vrot.lane.b32.xlu1 %v1566_v24, %s3576_s26 }
 0x585   : > { %1759 = vrot.lane.b32.xlu0 %v1566_v24, %s3577_s27 }
 0x586   : > { %1733 = vrot.lane.b32.xlu1 %v1565_v22, %s3576_s26 }
 0x589   : > { %1757 = vrot.lane.b32.xlu0 %v1565_v22, %s3577_s27 }
 0x58a   : > { %1783 = vrot.lane.b32.xlu1 %v1566_v24, %s3578_s28 }
 0x58d   : > { %1785 = vrot.lane.b32.xlu0 %v3511_v40, %s3578_s28 }
 0x58e   : > { %1781 = vrot.lane.b32.xlu1 %v1565_v22, %s3578_s28 }
 0x591   : > { %1824 = vperm.xlu0 %3474, %v3274_v43  }
 0x5cb   : > { %v4068_v44 = vpop.permute.xlu0 %1737 }
 0x5cc   : > { %1746 = vst.msk [vmem:[#allocation3 + $0xa0] sm:$0xf] %vm485_vm15, %v4068_v44  ;;  %v4072_v45 = vpop.permute.xlu1 %1713 }
 0x5cd   : > { %1722 = vst.msk [vmem:[#allocation3 + $0x88] sm:$0xf] %vm485_vm15, %v4072_v45 }
 0x5cf   : > { %v1595_v46 = vpop.permute.xlu0 %1594 }
 0x5d0   : > { %v1597_v47 = vpop.permute.xlu1 %1596 }
 0x5d1   : > { %v1601_v48 = vsel %vm507_vm1, %v1595_v46, %v1597_v47 }
 0x5d2   : > { %1607 = vst [vmem:[#allocation3 + $0x8] sm:$0xf] %v1601_v48 }
 0x5d3   : > { %v1593_v49 = vpop.permute.xlu0 %1592 }
 0x5d4   : > { %v1599_v50 = vpop.permute.xlu1 %1598  ;;  %v1600_v51 = vsel %vm507_vm1, %v1593_v49, %v1595_v46 }
 0x5d5   : > { %v1602_v52 = vsel %vm507_vm1, %v1597_v47, %v1599_v50  ;;  %1606 = vst [vmem:[#allocation3] sm:$0xf] %v1600_v51 }
 0x5d6   : > { %1608 = vst.msk [vmem:[#allocation3 + $0x10] sm:$0xf] %vm485_vm15, %v1602_v52  ;;  %v1812_v52 = vld [vmem:[#allocation3 + $0x88] sm:$0xff] }
 0x5d7   : > { %v1624_v54 = vpop.permute.xlu0 %1623 }
 0x5d8   : > { %v1626_v55 = vpop.permute.xlu1 %1625 }
 0x5d9   : > { %v1630_v56 = vsel %vm537_vm2, %v1624_v54, %v1626_v55  ;;  %v1796_v57 = vld [vmem:[#allocation3 + $0x8] sm:$0xff] }
 0x5da   : > { %1636 = vst [vmem:[#allocation3 + $0x20] sm:$0xf] %v1630_v56  ;;  %1836 = vmatprep.subr.bf16.mxu0 %v1796_v57 }
 0x5db   : > { %v1622_v58 = vpop.permute.xlu0 %1621 }
 0x5dc   : > { %v1628_v59 = vpop.permute.xlu1 %1627  ;;  %v1629_v60 = vsel %vm537_vm2, %v1622_v58, %v1624_v54  ;;  %v1795_v61 = vld [vmem:[#allocation3] sm:$0xff] }
 0x5dd   : > { %v1631_v62 = vsel %vm537_vm2, %v1626_v55, %v1628_v59  ;;  %1635 = vst [vmem:[#allocation3 + $0x18] sm:$0xf] %v1629_v60  ;;  %1837 = vmatpush1.bf16.msra.mxu0 %v1795_v61  ;;  %v1797_v63 = vld [vmem:[#allocation3 + $0x10] sm:$0xff]  ;;  %v1815_v61 = vld [vmem:[#allocation3 + $0xa0] sm:$0xff] }
 0x5de   : > { %1637 = vst.msk [vmem:[#allocation3 + $0x28] sm:$0xf] %vm485_vm15, %v1631_v62  ;;  %1878 = vmatpush1.bf16.msra.mxu1 %v1797_v63 }
 0x5df   : > { %v1653_v0 = vpop.permute.xlu0 %1652  ;;  %1879 = vmatprep.subr.bf16.mxu1 %v3570_v1 }
 0x5e0   : > { %v1655_v2 = vpop.permute.xlu1 %1654 }
 0x5e1   : > { %v1659_v3 = vsel %vm567_vm3, %v1653_v0, %v1655_v2  ;;  %v1799_v4 = vld [vmem:[#allocation3 + $0x20] sm:$0xff] }
 0x5e2   : > { %1665 = vst [vmem:[#allocation3 + $0x38] sm:$0xf] %v1659_v3  ;;  %1838 = vmatprep.subr.bf16.mxu0 %v1799_v4  ;;  %v3305_v4 = vcombine.low %v4057_v39, %v4057_v39 }
 0x5e3   : > { %v1651_v5 = vpop.permute.xlu0 %1650 }
 0x5e4   : > { %v1657_v6 = vpop.permute.xlu1 %1656  ;;  %v1658_v7 = vsel %vm567_vm3, %v1651_v5, %v1653_v0  ;;  %v1798_v8 = vld [vmem:[#allocation3 + $0x18] sm:$0xff] }
 0x5e5   : > { %v1660_v9 = vsel %vm567_vm3, %v1655_v2, %v1657_v6  ;;  %1664 = vst [vmem:[#allocation3 + $0x30] sm:$0xf] %v1658_v7  ;;  %1839 = vmatpush1.bf16.msra.mxu0 %v1798_v8  ;;  %v1800_v10 = vld [vmem:[#allocation3 + $0x28] sm:$0xff] }
 0x5e6   : > { %1666 = vst.msk [vmem:[#allocation3 + $0x40] sm:$0xf] %vm485_vm15, %v1660_v9  ;;  %1880 = vmatpush1.bf16.msra.mxu1 %v1800_v10 }
 0x5e7   : > { %v1682_v11 = vpop.permute.xlu0 %1681  ;;  %1881 = vmatprep.subr.bf16.mxu1 %v3570_v1 }
 0x5e8   : > { %v1684_v12 = vpop.permute.xlu1 %1683 }
 0x5e9   : > { %v1688_v14 = vsel %vm597_vm4, %v1682_v11, %v1684_v12  ;;  %v1802_v38 = vld [vmem:[#allocation3 + $0x38] sm:$0xff] }
 0x5ea   : > { %1694 = vst [vmem:[#allocation3 + $0x50] sm:$0xf] %v1688_v14  ;;  %1840 = vmatprep.subr.bf16.mxu0 %v1802_v38 }
 0x5eb   : > { %v1680_v15 = vpop.permute.xlu0 %1679 }
 0x5ec   : > { %v1686_v18 = vpop.permute.xlu1 %1685  ;;  %v1687_v19 = vsel %vm597_vm4, %v1680_v15, %v1682_v11  ;;  %v1801_v20 = vld [vmem:[#allocation3 + $0x30] sm:$0xff] }
 0x5ed   : > { %v1689_v22 = vsel %vm597_vm4, %v1684_v12, %v1686_v18  ;;  %1693 = vst [vmem:[#allocation3 + $0x48] sm:$0xf] %v1687_v19  ;;  %1841 = vmatpush1.bf16.msra.mxu0 %v1801_v20  ;;  %v1803_v23 = vld [vmem:[#allocation3 + $0x40] sm:$0xff] }
 0x5ee   : > { %1695 = vst.msk [vmem:[#allocation3 + $0x58] sm:$0xf] %vm485_vm15, %v1689_v22  ;;  %1882 = vmatpush1.bf16.msra.mxu1 %v1803_v23 }
 0x5ef   : > { %v1712_v24 = vpop.permute.xlu0 %1711  ;;  %1883 = vmatprep.subr.bf16.mxu1 %v3570_v1 }
 0x5f0   : > { %v1762_v25 = vpop.permute.xlu1 %1761  ;;  %v1716_v26 = vsel %vm626_vm5, %v1712_v24, %v4072_v45  ;;  %v1807_v45 = vld [vmem:[#allocation3 + $0x60] sm:$0xff] }
 0x5f1   : > { %1770 = vst.msk [vmem:[#allocation3 + $0xb8] sm:$0xf] %vm485_vm15, %v1762_v25  ;;  %1721 = vst [vmem:[#allocation3 + $0x80] sm:$0xf] %v1716_v26  ;;  %v1805_v27 = vld [vmem:[#allocation3 + $0x50] sm:$0xff] }
 0x5f2   : > { %1842 = vmatprep.subr.bf16.mxu0 %v1805_v27 }
 0x5f3   : > { %v1710_v28 = vpop.permute.xlu0 %1709 }
 0x5f4   : > { %v1736_v29 = vpop.permute.xlu1 %1735  ;;  %v1715_v33 = vsel %vm626_vm5, %v1710_v28, %v1712_v24  ;;  %v1804_v34 = vld [vmem:[#allocation3 + $0x48] sm:$0xff] }
 0x5f5   : > { %v1740_v35 = vsel %vm651_vm6, %v1736_v29, %v4068_v44  ;;  %1720 = vst [vmem:[#allocation3 + $0x78] sm:$0xf] %v1715_v33  ;;  %1843 = vmatpush1.bf16.msra.mxu0 %v1804_v34  ;;  %v1806_v36 = vld [vmem:[#allocation3 + $0x58] sm:$0xff]  ;;  %v1809_v44 = vld [vmem:[#allocation3 + $0x70] sm:$0xff] }
 0x5f6   : > { %1745 = vst [vmem:[#allocation3 + $0x98] sm:$0xf] %v1740_v35  ;;  %1884 = vmatpush1.bf16.msra.mxu1 %v1806_v36  ;;  %1844 = vmatprep.subr.bf16.mxu0 %v1808_v37 }
 0x5f7   : > { %v1760_v40 = vpop.permute.xlu0 %1759  ;;  %1885 = vmatprep.subr.bf16.mxu1 %v3570_v1 }
 0x5f8   : > { %v1734_v42 = vpop.permute.xlu1 %1733  ;;  %v1764_v43 = vsel %vm676_vm7, %v1760_v40, %v1762_v25  ;;  %v1811_v46 = vld [vmem:[#allocation3 + $0x80] sm:$0xff]  ;;  %v1818_v63 = vld [vmem:[#allocation3 + $0xb8] sm:$0xff] }
 0x5f9   : > { %v1739_v47 = vsel %vm651_vm6, %v1734_v42, %v1736_v29  ;;  %1769 = vst [vmem:[#allocation3 + $0xb0] sm:$0xf] %v1764_v43  ;;  %1845 = vmatpush1.bf16.msra.mxu0 %v1807_v45  ;;  %v4152_v45 = vld [vmem:[%s4444_s4 + $0x18] sm:$0xff] }
 0x5fa   : > { %1744 = vst [vmem:[#allocation3 + $0x90] sm:$0xf] %v1739_v47  ;;  %1886 = vmatpush1.bf16.msra.mxu1 %v1809_v44  ;;  %1846 = vmatprep.subr.bf16.mxu0 %v1811_v46  ;;  %v3342_v47 = vcombine.high %v4152_v45, %v4152_v45  ;;  %v3310_v44 = vld [vmem:[%s4445_s5 + $0x18] sm:$0xff] }
 0x5fb   : > { %v1758_v48 = vpop.permute.xlu0 %1757  ;;  %1887 = vmatprep.subr.bf16.mxu1 %v3570_v1 }
 0x5fc   : > { %v1784_v49 = vpop.permute.xlu1 %1783  ;;  %v1763_v50 = vsel %vm676_vm7, %v1758_v48, %v1760_v40  ;;  %v1810_v51 = vld [vmem:[#allocation3 + $0x78] sm:$0xff] }
 0x5fd   : > { %1768 = vst [vmem:[#allocation3 + $0xa8] sm:$0xf] %v1763_v50  ;;  %1847 = vmatpush1.bf16.msra.mxu0 %v1810_v51  ;;  %v1814_v54 = vld [vmem:[#allocation3 + $0x98] sm:$0xff] }
 0x5fe   : > { %1888 = vmatpush1.bf16.msra.mxu1 %v1812_v52  ;;  %1848 = vmatprep.subr.bf16.mxu0 %v1814_v54 }
 0x5ff   : > { %v1786_v55 = vpop.permute.xlu0 %1785  ;;  %1889 = vmatprep.subr.bf16.mxu1 %v3570_v1 }
 0x600   : > { %v1782_v56 = vpop.permute.xlu1 %1781  ;;  %v1788_v57 = vsel %vm701_vm8, %v1784_v49, %v1786_v55  ;;  %1794 = vst.msk [vmem:[#allocation3 + $0xd0] sm:$0xf] %vm485_vm15, %v1786_v55  ;;  %v1817_v58 = vld [vmem:[#allocation3 + $0xb0] sm:$0xff] }
 0x601   : > { %v1787_v59 = vsel %vm701_vm8, %v1782_v56, %v1784_v49  ;;  %1793 = vst [vmem:[#allocation3 + $0xc8] sm:$0xf] %v1788_v57  ;;  %v1813_v60 = vld [vmem:[#allocation3 + $0x90] sm:$0xff] }
 0x602   : > { %1792 = vst [vmem:[#allocation3 + $0xc0] sm:$0xf] %v1787_v59  ;;  %1849 = vmatpush1.bf16.msra.mxu0 %v1813_v60  ;;  %1890 = vmatpush1.bf16.msra.mxu1 %v1815_v61 }
 0x603   : > { %1850 = vmatprep.subr.bf16.mxu0 %v1817_v58  ;;  %1891 = vmatprep.subr.bf16.mxu1 %v3570_v1 }
 0x604   : > { %v1816_v62 = vld [vmem:[#allocation3 + $0xa8] sm:$0xff] }
 0x606   : > { %1851 = vmatpush1.bf16.msra.mxu0 %v1816_v62  ;;  %1892 = vmatpush1.bf16.msra.mxu1 %v1818_v63 }
 0x607   : > { %1893 = vmatprep.subr.bf16.mxu1 %v3570_v1  ;;  %v1821_v0 = vld [vmem:[#allocation3 + $0xd0] sm:$0xff] }
 0x608   : > { %v1820_v2 = vld [vmem:[#allocation3 + $0xc8] sm:$0xff] }
 0x609   : > { %1852 = vmatprep.subr.bf16.mxu0 %v1820_v2  ;;  %v1819_v3 = vld [vmem:[#allocation3 + $0xc0] sm:$0xff] }
 0x60a   : > { %1894 = vmatpush1.bf16.msra.mxu1 %v1821_v0  ;;  %1853 = vmatpush1.bf16.msra.mxu0 %v1819_v3 }
 0x60b   : > { %2239 = vmatprep.subr.bf16.mxu1 %v3570_v1 }
 0x60d   : > { %1910 = vmatmul.mubr.bf16.vlgmr.msra.gmra.mrb[12].mxu1 %v3305_v4  ;;  %1869 = vmatmul.mubr.bf16.vlgmr.msra.gmra.mrb[12].mxu0 %v3305_v4 }
 0x60e   : > { %3344 = vmatprep.mubr.msk.bf16.mxu1 %vm748_vm0, %v3342_v47  ;;  %3343 = vmatprep.mubr.msk.bf16.mxu0 %vm748_vm0, %v3342_v47 }
 0x610   : > { %v1825_v5 = vpop.permute.xlu0 %1824 }
 0x6e0   : > { %v1911_v6 = vpop.f32.mrb[12].mxu1  ;;  %v1870_v7 = vpop.f32.mrb[12].mxu0 }
 0x6e1   : > { %v1912_v8 = vadd.f32 %v1911_v6, %v1825_v5  ;;  %v1871_v9 = vadd.f32 %v1870_v7, %v1825_v5  ;;  %v1913_v10 = vpop.f32.mrb[13].mxu1  ;;  %v1872_v11 = vpop.f32.mrb[13].mxu0 }
 0x6e2   : > { %v1873_v12 = vadd.f32 %v1872_v11, %v1825_v5  ;;  %v1914_v14 = vpop.f32.mrb[14].mxu1  ;;  %v1874_v38 = vpop.f32.mrb[14].mxu0 }
 0x6e3   : > { %v1919_v15 = vmax.f32 %v1912_v8, 0.0  ;;  %v1917_v18 = vmax.f32 %v1871_v9, 0.0  ;;  %v1915_v19 = vpop.f32.mrb[15].mxu1  ;;  %v1875_v39 = vpop.f32.mrb[15].mxu0 }
 0x6e4   : > { %v1918_v20 = vmax.f32 %v1873_v12, 0.0 }
 0x6e5   : > { %v1926_v22 = vsel %vm3718_vm14, %v1919_v15, 0.0  ;;  %v1924_v23 = vsel %vm3710_vm12, %v1917_v18, 0.0 }
 0x6e6   : > { %v1929_v24 = vpack.c.bf16 %v1926_v22, %v1926_v22  ;;  %v1927_v25 = vpack.c.bf16 %v1924_v23, %v1924_v23  ;;  %v1925_v26 = vsel %vm3714_vm13, %v1918_v20, 0.0 }
 0x6e7   : > { %v1928_v27 = vpack.c.bf16 %v1925_v26, %v1925_v26  ;;  %v3435_v28 = vpack.c.bf16 %v1925_v26, %v1924_v23 }
 0x6e8   : > { %2060 = vst.msk [vmem:[#allocation3 + $0x70] sm:$0xf] %vm485_vm15, %v1929_v24  ;;  %1941 = vst.msk [vmem:[#allocation2 + $0xc] sm:$0xf] %vm485_vm15, %v1929_v24 }
 0x6e9   : > { %2058 = vst [vmem:[#allocation3 + $0x60] sm:$0xf] %v1927_v25  ;;  %2059 = vst [vmem:[#allocation3 + $0x68] sm:$0xf] %v1928_v27 }
 0x6ea   : > { %1940 = vst [vmem:[#allocation2 + $0x4] sm:$0xff] %v3435_v28 }
 0x6ef   : > { %v3514_v29 = vld [vmem:[#allocation2 + $0xc] ss:$0 sps:$4 sm:$0xff]  }
 0x6f0   : > { %v3515_v33 = vld [vmem:[#allocation2 + $0xc] ss:$0 sps:$4 sm:$0xff]   ;;  %2099 = vrot.lane.b32.xlu1 %v3514_v29, %s3576_s26 }
 0x6f1   : > { %v1943_v34 = vld [vmem:[#allocation2 + $0x8] sm:$0xff]  ;;  %v1942_v35 = vld [vmem:[#allocation2] sm:$0xff]  ;;  %2075 = vrot.lane.b32.xlu0 %v3515_v33, %s3575_s25 }
 0x6f2   : > { %v3314_v36 = vcombine.high %v1942_v35, %v1942_v35  ;;  %v3315_v37 = vcombine.low %v1943_v34, %v1943_v34  ;;  %v3313_v40 = vcombine.low %v1942_v35, %v1942_v35  ;;  %v3316_v42 = vcombine.high %v1943_v34, %v1943_v34  ;;  %v3520_v43 = vld [vmem:[#allocation2 + $0xc] ss:$0 sps:$4 sm:$0xff]  }
 0x6f3   : > { %v3521_v46 = vld [vmem:[#allocation2 + $0xc] ss:$0 sps:$4 sm:$0xff]  }
 0x6f4   : > { %1956 = vrot.lane.b32.xlu1 %v3314_v36, %s3571_s21 }
 0x6f5   : > { %1958 = vrot.lane.b32.xlu0 %v3315_v37, %s3571_s21 }
 0x6f8   : > { %1954 = vrot.lane.b32.xlu1 %v3313_v40, %s3571_s21 }
 0x6f9   : > { %1960 = vrot.lane.b32.xlu0 %v3316_v42, %s3571_s21 }
 0x6fc   : > { %1985 = vrot.lane.b32.xlu1 %v3314_v36, %s3572_s22 }
 0x6fd   : > { %1987 = vrot.lane.b32.xlu0 %v3315_v37, %s3572_s22 }
 0x700   : > { %1983 = vrot.lane.b32.xlu1 %v3313_v40, %s3572_s22 }
 0x701   : > { %1989 = vrot.lane.b32.xlu0 %v3316_v42, %s3572_s22 }
 0x704   : > { %2014 = vrot.lane.b32.xlu1 %v3314_v36, %s3573_s23 }
 0x705   : > { %2016 = vrot.lane.b32.xlu0 %v3315_v37, %s3573_s23 }
 0x708   : > { %2012 = vrot.lane.b32.xlu1 %v3313_v40, %s3573_s23 }
 0x709   : > { %2018 = vrot.lane.b32.xlu0 %v3316_v42, %s3573_s23 }
 0x70c   : > { %2043 = vrot.lane.b32.xlu1 %v3314_v36, %s3574_s24 }
 0x70d   : > { %2045 = vrot.lane.b32.xlu0 %v3315_v37, %s3574_s24 }
 0x710   : > { %2041 = vrot.lane.b32.xlu1 %v3313_v40, %s3574_s24 }
 0x711   : > { %2047 = vrot.lane.b32.xlu0 %v3316_v42, %s3574_s24 }
 0x714   : > { %2073 = vrot.lane.b32.xlu1 %v1928_v27, %s3575_s25 }
 0x715   : > { %2123 = vrot.lane.b32.xlu0 %v3520_v43, %s3577_s27  ;;  %v2170_v43 = vld [vmem:[#allocation3 + $0x68] sm:$0xff] }
 0x718   : > { %2071 = vrot.lane.b32.xlu1 %v1927_v25, %s3575_s25 }
 0x719   : > { %2097 = vrot.lane.b32.xlu0 %v1928_v27, %s3576_s26 }
 0x71c   : > { %2121 = vrot.lane.b32.xlu1 %v1928_v27, %s3577_s27 }
 0x71d   : > { %2095 = vrot.lane.b32.xlu0 %v1927_v25, %s3576_s26 }
 0x720   : > { %2119 = vrot.lane.b32.xlu1 %v1927_v25, %s3577_s27 }
 0x721   : > { %2145 = vrot.lane.b32.xlu0 %v1928_v27, %s3578_s28 }
 0x724   : > { %2147 = vrot.lane.b32.xlu1 %v3521_v46, %s3578_s28 }
 0x725   : > { %2143 = vrot.lane.b32.xlu0 %v1927_v25, %s3578_s28 }
 0x728   : > { %2186 = vperm.xlu1 %3475, %v3310_v44  }
 0x762   : > { %v4163_v48 = vpop.permute.xlu1 %2099 }
 0x763   : > { %2108 = vst.msk [vmem:[#allocation3 + $0xa0] sm:$0xf] %vm485_vm15, %v4163_v48  ;;  %v4167_v49 = vpop.permute.xlu0 %2075 }
 0x764   : > { %2084 = vst.msk [vmem:[#allocation3 + $0x88] sm:$0xf] %vm485_vm15, %v4167_v49 }
 0x766   : > { %v1957_v50 = vpop.permute.xlu1 %1956 }
 0x767   : > { %v1959_v51 = vpop.permute.xlu0 %1958 }
 0x768   : > { %v1963_v52 = vsel %vm507_vm1, %v1957_v50, %v1959_v51 }
 0x769   : > { %1969 = vst [vmem:[#allocation3 + $0x8] sm:$0xf] %v1963_v52 }
 0x76a   : > { %v1955_v54 = vpop.permute.xlu1 %1954 }
 0x76b   : > { %v1961_v55 = vpop.permute.xlu0 %1960  ;;  %v1962_v56 = vsel %vm507_vm1, %v1955_v54, %v1957_v50 }
 0x76c   : > { %v1964_v57 = vsel %vm507_vm1, %v1959_v51, %v1961_v55  ;;  %1968 = vst [vmem:[#allocation3] sm:$0xf] %v1962_v56 }
 0x76d   : > { %1970 = vst.msk [vmem:[#allocation3 + $0x10] sm:$0xf] %vm485_vm15, %v1964_v57  ;;  %v2174_v57 = vld [vmem:[#allocation3 + $0x88] sm:$0xff] }
 0x76e   : > { %v1986_v58 = vpop.permute.xlu1 %1985 }
 0x76f   : > { %v1988_v59 = vpop.permute.xlu0 %1987 }
 0x770   : > { %v1992_v60 = vsel %vm537_vm2, %v1986_v58, %v1988_v59  ;;  %v2158_v61 = vld [vmem:[#allocation3 + $0x8] sm:$0xff] }
 0x771   : > { %1998 = vst [vmem:[#allocation3 + $0x20] sm:$0xf] %v1992_v60  ;;  %2198 = vmatprep.subr.bf16.mxu0 %v2158_v61 }
 0x772   : > { %v1984_v62 = vpop.permute.xlu1 %1983 }
 0x773   : > { %v1990_v63 = vpop.permute.xlu0 %1989  ;;  %v1991_v0 = vsel %vm537_vm2, %v1984_v62, %v1986_v58  ;;  %v2157_v2 = vld [vmem:[#allocation3] sm:$0xff] }
 0x774   : > { %v1993_v3 = vsel %vm537_vm2, %v1988_v59, %v1990_v63  ;;  %1997 = vst [vmem:[#allocation3 + $0x18] sm:$0xf] %v1991_v0  ;;  %2199 = vmatpush1.bf16.msra.mxu0 %v2157_v2  ;;  %v2159_v4 = vld [vmem:[#allocation3 + $0x10] sm:$0xff]  ;;  %v2177_v2 = vld [vmem:[#allocation3 + $0xa0] sm:$0xff] }
 0x775   : > { %1999 = vst.msk [vmem:[#allocation3 + $0x28] sm:$0xf] %vm485_vm15, %v1993_v3  ;;  %2240 = vmatpush1.bf16.msra.mxu1 %v2159_v4 }
 0x776   : > { %v2015_v5 = vpop.permute.xlu1 %2014  ;;  %2241 = vmatprep.subr.bf16.mxu1 %v3570_v1 }
 0x777   : > { %v2017_v6 = vpop.permute.xlu0 %2016 }
 0x778   : > { %v2021_v7 = vsel %vm567_vm3, %v2015_v5, %v2017_v6  ;;  %v2161_v8 = vld [vmem:[#allocation3 + $0x20] sm:$0xff] }
 0x779   : > { %2027 = vst [vmem:[#allocation3 + $0x38] sm:$0xf] %v2021_v7  ;;  %2200 = vmatprep.subr.bf16.mxu0 %v2161_v8  ;;  %v3341_v8 = vcombine.low %v4152_v45, %v4152_v45 }
 0x77a   : > { %v2013_v9 = vpop.permute.xlu1 %2012 }
 0x77b   : > { %v2019_v10 = vpop.permute.xlu0 %2018  ;;  %v2020_v11 = vsel %vm567_vm3, %v2013_v9, %v2015_v5  ;;  %v2160_v12 = vld [vmem:[#allocation3 + $0x18] sm:$0xff] }
 0x77c   : > { %v2022_v14 = vsel %vm567_vm3, %v2017_v6, %v2019_v10  ;;  %2026 = vst [vmem:[#allocation3 + $0x30] sm:$0xf] %v2020_v11  ;;  %2201 = vmatpush1.bf16.msra.mxu0 %v2160_v12  ;;  %v2162_v38 = vld [vmem:[#allocation3 + $0x28] sm:$0xff] }
 0x77d   : > { %2028 = vst.msk [vmem:[#allocation3 + $0x40] sm:$0xf] %vm485_vm15, %v2022_v14  ;;  %2242 = vmatpush1.bf16.msra.mxu1 %v2162_v38 }
 0x77e   : > { %v2044_v15 = vpop.permute.xlu1 %2043  ;;  %2243 = vmatprep.subr.bf16.mxu1 %v3570_v1 }
 0x77f   : > { %v2046_v18 = vpop.permute.xlu0 %2045 }
 0x780   : > { %v2050_v19 = vsel %vm597_vm4, %v2044_v15, %v2046_v18  ;;  %v2164_v39 = vld [vmem:[#allocation3 + $0x38] sm:$0xff] }
 0x781   : > { %2056 = vst [vmem:[#allocation3 + $0x50] sm:$0xf] %v2050_v19  ;;  %2202 = vmatprep.subr.bf16.mxu0 %v2164_v39 }
 0x782   : > { %v2042_v20 = vpop.permute.xlu1 %2041 }
 0x783   : > { %v2048_v22 = vpop.permute.xlu0 %2047  ;;  %v2049_v23 = vsel %vm597_vm4, %v2042_v20, %v2044_v15  ;;  %v2163_v24 = vld [vmem:[#allocation3 + $0x30] sm:$0xff] }
 0x784   : > { %v2051_v25 = vsel %vm597_vm4, %v2046_v18, %v2048_v22  ;;  %2055 = vst [vmem:[#allocation3 + $0x48] sm:$0xf] %v2049_v23  ;;  %2203 = vmatpush1.bf16.msra.mxu0 %v2163_v24  ;;  %v2165_v26 = vld [vmem:[#allocation3 + $0x40] sm:$0xff] }
 0x785   : > { %2057 = vst.msk [vmem:[#allocation3 + $0x58] sm:$0xf] %vm485_vm15, %v2051_v25  ;;  %2244 = vmatpush1.bf16.msra.mxu1 %v2165_v26 }
 0x786   : > { %v2074_v27 = vpop.permute.xlu1 %2073  ;;  %2245 = vmatprep.subr.bf16.mxu1 %v3570_v1 }
 0x787   : > { %v2124_v28 = vpop.permute.xlu0 %2123  ;;  %v2078_v29 = vsel %vm626_vm5, %v2074_v27, %v4167_v49  ;;  %v2169_v49 = vld [vmem:[#allocation3 + $0x60] sm:$0xff] }
 0x788   : > { %2132 = vst.msk [vmem:[#allocation3 + $0xb8] sm:$0xf] %vm485_vm15, %v2124_v28  ;;  %2083 = vst [vmem:[#allocation3 + $0x80] sm:$0xf] %v2078_v29  ;;  %v2167_v33 = vld [vmem:[#allocation3 + $0x50] sm:$0xff] }
 0x789   : > { %2204 = vmatprep.subr.bf16.mxu0 %v2167_v33 }
 0x78a   : > { %v2072_v34 = vpop.permute.xlu1 %2071 }
 0x78b   : > { %v2098_v35 = vpop.permute.xlu0 %2097  ;;  %v2077_v36 = vsel %vm626_vm5, %v2072_v34, %v2074_v27  ;;  %v2166_v37 = vld [vmem:[#allocation3 + $0x48] sm:$0xff] }
 0x78c   : > { %v2102_v40 = vsel %vm651_vm6, %v2098_v35, %v4163_v48  ;;  %2082 = vst [vmem:[#allocation3 + $0x78] sm:$0xf] %v2077_v36  ;;  %2205 = vmatpush1.bf16.msra.mxu0 %v2166_v37  ;;  %v2168_v42 = vld [vmem:[#allocation3 + $0x58] sm:$0xff]  ;;  %v2171_v48 = vld [vmem:[#allocation3 + $0x70] sm:$0xff] }
 0x78d   : > { %2107 = vst [vmem:[#allocation3 + $0x98] sm:$0xf] %v2102_v40  ;;  %2246 = vmatpush1.bf16.msra.mxu1 %v2168_v42  ;;  %2206 = vmatprep.subr.bf16.mxu0 %v2170_v43 }
 0x78e   : > { %v2122_v46 = vpop.permute.xlu1 %2121  ;;  %2247 = vmatprep.subr.bf16.mxu1 %v3570_v1 }
 0x78f   : > { %v2096_v47 = vpop.permute.xlu0 %2095  ;;  %v2126_v44 = vsel %vm676_vm7, %v2122_v46, %v2124_v28  ;;  %v2173_v50 = vld [vmem:[#allocation3 + $0x80] sm:$0xff]  ;;  %v2180_v4 = vld [vmem:[#allocation3 + $0xb8] sm:$0xff] }
 0x790   : > { %v2101_v51 = vsel %vm651_vm6, %v2096_v47, %v2098_v35  ;;  %2131 = vst [vmem:[#allocation3 + $0xb0] sm:$0xf] %v2126_v44  ;;  %2207 = vmatpush1.bf16.msra.mxu0 %v2169_v49  ;;  %v4250_v49 = vld [vmem:[%s4446_s6] sm:$0xff] }
 0x791   : > { %2106 = vst [vmem:[#allocation3 + $0x90] sm:$0xf] %v2101_v51  ;;  %2248 = vmatpush1.bf16.msra.mxu1 %v2171_v48  ;;  %2208 = vmatprep.subr.bf16.mxu0 %v2173_v50  ;;  %v3376_v51 = vcombine.high %v4250_v49, %v4250_v49  ;;  %v2286_v48 = vld [vmem:[%s4447_s7] sm:$0xff] }
 0x792   : > { %v2120_v52 = vpop.permute.xlu1 %2119  ;;  %2249 = vmatprep.subr.bf16.mxu1 %v3570_v1 }
 0x793   : > { %v2146_v54 = vpop.permute.xlu0 %2145  ;;  %v2125_v55 = vsel %vm676_vm7, %v2120_v52, %v2122_v46  ;;  %v2172_v56 = vld [vmem:[#allocation3 + $0x78] sm:$0xff] }
 0x794   : > { %2130 = vst [vmem:[#allocation3 + $0xa8] sm:$0xf] %v2125_v55  ;;  %2209 = vmatpush1.bf16.msra.mxu0 %v2172_v56  ;;  %v2176_v58 = vld [vmem:[#allocation3 + $0x98] sm:$0xff] }
 0x795   : > { %2250 = vmatpush1.bf16.msra.mxu1 %v2174_v57  ;;  %2210 = vmatprep.subr.bf16.mxu0 %v2176_v58 }
 0x796   : > { %v2148_v59 = vpop.permute.xlu1 %2147  ;;  %2251 = vmatprep.subr.bf16.mxu1 %v3570_v1 }
 0x797   : > { %v2144_v60 = vpop.permute.xlu0 %2143  ;;  %v2150_v61 = vsel %vm701_vm8, %v2146_v54, %v2148_v59  ;;  %2156 = vst.msk [vmem:[#allocation3 + $0xd0] sm:$0xf] %vm485_vm15, %v2148_v59  ;;  %v2179_v62 = vld [vmem:[#allocation3 + $0xb0] sm:$0xff] }
 0x798   : > { %v2149_v63 = vsel %vm701_vm8, %v2144_v60, %v2146_v54  ;;  %2155 = vst [vmem:[#allocation3 + $0xc8] sm:$0xf] %v2150_v61  ;;  %v2175_v0 = vld [vmem:[#allocation3 + $0x90] sm:$0xff] }
 0x799   : > { %2154 = vst [vmem:[#allocation3 + $0xc0] sm:$0xf] %v2149_v63  ;;  %2211 = vmatpush1.bf16.msra.mxu0 %v2175_v0  ;;  %2252 = vmatpush1.bf16.msra.mxu1 %v2177_v2 }
 0x79a   : > { %2212 = vmatprep.subr.bf16.mxu0 %v2179_v62  ;;  %2253 = vmatprep.subr.bf16.mxu1 %v3570_v1 }
 0x79b   : > { %v2178_v3 = vld [vmem:[#allocation3 + $0xa8] sm:$0xff] }
 0x79d   : > { %2213 = vmatpush1.bf16.msra.mxu0 %v2178_v3  ;;  %2254 = vmatpush1.bf16.msra.mxu1 %v2180_v4 }
 0x79e   : > { %2255 = vmatprep.subr.bf16.mxu1 %v3570_v1  ;;  %v2183_v5 = vld [vmem:[#allocation3 + $0xd0] sm:$0xff] }
 0x79f   : > { %v2182_v6 = vld [vmem:[#allocation3 + $0xc8] sm:$0xff] }
 0x7a0   : > { %2214 = vmatprep.subr.bf16.mxu0 %v2182_v6  ;;  %v2181_v7 = vld [vmem:[#allocation3 + $0xc0] sm:$0xff] }
 0x7a1   : > { %2256 = vmatpush1.bf16.msra.mxu1 %v2183_v5  ;;  %2215 = vmatpush1.bf16.msra.mxu0 %v2181_v7 }
 0x7a2   : > { %2602 = vmatprep.subr.bf16.mxu1 %v3570_v1 }
 0x7a4   : > { %2272 = vmatmul.mubr.bf16.vlgmr.msra.gmra.mrb[16].mxu1 %v3341_v8  ;;  %2231 = vmatmul.mubr.bf16.vlgmr.msra.gmra.mrb[16].mxu0 %v3341_v8 }
 0x7a5   : > { %3378 = vmatprep.mubr.msk.bf16.mxu1 %vm748_vm0, %v3376_v51  ;;  %3377 = vmatprep.mubr.msk.bf16.mxu0 %vm748_vm0, %v3376_v51 }
 0x7a7   : > { %v2187_v9 = vpop.permute.xlu1 %2186 }
 0x877   : > { %v2273_v10 = vpop.f32.mrb[16].mxu1  ;;  %v2232_v11 = vpop.f32.mrb[16].mxu0 }
 0x878   : > { %v2274_v12 = vadd.f32 %v2273_v10, %v2187_v9  ;;  %v2233_v14 = vadd.f32 %v2232_v11, %v2187_v9  ;;  %v2275_v38 = vpop.f32.mrb[17].mxu1  ;;  %v2234_v15 = vpop.f32.mrb[17].mxu0 }
 0x879   : > { %v2235_v18 = vadd.f32 %v2234_v15, %v2187_v9  ;;  %v2276_v19 = vpop.f32.mrb[18].mxu1  ;;  %v2236_v39 = vpop.f32.mrb[18].mxu0 }
 0x87a   : > { %v2281_v20 = vmul.f32 0.1, %v2274_v12  ;;  %v2279_v22 = vmul.f32 0.1, %v2233_v14  ;;  %v2277_v23 = vpop.f32.mrb[19].mxu1  ;;  %v2237_v45 = vpop.f32.mrb[19].mxu0 }
 0x87b   : > { %v2280_v24 = vmul.f32 0.1, %v2235_v18 }
 0x87c   : > { %v2284_v25 = vadd.f32 %v2281_v20, %v4009_v16  ;;  %v2282_v26 = vadd.f32 %v2279_v22, %v4012_v41 }
 0x87d   : > { %v2283_v27 = vadd.f32 %v2280_v24, %v4015_v53 }
 0x87e   : > { %v2289_v28 = vsel %vm3718_vm14, %v2284_v25, 0.0  ;;  %v2287_v29 = vsel %vm3710_vm12, %v2282_v26, 0.0 }
 0x87f   : > { %v2292_v33 = vpack.c.bf16 %v2289_v28, %v2289_v28  ;;  %v2290_v34 = vpack.c.bf16 %v2287_v29, %v2287_v29  ;;  %v2288_v35 = vsel %vm3714_vm13, %v2283_v27, 0.0 }
 0x880   : > { %v2291_v36 = vpack.c.bf16 %v2288_v35, %v2288_v35  ;;  %v3437_v37 = vpack.c.bf16 %v2288_v35, %v2287_v29 }
 0x881   : > { %2304 = vst.msk [vmem:[#allocation2 + $0xc] sm:$0xf] %vm485_vm15, %v2292_v33  ;;  %2423 = vst.msk [vmem:[#allocation3 + $0x70] sm:$0xf] %vm485_vm15, %v2292_v33 }
 0x882   : > { %2421 = vst [vmem:[#allocation3 + $0x60] sm:$0xf] %v2290_v34  ;;  %2422 = vst [vmem:[#allocation3 + $0x68] sm:$0xf] %v2291_v36 }
 0x883   : > { %2303 = vst [vmem:[#allocation2 + $0x4] sm:$0xff] %v3437_v37 }
 0x888   : > { %v3524_v16 = vld [vmem:[#allocation2 + $0xc] ss:$0 sps:$4 sm:$0xff]  }
 0x889   : > { %v3525_v41 = vld [vmem:[#allocation2 + $0xc] ss:$0 sps:$4 sm:$0xff]   ;;  %2462 = vrot.lane.b32.xlu0 %v3524_v16, %s3576_s26 }
 0x88a   : > { %v2306_v53 = vld [vmem:[#allocation2 + $0x8] sm:$0xff]  ;;  %v2305_v40 = vld [vmem:[#allocation2] sm:$0xff]  ;;  %2438 = vrot.lane.b32.xlu1 %v3525_v41, %s3575_s25 }
 0x88b   : > { %v3348_v42 = vcombine.high %v2305_v40, %v2305_v40  ;;  %v3349_v43 = vcombine.low %v2306_v53, %v2306_v53  ;;  %v3347_v46 = vcombine.low %v2305_v40, %v2305_v40  ;;  %v3350_v47 = vcombine.high %v2306_v53, %v2306_v53  ;;  %v3530_v44 = vld [vmem:[#allocation2 + $0xc] ss:$0 sps:$4 sm:$0xff]  }
 0x88c   : > { %v3531_v50 = vld [vmem:[#allocation2 + $0xc] ss:$0 sps:$4 sm:$0xff]  }
 0x88d   : > { %2319 = vrot.lane.b32.xlu0 %v3348_v42, %s3571_s21 }
 0x88e   : > { %2321 = vrot.lane.b32.xlu1 %v3349_v43, %s3571_s21 }
 0x891   : > { %2317 = vrot.lane.b32.xlu0 %v3347_v46, %s3571_s21 }
 0x892   : > { %2323 = vrot.lane.b32.xlu1 %v3350_v47, %s3571_s21 }
 0x895   : > { %2348 = vrot.lane.b32.xlu0 %v3348_v42, %s3572_s22 }
 0x896   : > { %2350 = vrot.lane.b32.xlu1 %v3349_v43, %s3572_s22 }
 0x899   : > { %2346 = vrot.lane.b32.xlu0 %v3347_v46, %s3572_s22 }
 0x89a   : > { %2352 = vrot.lane.b32.xlu1 %v3350_v47, %s3572_s22 }
 0x89d   : > { %2377 = vrot.lane.b32.xlu0 %v3348_v42, %s3573_s23 }
 0x89e   : > { %2379 = vrot.lane.b32.xlu1 %v3349_v43, %s3573_s23 }
 0x8a1   : > { %2375 = vrot.lane.b32.xlu0 %v3347_v46, %s3573_s23 }
 0x8a2   : > { %2381 = vrot.lane.b32.xlu1 %v3350_v47, %s3573_s23 }
 0x8a5   : > { %2406 = vrot.lane.b32.xlu0 %v3348_v42, %s3574_s24 }
 0x8a6   : > { %2408 = vrot.lane.b32.xlu1 %v3349_v43, %s3574_s24  ;;  %v2533_v43 = vld [vmem:[#allocation3 + $0x68] sm:$0xff] }
 0x8a9   : > { %2404 = vrot.lane.b32.xlu0 %v3347_v46, %s3574_s24 }
 0x8aa   : > { %2410 = vrot.lane.b32.xlu1 %v3350_v47, %s3574_s24 }
 0x8ad   : > { %2436 = vrot.lane.b32.xlu0 %v2291_v36, %s3575_s25 }
 0x8ae   : > { %2486 = vrot.lane.b32.xlu1 %v3530_v44, %s3577_s27 }
 0x8b1   : > { %2434 = vrot.lane.b32.xlu0 %v2290_v34, %s3575_s25 }
 0x8b2   : > { %2460 = vrot.lane.b32.xlu1 %v2291_v36, %s3576_s26 }
 0x8b5   : > { %2484 = vrot.lane.b32.xlu0 %v2291_v36, %s3577_s27 }
 0x8b6   : > { %2458 = vrot.lane.b32.xlu1 %v2290_v34, %s3576_s26 }
 0x8b9   : > { %2482 = vrot.lane.b32.xlu0 %v2290_v34, %s3577_s27 }
 0x8ba   : > { %2508 = vrot.lane.b32.xlu1 %v2291_v36, %s3578_s28 }
 0x8bd   : > { %2510 = vrot.lane.b32.xlu0 %v3531_v50, %s3578_s28  ;;  %v2532_v50 = vld [vmem:[#allocation3 + $0x60] sm:$0xff] }
 0x8be   : > { %2506 = vrot.lane.b32.xlu1 %v2290_v34, %s3578_s28 }
 0x8c1   : > { %2549 = vperm.xlu0 %3474, %v2286_v48  }
 0x8fb   : > { %v4261_v52 = vpop.permute.xlu0 %2462 }
 0x8fc   : > { %2471 = vst.msk [vmem:[#allocation3 + $0xa0] sm:$0xf] %vm485_vm15, %v4261_v52  ;;  %v4265_v54 = vpop.permute.xlu1 %2438 }
 0x8fd   : > { %2447 = vst.msk [vmem:[#allocation3 + $0x88] sm:$0xf] %vm485_vm15, %v4265_v54 }
 0x8ff   : > { %v2320_v55 = vpop.permute.xlu0 %2319 }
 0x900   : > { %v2322_v56 = vpop.permute.xlu1 %2321 }
 0x901   : > { %v2326_v57 = vsel %vm507_vm1, %v2320_v55, %v2322_v56 }
 0x902   : > { %2332 = vst [vmem:[#allocation3 + $0x8] sm:$0xf] %v2326_v57 }
 0x903   : > { %v2318_v58 = vpop.permute.xlu0 %2317 }
 0x904   : > { %v2324_v59 = vpop.permute.xlu1 %2323  ;;  %v2325_v60 = vsel %vm507_vm1, %v2318_v58, %v2320_v55  ;;  %v2537_v58 = vld [vmem:[#allocation3 + $0x88] sm:$0xff] }
 0x905   : > { %v2327_v61 = vsel %vm507_vm1, %v2322_v56, %v2324_v59  ;;  %2331 = vst [vmem:[#allocation3] sm:$0xf] %v2325_v60 }
 0x906   : > { %2333 = vst.msk [vmem:[#allocation3 + $0x10] sm:$0xf] %vm485_vm15, %v2327_v61 }
 0x907   : > { %v2349_v62 = vpop.permute.xlu0 %2348 }
 0x908   : > { %v2351_v63 = vpop.permute.xlu1 %2350 }
 0x909   : > { %v2355_v0 = vsel %vm537_vm2, %v2349_v62, %v2351_v63  ;;  %v2521_v2 = vld [vmem:[#allocation3 + $0x8] sm:$0xff] }
 0x90a   : > { %2361 = vst [vmem:[#allocation3 + $0x20] sm:$0xf] %v2355_v0  ;;  %2561 = vmatprep.subr.bf16.mxu0 %v2521_v2 }
 0x90b   : > { %v2347_v3 = vpop.permute.xlu0 %2346 }
 0x90c   : > { %v2353_v4 = vpop.permute.xlu1 %2352  ;;  %v2354_v5 = vsel %vm537_vm2, %v2347_v3, %v2349_v62  ;;  %v2520_v6 = vld [vmem:[#allocation3] sm:$0xff] }
 0x90d   : > { %v2356_v7 = vsel %vm537_vm2, %v2351_v63, %v2353_v4  ;;  %2360 = vst [vmem:[#allocation3 + $0x18] sm:$0xf] %v2354_v5  ;;  %2562 = vmatpush1.bf16.msra.mxu0 %v2520_v6  ;;  %v2522_v8 = vld [vmem:[#allocation3 + $0x10] sm:$0xff]  ;;  %v2540_v3 = vld [vmem:[#allocation3 + $0xa0] sm:$0xff] }
 0x90e   : > { %2362 = vst.msk [vmem:[#allocation3 + $0x28] sm:$0xf] %vm485_vm15, %v2356_v7  ;;  %2603 = vmatpush1.bf16.msra.mxu1 %v2522_v8 }
 0x90f   : > { %v2378_v9 = vpop.permute.xlu0 %2377  ;;  %2604 = vmatprep.subr.bf16.mxu1 %v3570_v1 }
 0x910   : > { %v2380_v10 = vpop.permute.xlu1 %2379 }
 0x911   : > { %v2384_v11 = vsel %vm567_vm3, %v2378_v9, %v2380_v10  ;;  %v2524_v12 = vld [vmem:[#allocation3 + $0x20] sm:$0xff] }
 0x912   : > { %2390 = vst [vmem:[#allocation3 + $0x38] sm:$0xf] %v2384_v11  ;;  %2563 = vmatprep.subr.bf16.mxu0 %v2524_v12 }
 0x913   : > { %v2376_v14 = vpop.permute.xlu0 %2375 }
 0x914   : > { %v2382_v38 = vpop.permute.xlu1 %2381  ;;  %v2383_v15 = vsel %vm567_vm3, %v2376_v14, %v2378_v9  ;;  %v2523_v18 = vld [vmem:[#allocation3 + $0x18] sm:$0xff]  ;;  %v3375_v9 = vcombine.low %v4250_v49, %v4250_v49 }
 0x915   : > { %v2385_v19 = vsel %vm567_vm3, %v2380_v10, %v2382_v38  ;;  %2389 = vst [vmem:[#allocation3 + $0x30] sm:$0xf] %v2383_v15  ;;  %2564 = vmatpush1.bf16.msra.mxu0 %v2523_v18  ;;  %v2525_v39 = vld [vmem:[#allocation3 + $0x28] sm:$0xff] }
 0x916   : > { %2391 = vst.msk [vmem:[#allocation3 + $0x40] sm:$0xf] %vm485_vm15, %v2385_v19  ;;  %2605 = vmatpush1.bf16.msra.mxu1 %v2525_v39 }
 0x917   : > { %v2407_v20 = vpop.permute.xlu0 %2406  ;;  %2606 = vmatprep.subr.bf16.mxu1 %v3570_v1 }
 0x918   : > { %v2409_v22 = vpop.permute.xlu1 %2408 }
 0x919   : > { %v2413_v23 = vsel %vm597_vm4, %v2407_v20, %v2409_v22  ;;  %v2527_v45 = vld [vmem:[#allocation3 + $0x38] sm:$0xff] }
 0x91a   : > { %2419 = vst [vmem:[#allocation3 + $0x50] sm:$0xf] %v2413_v23  ;;  %2565 = vmatprep.subr.bf16.mxu0 %v2527_v45 }
 0x91b   : > { %v2405_v24 = vpop.permute.xlu0 %2404 }
 0x91c   : > { %v2411_v25 = vpop.permute.xlu1 %2410  ;;  %v2412_v26 = vsel %vm597_vm4, %v2405_v24, %v2407_v20  ;;  %v2526_v27 = vld [vmem:[#allocation3 + $0x30] sm:$0xff] }
 0x91d   : > { %v2414_v28 = vsel %vm597_vm4, %v2409_v22, %v2411_v25  ;;  %2418 = vst [vmem:[#allocation3 + $0x48] sm:$0xf] %v2412_v26  ;;  %2566 = vmatpush1.bf16.msra.mxu0 %v2526_v27  ;;  %v2528_v29 = vld [vmem:[#allocation3 + $0x40] sm:$0xff] }
 0x91e   : > { %2420 = vst.msk [vmem:[#allocation3 + $0x58] sm:$0xf] %vm485_vm15, %v2414_v28  ;;  %2607 = vmatpush1.bf16.msra.mxu1 %v2528_v29 }
 0x91f   : > { %v2437_v33 = vpop.permute.xlu0 %2436  ;;  %2608 = vmatprep.subr.bf16.mxu1 %v3570_v1 }
 0x920   : > { %v2487_v34 = vpop.permute.xlu1 %2486  ;;  %v2441_v35 = vsel %vm626_vm5, %v2437_v33, %v4265_v54 }
 0x921   : > { %2495 = vst.msk [vmem:[#allocation3 + $0xb8] sm:$0xf] %vm485_vm15, %v2487_v34  ;;  %2446 = vst [vmem:[#allocation3 + $0x80] sm:$0xf] %v2441_v35  ;;  %v2530_v36 = vld [vmem:[#allocation3 + $0x50] sm:$0xff] }
 0x922   : > { %2567 = vmatprep.subr.bf16.mxu0 %v2530_v36 }
 0x923   : > { %v2435_v37 = vpop.permute.xlu0 %2434 }
 0x924   : > { %v2461_v16 = vpop.permute.xlu1 %2460  ;;  %v2440_v41 = vsel %vm626_vm5, %v2435_v37, %v2437_v33  ;;  %v2529_v53 = vld [vmem:[#allocation3 + $0x48] sm:$0xff] }
 0x925   : > { %v2465_v40 = vsel %vm651_vm6, %v2461_v16, %v4261_v52  ;;  %2445 = vst [vmem:[#allocation3 + $0x78] sm:$0xf] %v2440_v41  ;;  %2568 = vmatpush1.bf16.msra.mxu0 %v2529_v53  ;;  %v2531_v42 = vld [vmem:[#allocation3 + $0x58] sm:$0xff]  ;;  %v2534_v52 = vld [vmem:[#allocation3 + $0x70] sm:$0xff] }
 0x926   : > { %2470 = vst [vmem:[#allocation3 + $0x98] sm:$0xf] %v2465_v40  ;;  %2609 = vmatpush1.bf16.msra.mxu1 %v2531_v42  ;;  %2569 = vmatprep.subr.bf16.mxu0 %v2533_v43  ;;  %v2649_v53 = vld [vmem:[%s4449_s9] sm:$0xff]  ;;  %v2650_v40 = vld [vmem:[%s4449_s9 + $0x8] sm:$0xff]  ;;  %v2651_v42 = vld [vmem:[%s4449_s9 + $0x10] sm:$0xff] }
 0x927   : > { %v2485_v46 = vpop.permute.xlu0 %2484  ;;  %2610 = vmatprep.subr.bf16.mxu1 %v3570_v1  ;;  %v2652_v43 = vld [vmem:[%s4449_s9 + $0x18] sm:$0xff] }
 0x928   : > { %v2459_v47 = vpop.permute.xlu1 %2458  ;;  %v2489_v44 = vsel %vm676_vm7, %v2485_v46, %v2487_v34  ;;  %v2536_v51 = vld [vmem:[#allocation3 + $0x80] sm:$0xff]  ;;  %v2543_v5 = vld [vmem:[#allocation3 + $0xb8] sm:$0xff] }
 0x929   : > { %v2464_v48 = vsel %vm651_vm6, %v2459_v47, %v2461_v16  ;;  %2494 = vst [vmem:[#allocation3 + $0xb0] sm:$0xf] %v2489_v44  ;;  %2570 = vmatpush1.bf16.msra.mxu0 %v2532_v50  ;;  %v3542_v16 = vld [vmem:[%s4448_s8 + $0x4] ss:$8 sps:$4 sm:$0xff]  }
 0x92a   : > { %2469 = vst [vmem:[#allocation3 + $0x90] sm:$0xf] %v2464_v48  ;;  %2611 = vmatpush1.bf16.msra.mxu1 %v2534_v52  ;;  %2571 = vmatprep.subr.bf16.mxu0 %v2536_v51 }
 0x92b   : > { %v2483_v54 = vpop.permute.xlu0 %2482  ;;  %2612 = vmatprep.subr.bf16.mxu1 %v3570_v1 }
 0x92c   : > { %v2509_v55 = vpop.permute.xlu1 %2508  ;;  %v2488_v56 = vsel %vm676_vm7, %v2483_v54, %v2485_v46  ;;  %v2535_v57 = vld [vmem:[#allocation3 + $0x78] sm:$0xff] }
 0x92d   : > { %2493 = vst [vmem:[#allocation3 + $0xa8] sm:$0xf] %v2488_v56  ;;  %2572 = vmatpush1.bf16.msra.mxu0 %v2535_v57  ;;  %v2539_v59 = vld [vmem:[#allocation3 + $0x98] sm:$0xff] }
 0x92e   : > { %2613 = vmatpush1.bf16.msra.mxu1 %v2537_v58  ;;  %2573 = vmatprep.subr.bf16.mxu0 %v2539_v59 }
 0x92f   : > { %v2511_v60 = vpop.permute.xlu0 %2510  ;;  %2614 = vmatprep.subr.bf16.mxu1 %v3570_v1 }
 0x930   : > { %v2507_v61 = vpop.permute.xlu1 %2506  ;;  %v2513_v62 = vsel %vm701_vm8, %v2509_v55, %v2511_v60  ;;  %2519 = vst.msk [vmem:[#allocation3 + $0xd0] sm:$0xf] %vm485_vm15, %v2511_v60  ;;  %v2542_v63 = vld [vmem:[#allocation3 + $0xb0] sm:$0xff] }
 0x931   : > { %v2512_v0 = vsel %vm701_vm8, %v2507_v61, %v2509_v55  ;;  %2518 = vst [vmem:[#allocation3 + $0xc8] sm:$0xf] %v2513_v62  ;;  %v2538_v2 = vld [vmem:[#allocation3 + $0x90] sm:$0xff] }
 0x932   : > { %2517 = vst [vmem:[#allocation3 + $0xc0] sm:$0xf] %v2512_v0  ;;  %2574 = vmatpush1.bf16.msra.mxu0 %v2538_v2  ;;  %2615 = vmatpush1.bf16.msra.mxu1 %v2540_v3 }
 0x933   : > { %2575 = vmatprep.subr.bf16.mxu0 %v2542_v63  ;;  %2616 = vmatprep.subr.bf16.mxu1 %v3570_v1 }
 0x934   : > { %v2541_v4 = vld [vmem:[#allocation3 + $0xa8] sm:$0xff] }
 0x936   : > { %2576 = vmatpush1.bf16.msra.mxu0 %v2541_v4  ;;  %2617 = vmatpush1.bf16.msra.mxu1 %v2543_v5 }
 0x937   : > { %2618 = vmatprep.subr.bf16.mxu1 %v3570_v1  ;;  %v2546_v6 = vld [vmem:[#allocation3 + $0xd0] sm:$0xff] }
 0x938   : > { %v2545_v7 = vld [vmem:[#allocation3 + $0xc8] sm:$0xff] }
 0x939   : > { %2577 = vmatprep.subr.bf16.mxu0 %v2545_v7  ;;  %v2544_v8 = vld [vmem:[#allocation3 + $0xc0] sm:$0xff] }
 0x93a   : > { %2619 = vmatpush1.bf16.msra.mxu1 %v2546_v6  ;;  %2578 = vmatpush1.bf16.msra.mxu0 %v2544_v8 }
 0x93b   : > { %3010 = vmatprep.subr.bf16.mxu1 %v3570_v1 }
 0x93d   : > { %2635 = vmatmul.mubr.bf16.vlgmr.msra.gmra.mrb[20].mxu1 %v3375_v9  ;;  %2594 = vmatmul.mubr.bf16.vlgmr.msra.gmra.mrb[20].mxu0 %v3375_v9 }
 0x93e   : > { %3415 = vmatprep.mubr.msk.bf16.mxu1 %vm748_vm0, %v3542_v16  ;;  %3413 = vmatprep.mubr.msk.bf16.mxu0 %vm748_vm0, %v3542_v16 }
 0x940   : > { %v2550_v10 = vpop.permute.xlu0 %2549 }
 0xa10   : > { %v2636_v11 = vpop.f32.mrb[20].mxu1  ;;  %v2595_v12 = vpop.f32.mrb[20].mxu0 }
 0xa11   : > { %v2637_v14 = vadd.f32 %v2636_v11, %v2550_v10  ;;  %v2596_v38 = vadd.f32 %v2595_v12, %v2550_v10  ;;  %v2638_v15 = vpop.f32.mrb[21].mxu1  ;;  %v2597_v18 = vpop.f32.mrb[21].mxu0 }
 0xa12   : > { %v2598_v19 = vadd.f32 %v2597_v18, %v2550_v10  ;;  %v2639_v39 = vpop.f32.mrb[22].mxu1  ;;  %v2599_v20 = vpop.f32.mrb[22].mxu0 }
 0xa13   : > { %v2644_v22 = vadd.f32 %v2637_v14, %v3809_v13  ;;  %v2642_v49 = vadd.f32 %v2596_v38, %v3814_v17  ;;  %v2640_v23 = vpop.f32.mrb[23].mxu1  ;;  %v2600_v45 = vpop.f32.mrb[23].mxu0 }
 0xa14   : > { %v2643_v24 = vadd.f32 %v2598_v19, %v3816_v21 }
 0xa15   : > { %v2655_v25 = vsel %vm3718_vm14, %v2644_v22, 0.0  ;;  %v2653_v26 = vsel %vm3710_vm12, %v2642_v49, 0.0 }
 0xa16   : > { %v2658_v27 = vpack.c.bf16 %v2655_v25, %v2655_v25  ;;  %v2656_v28 = vpack.c.bf16 %v2653_v26, %v2653_v26  ;;  %v2654_v29 = vsel %vm3714_vm13, %v2643_v24, 0.0 }
 0xa17   : > { %v2657_v33 = vpack.c.bf16 %v2654_v29, %v2654_v29  ;;  %v3439_v34 = vpack.c.bf16 %v2654_v29, %v2653_v26 }
 0xa18   : > { %2670 = vst.msk [vmem:[#allocation2 + $0xc] sm:$0xf] %vm485_vm15, %v2658_v27  ;;  %2789 = vst.msk [vmem:[#allocation3 + $0x70] sm:$0xf] %vm485_vm15, %v2658_v27 }
 0xa19   : > { %2787 = vst [vmem:[#allocation3 + $0x60] sm:$0xf] %v2656_v28  ;;  %2669 = vst [vmem:[#allocation2 + $0x4] sm:$0xff] %v3439_v34 }
 0xa1a   : > { %2788 = vst [vmem:[#allocation3 + $0x68] sm:$0xf] %v2657_v33 }
 0xa1f   : > { %v3534_v13 = vld [vmem:[#allocation2 + $0xc] ss:$0 sps:$4 sm:$0xff]  }
 0xa20   : > { %v3535_v32 = vld [vmem:[#allocation2 + $0xc] ss:$0 sps:$4 sm:$0xff]   ;;  %v2671_v21 = vld [vmem:[#allocation2] sm:$0xff]  ;;  %2828 = vrot.lane.b32.xlu1 %v3534_v13, %s3576_s26 }
 0xa21   : > { %v2672_v17 = vld [vmem:[#allocation2 + $0x8] sm:$0xff]  ;;  %v3382_v30 = vcombine.high %v2671_v21, %v2671_v21  ;;  %2804 = vrot.lane.b32.xlu0 %v3535_v32, %s3575_s25  ;;  %v3381_v35 = vcombine.low %v2671_v21, %v2671_v21  ;;  %v2899_v32 = vld [vmem:[#allocation3 + $0x68] sm:$0xff] }
 0xa22   : > { %v3383_v31 = vcombine.low %v2672_v17, %v2672_v17  ;;  %v3384_v36 = vcombine.high %v2672_v17, %v2672_v17  ;;  %v3540_v37 = vld [vmem:[#allocation2 + $0xc] ss:$0 sps:$4 sm:$0xff]  }
 0xa23   : > { %v3541_v41 = vld [vmem:[#allocation2 + $0xc] ss:$0 sps:$4 sm:$0xff]  }
 0xa24   : > { %2685 = vrot.lane.b32.xlu1 %v3382_v30, %s3571_s21 }
 0xa25   : > { %2687 = vrot.lane.b32.xlu0 %v3383_v31, %s3571_s21 }
 0xa28   : > { %2683 = vrot.lane.b32.xlu1 %v3381_v35, %s3571_s21 }
 0xa29   : > { %2689 = vrot.lane.b32.xlu0 %v3384_v36, %s3571_s21 }
 0xa2c   : > { %2714 = vrot.lane.b32.xlu1 %v3382_v30, %s3572_s22 }
 0xa2d   : > { %2716 = vrot.lane.b32.xlu0 %v3383_v31, %s3572_s22 }
 0xa30   : > { %2712 = vrot.lane.b32.xlu1 %v3381_v35, %s3572_s22 }
 0xa31   : > { %2718 = vrot.lane.b32.xlu0 %v3384_v36, %s3572_s22  ;;  %s4423_s22 = scalar_lea.vmem %s4450_s10, %s3450_s11 }
 0xa34   : > { %2743 = vrot.lane.b32.xlu1 %v3382_v30, %s3573_s23 }
 0xa35   : > { %2745 = vrot.lane.b32.xlu0 %v3383_v31, %s3573_s23 }
 0xa38   : > { %2741 = vrot.lane.b32.xlu1 %v3381_v35, %s3573_s23 }
 0xa39   : > { %2747 = vrot.lane.b32.xlu0 %v3384_v36, %s3573_s23 }
 0xa3c   : > { %2772 = vrot.lane.b32.xlu1 %v3382_v30, %s3574_s24 }
 0xa3d   : > { %2774 = vrot.lane.b32.xlu0 %v3383_v31, %s3574_s24  ;;  %v2898_v31 = vld [vmem:[#allocation3 + $0x60] sm:$0xff] }
 0xa40   : > { %2770 = vrot.lane.b32.xlu1 %v3381_v35, %s3574_s24 }
 0xa41   : > { %2776 = vrot.lane.b32.xlu0 %v3384_v36, %s3574_s24 }
 0xa44   : > { %2802 = vrot.lane.b32.xlu1 %v2657_v33, %s3575_s25 }
 0xa45   : > { %2852 = vrot.lane.b32.xlu0 %v3540_v37, %s3577_s27  ;;  %v2900_v37 = vld [vmem:[#allocation3 + $0x70] sm:$0xff] }
 0xa48   : > { %2800 = vrot.lane.b32.xlu1 %v2656_v28, %s3575_s25 }
 0xa49   : > { %2826 = vrot.lane.b32.xlu0 %v2657_v33, %s3576_s26 }
 0xa4c   : > { %2850 = vrot.lane.b32.xlu1 %v2657_v33, %s3577_s27 }
 0xa4d   : > { %2824 = vrot.lane.b32.xlu0 %v2656_v28, %s3576_s26 }
 0xa50   : > { %2848 = vrot.lane.b32.xlu1 %v2656_v28, %s3577_s27 }
 0xa51   : > { %2874 = vrot.lane.b32.xlu0 %v2657_v33, %s3578_s28 }
 0xa54   : > { %2876 = vrot.lane.b32.xlu1 %v3541_v41, %s3578_s28 }
 0xa55   : > { %2872 = vrot.lane.b32.xlu0 %v2656_v28, %s3578_s28 }
 0xa58   : > { %2915 = vperm.xlu1 %3475, %v2649_v53  }
 0xa59   : > { %2920 = vperm.xlu0 %3474, %v2650_v40  }
 0xa5c   : > { %2925 = vperm.xlu1 %3475, %v2651_v42  }
 0xa5d   : > { %2930 = vperm.xlu0 %3474, %v2652_v43  }
 0xa92   : > { %v4364_v46 = vpop.permute.xlu1 %2828 }
 0xa93   : > { %2837 = vst.msk [vmem:[#allocation3 + $0xa0] sm:$0xf] %vm485_vm15, %v4364_v46  ;;  %v4368_v47 = vpop.permute.xlu0 %2804 }
 0xa94   : > { %2813 = vst.msk [vmem:[#allocation3 + $0x88] sm:$0xf] %vm485_vm15, %v4368_v47 }
 0xa96   : > { %v2686_v44 = vpop.permute.xlu1 %2685 }
 0xa97   : > { %v2688_v50 = vpop.permute.xlu0 %2687 }
 0xa98   : > { %v2692_v51 = vsel %vm507_vm1, %v2686_v44, %v2688_v50 }
 0xa99   : > { %2698 = vst [vmem:[#allocation3 + $0x8] sm:$0xf] %v2692_v51 }
 0xa9a   : > { %v2684_v48 = vpop.permute.xlu1 %2683 }
 0xa9b   : > { %v2690_v52 = vpop.permute.xlu0 %2689  ;;  %v2691_v54 = vsel %vm507_vm1, %v2684_v48, %v2686_v44  ;;  %v2903_v42 = vld [vmem:[#allocation3 + $0x88] sm:$0xff] }
 0xa9c   : > { %v2693_v55 = vsel %vm507_vm1, %v2688_v50, %v2690_v52  ;;  %2697 = vst [vmem:[#allocation3] sm:$0xf] %v2691_v54  ;;  %v2906_v52 = vld [vmem:[#allocation3 + $0xa0] sm:$0xff] }
 0xa9d   : > { %2699 = vst.msk [vmem:[#allocation3 + $0x10] sm:$0xf] %vm485_vm15, %v2693_v55 }
 0xa9e   : > { %v2715_v56 = vpop.permute.xlu1 %2714 }
 0xa9f   : > { %v2717_v57 = vpop.permute.xlu0 %2716 }
 0xaa0   : > { %v2721_v58 = vsel %vm537_vm2, %v2715_v56, %v2717_v57  ;;  %v2887_v59 = vld [vmem:[#allocation3 + $0x8] sm:$0xff] }
 0xaa1   : > { %2727 = vst [vmem:[#allocation3 + $0x20] sm:$0xf] %v2721_v58  ;;  %2957 = vmatprep.subr.bf16.mxu0 %v2887_v59  ;;  %v3544_v59 = vld [vmem:[%s4448_s8] ss:$8 sps:$4 sm:$0xff]  }
 0xaa2   : > { %v2713_v60 = vpop.permute.xlu1 %2712 }
 0xaa3   : > { %v2719_v61 = vpop.permute.xlu0 %2718  ;;  %v2720_v62 = vsel %vm537_vm2, %v2713_v60, %v2715_v56  ;;  %v2886_v63 = vld [vmem:[#allocation3] sm:$0xff] }
 0xaa4   : > { %v2722_v0 = vsel %vm537_vm2, %v2717_v57, %v2719_v61  ;;  %2726 = vst [vmem:[#allocation3 + $0x18] sm:$0xf] %v2720_v62  ;;  %2958 = vmatpush1.bf16.msra.mxu0 %v2886_v63  ;;  %v2888_v2 = vld [vmem:[#allocation3 + $0x10] sm:$0xff]  ;;  %v3545_v60 = vld [vmem:[%s4448_s8 + $0x14] ss:$8 sps:$4 sm:$0xff]  }
 0xaa5   : > { %2728 = vst.msk [vmem:[#allocation3 + $0x28] sm:$0xf] %vm485_vm15, %v2722_v0  ;;  %3011 = vmatpush1.bf16.msra.mxu1 %v2888_v2 }
 0xaa6   : > { %v2744_v3 = vpop.permute.xlu1 %2743  ;;  %3012 = vmatprep.subr.bf16.mxu1 %v3570_v1 }
 0xaa7   : > { %v2746_v4 = vpop.permute.xlu0 %2745 }
 0xaa8   : > { %v2750_v5 = vsel %vm567_vm3, %v2744_v3, %v2746_v4  ;;  %v2890_v6 = vld [vmem:[#allocation3 + $0x20] sm:$0xff] }
 0xaa9   : > { %2756 = vst [vmem:[#allocation3 + $0x38] sm:$0xf] %v2750_v5  ;;  %2959 = vmatprep.subr.bf16.mxu0 %v2890_v6 }
 0xaaa   : > { %v2742_v7 = vpop.permute.xlu1 %2741 }
 0xaab   : > { %v2748_v8 = vpop.permute.xlu0 %2747  ;;  %v2749_v9 = vsel %vm567_vm3, %v2742_v7, %v2744_v3  ;;  %v2889_v10 = vld [vmem:[#allocation3 + $0x18] sm:$0xff] }
 0xaac   : > { %v2751_v11 = vsel %vm567_vm3, %v2746_v4, %v2748_v8  ;;  %2755 = vst [vmem:[#allocation3 + $0x30] sm:$0xf] %v2749_v9  ;;  %2960 = vmatpush1.bf16.msra.mxu0 %v2889_v10  ;;  %v2891_v12 = vld [vmem:[#allocation3 + $0x28] sm:$0xff] }
 0xaad   : > { %2757 = vst.msk [vmem:[#allocation3 + $0x40] sm:$0xf] %vm485_vm15, %v2751_v11  ;;  %3013 = vmatpush1.bf16.msra.mxu1 %v2891_v12 }
 0xaae   : > { %v2773_v14 = vpop.permute.xlu1 %2772  ;;  %3014 = vmatprep.subr.bf16.mxu1 %v3570_v1 }
 0xaaf   : > { %v2775_v38 = vpop.permute.xlu0 %2774 }
 0xab0   : > { %v2779_v15 = vsel %vm597_vm4, %v2773_v14, %v2775_v38  ;;  %v2893_v18 = vld [vmem:[#allocation3 + $0x38] sm:$0xff] }
 0xab1   : > { %2785 = vst [vmem:[#allocation3 + $0x50] sm:$0xf] %v2779_v15  ;;  %2961 = vmatprep.subr.bf16.mxu0 %v2893_v18 }
 0xab2   : > { %v2771_v19 = vpop.permute.xlu1 %2770 }
 0xab3   : > { %v2777_v39 = vpop.permute.xlu0 %2776  ;;  %v2778_v20 = vsel %vm597_vm4, %v2771_v19, %v2773_v14  ;;  %v2892_v22 = vld [vmem:[#allocation3 + $0x30] sm:$0xff] }
 0xab4   : > { %v2780_v49 = vsel %vm597_vm4, %v2775_v38, %v2777_v39  ;;  %2784 = vst [vmem:[#allocation3 + $0x48] sm:$0xf] %v2778_v20  ;;  %2962 = vmatpush1.bf16.msra.mxu0 %v2892_v22  ;;  %v2894_v23 = vld [vmem:[#allocation3 + $0x40] sm:$0xff] }
 0xab5   : > { %2786 = vst.msk [vmem:[#allocation3 + $0x58] sm:$0xf] %vm485_vm15, %v2780_v49  ;;  %3015 = vmatpush1.bf16.msra.mxu1 %v2894_v23 }
 0xab6   : > { %v2803_v45 = vpop.permute.xlu1 %2802  ;;  %3016 = vmatprep.subr.bf16.mxu1 %v3570_v1 }
 0xab7   : > { %v2853_v24 = vpop.permute.xlu0 %2852  ;;  %v2807_v25 = vsel %vm626_vm5, %v2803_v45, %v4368_v47 }
 0xab8   : > { %2861 = vst.msk [vmem:[#allocation3 + $0xb8] sm:$0xf] %vm485_vm15, %v2853_v24  ;;  %2812 = vst [vmem:[#allocation3 + $0x80] sm:$0xf] %v2807_v25  ;;  %v2896_v26 = vld [vmem:[#allocation3 + $0x50] sm:$0xff] }
 0xab9   : > { %2963 = vmatprep.subr.bf16.mxu0 %v2896_v26 }
 0xaba   : > { %v2801_v27 = vpop.permute.xlu1 %2800 }
 0xabb   : > { %v2827_v28 = vpop.permute.xlu0 %2826  ;;  %v2806_v29 = vsel %vm626_vm5, %v2801_v27, %v2803_v45  ;;  %v2895_v33 = vld [vmem:[#allocation3 + $0x48] sm:$0xff] }
 0xabc   : > { %v2831_v34 = vsel %vm651_vm6, %v2827_v28, %v4364_v46  ;;  %2811 = vst [vmem:[#allocation3 + $0x78] sm:$0xf] %v2806_v29  ;;  %2964 = vmatpush1.bf16.msra.mxu0 %v2895_v33  ;;  %v2897_v13 = vld [vmem:[#allocation3 + $0x58] sm:$0xff] }
 0xabd   : > { %2836 = vst [vmem:[#allocation3 + $0x98] sm:$0xf] %v2831_v34  ;;  %3017 = vmatpush1.bf16.msra.mxu1 %v2897_v13  ;;  %2965 = vmatprep.subr.bf16.mxu0 %v2899_v32 }
 0xabe   : > { %v2851_v17 = vpop.permute.xlu1 %2850  ;;  %3018 = vmatprep.subr.bf16.mxu1 %v3570_v1 }
 0xabf   : > { %v2825_v21 = vpop.permute.xlu0 %2824  ;;  %v2855_v30 = vsel %vm676_vm7, %v2851_v17, %v2853_v24  ;;  %v2902_v35 = vld [vmem:[#allocation3 + $0x80] sm:$0xff]  ;;  %v2909_v55 = vld [vmem:[#allocation3 + $0xb8] sm:$0xff] }
 0xac0   : > { %v2830_v36 = vsel %vm651_vm6, %v2825_v21, %v2827_v28  ;;  %2860 = vst [vmem:[#allocation3 + $0xb0] sm:$0xf] %v2855_v30  ;;  %2966 = vmatpush1.bf16.msra.mxu0 %v2898_v31 }
 0xac1   : > { %2835 = vst [vmem:[#allocation3 + $0x90] sm:$0xf] %v2830_v36  ;;  %3019 = vmatpush1.bf16.msra.mxu1 %v2900_v37  ;;  %2967 = vmatprep.subr.bf16.mxu0 %v2902_v35 }
 0xac2   : > { %v2849_v16 = vpop.permute.xlu1 %2848  ;;  %3020 = vmatprep.subr.bf16.mxu1 %v3570_v1 }
 0xac3   : > { %v2875_v41 = vpop.permute.xlu0 %2874  ;;  %v2854_v53 = vsel %vm676_vm7, %v2849_v16, %v2851_v17  ;;  %v2901_v40 = vld [vmem:[#allocation3 + $0x78] sm:$0xff] }
 0xac4   : > { %2859 = vst [vmem:[#allocation3 + $0xa8] sm:$0xf] %v2854_v53  ;;  %2968 = vmatpush1.bf16.msra.mxu0 %v2901_v40  ;;  %v2905_v43 = vld [vmem:[#allocation3 + $0x98] sm:$0xff] }
 0xac5   : > { %3021 = vmatpush1.bf16.msra.mxu1 %v2903_v42  ;;  %2969 = vmatprep.subr.bf16.mxu0 %v2905_v43 }
 0xac6   : > { %v2877_v46 = vpop.permute.xlu1 %2876  ;;  %3022 = vmatprep.subr.bf16.mxu1 %v3570_v1 }
 0xac7   : > { %v2873_v47 = vpop.permute.xlu0 %2872  ;;  %v2879_v44 = vsel %vm701_vm8, %v2875_v41, %v2877_v46  ;;  %2885 = vst.msk [vmem:[#allocation3 + $0xd0] sm:$0xf] %vm485_vm15, %v2877_v46  ;;  %v2908_v50 = vld [vmem:[#allocation3 + $0xb0] sm:$0xff] }
 0xac8   : > { %v2878_v51 = vsel %vm701_vm8, %v2873_v47, %v2875_v41  ;;  %2884 = vst [vmem:[#allocation3 + $0xc8] sm:$0xf] %v2879_v44  ;;  %v2904_v48 = vld [vmem:[#allocation3 + $0x90] sm:$0xff] }
 0xac9   : > { %2883 = vst [vmem:[#allocation3 + $0xc0] sm:$0xf] %v2878_v51  ;;  %2970 = vmatpush1.bf16.msra.mxu0 %v2904_v48  ;;  %3023 = vmatpush1.bf16.msra.mxu1 %v2906_v52 }
 0xaca   : > { %2971 = vmatprep.subr.bf16.mxu0 %v2908_v50  ;;  %3024 = vmatprep.subr.bf16.mxu1 %v3570_v1 }
 0xacb   : > { %v2907_v54 = vld [vmem:[#allocation3 + $0xa8] sm:$0xff] }
 0xacd   : > { %2972 = vmatpush1.bf16.msra.mxu0 %v2907_v54  ;;  %3025 = vmatpush1.bf16.msra.mxu1 %v2909_v55 }
 0xace   : > { %3026 = vmatprep.subr.bf16.mxu1 %v3570_v1  ;;  %v2912_v56 = vld [vmem:[#allocation3 + $0xd0] sm:$0xff]  ;;  %v3547_v1 = vld [vmem:[%s4448_s8 + $0x10] ss:$8 sps:$4 sm:$0xff]  }
 0xacf   : > { %v2911_v57 = vld [vmem:[#allocation3 + $0xc8] sm:$0xff] }
 0xad0   : > { %2973 = vmatprep.subr.bf16.mxu0 %v2911_v57  ;;  %v2910_v58 = vld [vmem:[#allocation3 + $0xc0] sm:$0xff] }
 0xad1   : > { %3027 = vmatpush1.bf16.msra.mxu1 %v2912_v56  ;;  %2974 = vmatpush1.bf16.msra.mxu0 %v2910_v58 }
 0xad4   : > { %3043 = vmatmul.mubr.bf16.vlgmr.msra.gmra.mrb[24].mxu1 %v3544_v59  ;;  %2990 = vmatmul.mubr.bf16.vlgmr.msra.gmra.mrb[24].mxu0 %v3544_v59 }
 0xad5   : > { %3416 = vmatprep.mubr.msk.bf16.mxu1 %vm748_vm0, %v3545_v60  ;;  %3414 = vmatprep.mubr.msk.bf16.mxu0 %vm748_vm0, %v3545_v60 }
 0xad7   : > { %v2916_v62 = vpop.permute.xlu1 %2915 }
 0xad8   : > { %v2921_v61 = vpop.permute.xlu0 %2920 }
 0xadb   : > { %v2926_v20 = vpop.permute.xlu1 %2925 }
 0xadc   : > { %3051 = vmatmul.mubr.bf16.gmra.mrb[28].mxu1 %v3547_v1  ;;  %3000 = vmatmul.mubr.bf16.gmra.mrb[28].mxu0 %v3547_v1  ;;  %v2931_v39 = vpop.permute.xlu0 %2930 }
 0xba7   : > { %v3044_v63 = vpop.f32.mrb[24].mxu1  ;;  %v2991_v0 = vpop.f32.mrb[24].mxu0 }
 0xba8   : > { %v3045_v2 = vadd.f32 %v3044_v63, %v2916_v62  ;;  %v2992_v3 = vadd.f32 %v2991_v0, %v2916_v62  ;;  %v3046_v4 = vpop.f32.mrb[25].mxu1  ;;  %v2993_v5 = vpop.f32.mrb[25].mxu0 }
 0xba9   : > { %v2994_v6 = vadd.f32 %v2993_v5, %v2916_v62  ;;  %v3047_v7 = vpop.f32.mrb[26].mxu1  ;;  %v2995_v8 = vpop.f32.mrb[26].mxu0 }
 0xbaa   : > { %v3442_v9 = vpack.c.bf16 %v3045_v2, %v3045_v2  ;;  %v3048_v10 = vadd.f32 %v3047_v7, %v2921_v61  ;;  %v2996_v11 = vadd.f32 %v2995_v8, %v2921_v61  ;;  %v3049_v12 = vpop.f32.mrb[27].mxu1  ;;  %v2997_v14 = vpop.f32.mrb[27].mxu0 }
 0xbab   : > { %v3441_v38 = vpack.c.bf16 %v2994_v6, %v2992_v3  ;;  %v2998_v15 = vadd.f32 %v2997_v14, %v2921_v61 }
 0xbac   : > { %3100 = vst.msk [vmem:[%s4423_s22 + $0x8] sm:$0xf] %vm485_vm15, %v3442_v9  ;;  %v3444_v18 = vpack.c.bf16 %v3048_v10, %v3048_v10 }
 0xbad   : > { %3099 = vst [vmem:[%s4423_s22] sm:$0xff] %v3441_v38  ;;  %v3443_v19 = vpack.c.bf16 %v2998_v15, %v2996_v11 }
 0xbae   : > { %3102 = vst.msk [vmem:[%s4423_s22 + $0x14] sm:$0xf] %vm485_vm15, %v3444_v18 }
 0xbaf   : > { %3101 = vst [vmem:[%s4423_s22 + $0xc] sm:$0xff] %v3443_v19  ;;  %v3052_v22 = vpop.f32.mrb[28].mxu1  ;;  %v3001_v49 = vpop.f32.mrb[28].mxu0 }
 0xbb0   : > { %v3053_v23 = vadd.f32 %v3052_v22, %v2926_v20  ;;  %v3002_v45 = vadd.f32 %v3001_v49, %v2926_v20  ;;  %v3054_v24 = vpop.f32.mrb[29].mxu1  ;;  %v3003_v25 = vpop.f32.mrb[29].mxu0 }
 0xbb1   : > { %v3004_v26 = vadd.f32 %v3003_v25, %v2926_v20  ;;  %v3055_v27 = vpop.f32.mrb[30].mxu1  ;;  %v3005_v28 = vpop.f32.mrb[30].mxu0 }
 0xbb2   : > { %v3446_v29 = vpack.c.bf16 %v3053_v23, %v3053_v23  ;;  %v3056_v33 = vadd.f32 %v3055_v27, %v2931_v39  ;;  %v3006_v34 = vadd.f32 %v3005_v28, %v2931_v39  ;;  %v3057_v13 = vpop.f32.mrb[31].mxu1  ;;  %v3007_v32 = vpop.f32.mrb[31].mxu0 }
 0xbb3   : > { %v3445_v17 = vpack.c.bf16 %v3004_v26, %v3002_v45  ;;  %v3008_v21 = vadd.f32 %v3007_v32, %v2931_v39 }
 0xbb4   : > { %3104 = vst.msk [vmem:[%s4423_s22 + $0x20] sm:$0xf] %vm485_vm15, %v3446_v29  ;;  %v3448_v30 = vpack.c.bf16 %v3056_v33, %v3056_v33 }
 0xbb5   : > { %3103 = vst [vmem:[%s4423_s22 + $0x18] sm:$0xff] %v3445_v17  ;;  %v3447_v31 = vpack.c.bf16 %v3008_v21, %v3006_v34 }
 0xbb6   : > { %3106 = vst.msk [vmem:[%s4423_s22 + $0x2c] sm:$0xf] %vm485_vm15, %v3448_v30 }
 0xbb7   : > { %3105 = vst [vmem:[%s4423_s22 + $0x24] sm:$0xff] %v3447_v31 }
 0xbb8 PF: > { %s20_s13 = sadd.s32 1, %s3568_s13  }
 0xbb9   : > { %p17_p4 = scmp.ge.s32.totalorder %s20_s13, 4  }
 0xbbb   :  { %19 = sbr.rel (!%p17_p4) target bundleno = 1 (0x1), region = 96 }

// kernel: edsr_forward.3
= control target key start
LH: loop header
LB: loop body
LE: loop exit
PB: predicated region body
PF: predicated region fallthrough
CT: control target
= control target key end

     0   :  { %s1723_s15 = smov 0   ;;  %s2235_s0 = inlined_call_operand.vmem [shape: bf16[2,8,1088], index: 0, kind: input, shape index: {}]   ;;  %s2236_s1 = inlined_call_operand.vmem [shape: f32[3,1], index: 1, kind: input, shape index: {}]   ;;  %s2237_s2 = inlined_call_operand.vmem [shape: bf16[3,144], index: 2, kind: input, shape index: {}]   ;;  %s2238_s3 = inlined_call_operand.vmem [shape: f32[3,1], index: 3, kind: input, shape index: {}]   ;;  %s2239_s4 = inlined_call_operand.vmem [shape: f32[2,3,1088], index: 4, kind: output, shape index: {}]  }
   0x1 LB: > { %s1530_s16 = sadd.s32 4294967295, %s1687_s15   ;;  %p1534_p0 = scmp.ge.s32.totalorder %s1687_s15, 1  ;;  %s1687_s15 = sphi %s1723_s15, %s14_s15  }
   0x2   : > { %p162_p1 = scmp.lt.s32.totalorder %s1687_s15, 3 }
   0x4   : > { %p163_p2 = pnand %p1534_p0, %p162_p1 }
   0x5   : > { %v285_v0 = vlaneseq (!%p163_p2)  ;;  %v1689_v1 = vmov (!%p163_p2), 0   ;;  %p1809_p3 = scmp.lt.s32.totalorder (!%p163_p2), %s1530_s16, 1  ;;  %vm200_vm0 = vcmask (!%p163_p2), 1043968   ;;  %vm201_vm1 = vcmask (!%p163_p2), 523268   ;;  %s1690_s22 = smov (!%p163_p2), 35  }
   0x6   : > { %166 = sbr.rel (%p163_p2) target bundleno = 563 (0x233), region = 36  ;;  %199 = vst [vmem:[#allocation2] sm:$0xf] (!%p163_p2), %v1689_v1  ;;  %204 = vst [vmem:[#allocation3] sm:$0xf0] (!%p163_p2), %v1689_v1  ;;  %1666 = vset.pattern.permute.xlu0 (!%p163_p2), %v1689_v1  ;;  %1667 = vset.pattern.permute.xlu1 (!%p163_p2), %v1689_v1  ;;  %s1691_s23 = smov (!%p163_p2), 34  }
   0x7   : > { %205 = vst [vmem:[#allocation3 + $0x8] sm:$0xf0] (!%p163_p2), %v1689_v1  ;;  %206 = vst [vmem:[#allocation3 + $0x10] sm:$0xf0] (!%p163_p2), %v1689_v1  ;;  %v286_v2 = vand.u32 (!%p163_p2), 127, %v285_v0  ;;  %s1692_s24 = smov (!%p163_p2), 33  }
   0x8   : > { %207 = vst [vmem:[#allocation3 + $0x18] sm:$0xf0] (!%p163_p2), %v1689_v1  ;;  %208 = vst [vmem:[#allocation3 + $0x20] sm:$0xf0] (!%p163_p2), %v1689_v1  ;;  %s1693_s25 = smov (!%p163_p2), 1   ;;  %s1694_s26 = smov (!%p163_p2), 127  }
   0x9   : > { %209 = vst [vmem:[#allocation3 + $0x28] sm:$0xf0] (!%p163_p2), %v1689_v1  ;;  %210 = vst [vmem:[#allocation3 + $0x30] sm:$0xf0] (!%p163_p2), %v1689_v1  ;;  %v287_v3 = vadd.s32 (!%p163_p2), 128, %v286_v2  ;;  %v288_v6 = vadd.s32 (!%p163_p2), 256, %v286_v2 }
   0xa   : > { %211 = vst [vmem:[#allocation3 + $0x38] sm:$0xf0] (!%p163_p2), %v1689_v1  ;;  %213 = vst [vmem:[#allocation3 + $0x48] sm:$0xf0] (!%p163_p2), %v1689_v1  ;;  %v1813_v4 = vmul.u32.u64.low (!%p163_p2), 4042322161, %v286_v2  ;;  %v1814_v5 = vmul.u32.u64.high 4042322161, %v286_v2, %v1813_v4 }
   0xb   : > { %214 = vst [vmem:[#allocation3 + $0x50] sm:$0xf0] (!%p163_p2), %v1689_v1  ;;  %215 = vst [vmem:[#allocation3 + $0x58] sm:$0xf0] (!%p163_p2), %v1689_v1  ;;  %v289_v7 = vadd.s32 (!%p163_p2), 384, %v286_v2  ;;  %v290_v8 = vadd.s32 (!%p163_p2), 512, %v286_v2 }
   0xc   : > { %216 = vst [vmem:[#allocation3 + $0x60] sm:$0xf0] (!%p163_p2), %v1689_v1  ;;  %217 = vst [vmem:[#allocation3 + $0x68] sm:$0xf0] (!%p163_p2), %v1689_v1  ;;  %v291_v9 = vadd.s32 (!%p163_p2), 640, %v286_v2  ;;  %v1825_v10 = vadd.s32 (!%p163_p2), 768, %v286_v2 }
   0xd   : > { %218 = vst [vmem:[#allocation3 + $0x70] sm:$0xf0] %v1689_v1  ;;  %219 = vst [vmem:[#allocation3 + $0x78] sm:$0xf0] %v1689_v1  ;;  %v1828_v11 = vmul.u32.u64.low 4042322161, %v287_v3  ;;  %v1829_v12 = vmul.u32.u64.high 4042322161, %v287_v3, %v1828_v11 }
   0xe   : > { %220 = vst [vmem:[#allocation3 + $0x80] sm:$0xf0] %v1689_v1  ;;  %222 = vst [vmem:[#allocation3 + $0x90] sm:$0xf0] %v1689_v1  ;;  %v1831_v13 = vmul.u32.u64.low 4042322161, %v288_v6  ;;  %v1832_v14 = vmul.u32.u64.high 4042322161, %v288_v6, %v1831_v13 }
   0xf   : > { %223 = vst [vmem:[#allocation3 + $0x98] sm:$0xf0] %v1689_v1  ;;  %224 = vst [vmem:[#allocation3 + $0xa0] sm:$0xf0] %v1689_v1  ;;  %s2246_s16 = smov (!%p1809_p3, %s1530_s16), 1  ;;  %v301_v19 = vshrl.u32 %v1814_v5, 5 }
  0x10   : > { %225 = vst [vmem:[#allocation3 + $0xa8] sm:$0xf0] %v1689_v1  ;;  %226 = vst [vmem:[#allocation3 + $0xb0] sm:$0xf0] %v1689_v1  ;;  %v1840_v15 = vmul.u32.u64.low 4042322161, %v289_v7  ;;  %v1841_v16 = vmul.u32.u64.high 4042322161, %v289_v7, %v1840_v15 }
  0x11   : > { %227 = vst [vmem:[#allocation3 + $0xb8] sm:$0xf0] %v1689_v1  ;;  %228 = vst [vmem:[#allocation3 + $0xc0] sm:$0xf0] %v1689_v1  ;;  %v1843_v17 = vmul.u32.u64.low 4042322161, %v290_v8  ;;  %v1844_v18 = vmul.u32.u64.high 4042322161, %v290_v8, %v1843_v17 }
  0x12   : > { %229 = vst [vmem:[#allocation3 + $0xc8] sm:$0xf0] %v1689_v1  ;;  %231 = vst [vmem:[#allocation3 + $0xd8] sm:$0xf0] %v1689_v1  ;;  %v1847_v20 = vmul.u32.u64.low 4042322161, %v291_v9  ;;  %v1848_v21 = vmul.u32.u64.high 4042322161, %v291_v9, %v1847_v20 }
  0x13   : > { %232 = vst [vmem:[#allocation3 + $0xe0] sm:$0xf0] %v1689_v1  ;;  %233 = vst [vmem:[#allocation3 + $0xe8] sm:$0xf0] %v1689_v1  ;;  %v1850_v22 = vadd.s32 896, %v286_v2  ;;  %v302_v25 = vmul.u32 34, %v301_v19 }
  0x14   : > { %234 = vst [vmem:[#allocation3 + $0xf0] sm:$0xf0] %v1689_v1  ;;  %235 = vst [vmem:[#allocation3 + $0xf8] sm:$0xf0] %v1689_v1  ;;  %v1853_v23 = vmul.u32.u64.low 4042322161, %v1825_v10  ;;  %v1854_v24 = vmul.u32.u64.high 4042322161, %v1825_v10, %v1853_v23 }
  0x15   : > { %236 = vst [vmem:[#allocation3 + $0x100] sm:$0xf0] %v1689_v1  ;;  %237 = vst [vmem:[#allocation3 + $0x108] sm:$0xf0] %v1689_v1  ;;  %v312_v26 = vshrl.u32 %v1829_v12, 5  ;;  %v323_v27 = vshrl.u32 %v1832_v14, 5  ;;  %v303_v32 = vsub.s32 %v286_v2, %v302_v25 }
  0x16   : > { %238 = vst [vmem:[#allocation3 + $0x110] sm:$0xf0] %v1689_v1  ;;  %240 = vst [vmem:[#allocation3 + $0x120] sm:$0xf0] %v1689_v1  ;;  %s1630_s18 = smul.u32 36, %s2246_s16  ;;  %v334_v28 = vshrl.u32 %v1841_v16, 5 }
  0x17   : > { %241 = vst [vmem:[#allocation3 + $0x128] sm:$0xf0] %v1689_v1  ;;  %242 = vst [vmem:[#allocation3 + $0x130] sm:$0xf0] %v1689_v1  ;;  %v345_v29 = vshrl.u32 %v1844_v18, 5  ;;  %v313_v33 = vmul.u32 34, %v312_v26 }
  0x18   : > { %243 = vst [vmem:[#allocation3 + $0x138] sm:$0xf0] %v1689_v1  ;;  %244 = vst [vmem:[#allocation3 + $0x140] sm:$0xf0] %v1689_v1  ;;  %v1862_v30 = vmul.u32.u64.low 4042322161, %v1850_v22  ;;  %v1863_v31 = vmul.u32.u64.high 4042322161, %v1850_v22, %v1862_v30  ;;  %s1874_s21 = scalar_lea.vmem %s2235_s0, %s1630_s18  ;;  %s2225_s12 = scalar_lea.vmem %s2239_s4, %s1630_s18 }
  0x19   : > { %245 = vst [vmem:[#allocation3 + $0x148] sm:$0xf0] %v1689_v1  ;;  %246 = vst [vmem:[#allocation3 + $0x150] sm:$0xf0] %v1689_v1  ;;  %v324_v34 = vmul.u32 34, %v323_v27  ;;  %v356_v35 = vshrl.u32 %v1848_v21, 5  ;;  %v314_v40 = vsub.s32 %v287_v3, %v313_v33 }
  0x1a   : > { %247 = vst [vmem:[#allocation3 + $0x158] sm:$0xf0] %v1689_v1  ;;  %249 = vst [vmem:[#allocation3 + $0x168] sm:$0xf0] %v1689_v1  ;;  %v335_v36 = vmul.u32 34, %v334_v28  ;;  %v346_v37 = vmul.u32 34, %v345_v29 }
  0x1b   : > { %250 = vst [vmem:[#allocation3 + $0x170] sm:$0xf0] %v1689_v1  ;;  %251 = vst [vmem:[#allocation3 + $0x178] sm:$0xf0] %v1689_v1  ;;  %v367_v38 = vshrl.u32 %v1854_v24, 5  ;;  %v1867_v39 = vadd.s32 1024, %v286_v2  ;;  %v325_v42 = vsub.s32 %v288_v6, %v324_v34 }
  0x1c   : > { %252 = vst [vmem:[#allocation3 + $0x180] sm:$0xf0] %v1689_v1  ;;  %253 = vst [vmem:[#allocation3 + $0x188] sm:$0xf0] %v1689_v1  ;;  %vm394_vm3 = vcmp.ne.s32.totalorder %v303_v32, 0  ;;  %vm403_vm4 = vcmp.lt.s32.totalorder %v303_v32, 0  ;;  %v336_v43 = vsub.s32 %v289_v7, %v335_v36  ;;  %v347_v44 = vsub.s32 %v290_v8, %v346_v37 }
  0x1d   : > { %254 = vst [vmem:[#allocation3 + $0x190] sm:$0xf0] %v1689_v1  ;;  %255 = vst [vmem:[#allocation3 + $0x198] sm:$0xf0] %v1689_v1  ;;  %v421_v41 = vadd.s32 34, %v303_v32  ;;  %v357_v45 = vmul.u32 34, %v356_v35 }
  0x1e   : > { %256 = vst [vmem:[#allocation3 + $0x1a0] sm:$0xf0] %v1689_v1  ;;  %258 = vst [vmem:[#allocation3 + $0x1b0] sm:$0xf0] %v1689_v1  ;;  %vm395_vm6 = vcmp.ne.s32.totalorder %v314_v40, 0  ;;  %vm404_vm7 = vcmp.lt.s32.totalorder %v314_v40, 0 }
  0x1f   : > { %259 = vst [vmem:[#allocation3 + $0x1b8] sm:$0xf0] %v1689_v1  ;;  %260 = vst [vmem:[#allocation3 + $0x1c0] sm:$0xf0] %v1689_v1  ;;  %v422_v46 = vadd.s32 34, %v314_v40  ;;  %vm396_vm10 = vcmp.ne.s32.totalorder %v325_v42, 0  ;;  %v358_v54 = vsub.s32 %v291_v9, %v357_v45 }
  0x20   : > { %261 = vst [vmem:[#allocation3 + $0x1c8] sm:$0xf0] %v1689_v1  ;;  %262 = vst [vmem:[#allocation3 + $0x1d0] sm:$0xf0] %v1689_v1  ;;  %vm397_vm11 = vcmp.ne.s32.totalorder %v336_v43, 0  ;;  %vm405_vm12 = vcmp.lt.s32.totalorder %v325_v42, 0 }
  0x21   : > { %263 = vst [vmem:[#allocation3 + $0x1d8] sm:$0xf0] %v1689_v1  ;;  %264 = vst [vmem:[#allocation3 + $0x1e0] sm:$0xf0] %v1689_v1  ;;  %v448_v50 = vld [vmem:[%s1874_s21] sm:$0xff]  ;;  %vm406_vm13 = vcmp.lt.s32.totalorder %v336_v43, 0 }
  0x22   : > { %265 = vst [vmem:[#allocation3 + $0x1e8] sm:$0xf0] %v1689_v1  ;;  %267 = vst [vmem:[#allocation3 + $0x1f8] sm:$0xf0] %v1689_v1  ;;  %v423_v52 = vadd.s32 34, %v325_v42  ;;  %v424_v53 = vadd.s32 34, %v336_v43 }
  0x23   : > { %268 = vst [vmem:[#allocation3 + $0x200] sm:$0xf0] %v1689_v1  ;;  %269 = vst [vmem:[#allocation3 + $0x208] sm:$0xf0] %v1689_v1  ;;  %v449_v57 = vld [vmem:[%s1874_s21 + $0x8] sm:$0xff]  ;;  %v425_v58 = vadd.s32 34, %v347_v44 }
  0x24   : > { %270 = vst [vmem:[#allocation3 + $0x210] sm:$0xf0] %v1689_v1  ;;  %271 = vst [vmem:[#allocation3 + $0x218] sm:$0xf0] %v1689_v1  ;;  %v368_v59 = vmul.u32 34, %v367_v38  ;;  %v426_v63 = vadd.s32 34, %v358_v54 }
  0x25   : > { %272 = vst [vmem:[#allocation3 + $0x220] sm:$0xf0] %v1689_v1  ;;  %273 = vst [vmem:[#allocation3 + $0x228] sm:$0xf0] %v1689_v1  ;;  %v378_v4 = vshrl.u32 %v1863_v31, 5  ;;  %v450_v7 = vld [vmem:[%s1874_s21 + $0x10] sm:$0xff] }
  0x26   : > { %274 = vst [vmem:[#allocation3 + $0x230] sm:$0xf0] %v1689_v1  ;;  %276 = vst [vmem:[#allocation3 + $0x240] sm:$0xf0] %v1689_v1  ;;  %v369_v3 = vsub.s32 %v1825_v10, %v368_v59  ;;  %v1904_v11 = vmul.u32.u64.low 4042322161, %v1867_v39  ;;  %v1905_v12 = vmul.u32.u64.high 4042322161, %v1867_v39, %v1904_v11 }
  0x27   : > { %277 = vst [vmem:[#allocation3 + $0x248] sm:$0xf0] %v1689_v1  ;;  %278 = vst [vmem:[#allocation3 + $0x250] sm:$0xf0] %v1689_v1  ;;  %v379_v9 = vmul.u32 34, %v378_v4  ;;  %v451_v25 = vld [vmem:[%s1874_s21 + $0x18] sm:$0xff] }
  0x28   : > { %279 = vst [vmem:[#allocation3 + $0x258] sm:$0xf0] %v1689_v1  ;;  %280 = vst [vmem:[#allocation3 + $0x260] sm:$0xf0] %v1689_v1  ;;  %v427_v10 = vadd.s32 34, %v369_v3  ;;  %v389_v23 = vshrl.u32 %v1905_v12, 5 }
  0x29   : > { %281 = vst [vmem:[#allocation3 + $0x268] sm:$0xf0] %v1689_v1  ;;  %282 = vst [vmem:[#allocation3 + $0x270] sm:$0xf0] %v1689_v1  ;;  %v380_v14 = vsub.s32 %v1850_v22, %v379_v9  ;;  %v452_v33 = vld [vmem:[%s1874_s21 + $0x20] sm:$0xf] }
  0x2a   : > { %283 = vst [vmem:[#allocation3 + $0x278] sm:$0xf0] %v1689_v1  ;;  %vm202_vm2 = vmor %vm201_vm1, %vm200_vm0  ;;  %v390_v27 = vmul.u32 34, %v389_v23  ;;  %s1695_s27 = smov 95   ;;  %s1696_s28 = smov 94  }
  0x2b   : > { %212 = vst.msk [vmem:[#allocation3 + $0x40] sm:$0xf0] %vm201_vm1, %v1689_v1  ;;  %221 = vst.msk [vmem:[#allocation3 + $0x88] sm:$0xf0] %vm201_vm1, %v1689_v1  ;;  %v428_v19 = vadd.s32 34, %v380_v14  ;;  %s1697_s29 = smov 93  }
  0x2c   : > { %230 = vst.msk [vmem:[#allocation3 + $0xd0] sm:$0xf0] %vm201_vm1, %v1689_v1  ;;  %239 = vst.msk [vmem:[#allocation3 + $0x118] sm:$0xf0] %vm201_vm1, %v1689_v1  ;;  %v391_v29 = vsub.s32 %v1867_v39, %v390_v27 }
  0x2d   : > { %248 = vst.msk [vmem:[#allocation3 + $0x160] sm:$0xf0] %vm201_vm1, %v1689_v1  ;;  %257 = vst.msk [vmem:[#allocation3 + $0x1a8] sm:$0xf0] %vm201_vm1, %v1689_v1 }
  0x2e   : > { %266 = vst.msk [vmem:[#allocation3 + $0x1f0] sm:$0xf0] %vm201_vm1, %v1689_v1  ;;  %275 = vst.msk [vmem:[#allocation3 + $0x238] sm:$0xf0] %vm201_vm1, %v1689_v1  ;;  %v429_v31 = vadd.s32 34, %v391_v29 }
  0x2f   : > { %284 = vst.msk [vmem:[#allocation3 + $0x280] sm:$0xf0] %vm201_vm1, %v1689_v1  ;;  %vm412_vm5 = vmand %vm403_vm4, %vm394_vm3  ;;  %vm398_vm1 = vcmp.ne.s32.totalorder %v347_v44, 0 }
  0x30   : > { %203 = vst.msk [vmem:[#allocation2 + $0x24] sm:$0xff] %vm202_vm2, %v1689_v1  ;;  %v430_v47 = vsel %vm412_vm5, %v421_v41, %v303_v32  ;;  %vm413_vm8 = vmand %vm404_vm7, %vm395_vm6  ;;  %vm407_vm2 = vcmp.lt.s32.totalorder %v347_v44, 0  ;;  %vm399_vm6 = vcmp.ne.s32.totalorder %v358_v54, 0 }
  0x31   : > { %vm1876_vm9 = vcmp.lt.s32.totalorder %v430_v47, 32  ;;  %v431_v49 = vsel %vm413_vm8, %v422_v46, %v314_v40  ;;  %vm1881_vm14 = vmand %vm405_vm12, %vm396_vm10  ;;  %v1968_v40 = vld.sshfl [vmem:[%s2237_s2] sm:$0x33 pattern:$0x76325410] }
  0x32   : > { %vm440_vm15 = vcmp.lt.s32.totalorder %v431_v49, 32  ;;  %vm415_vm0 = vmand %vm406_vm13, %vm397_vm11  ;;  %v432_v55 = vsel %vm1881_vm14, %v423_v52, %v325_v42  ;;  %vm400_vm13 = vcmp.ne.s32.totalorder %v369_v3, 0  ;;  %vm409_vm14 = vcmp.lt.s32.totalorder %v369_v3, 0 }
  0x33   : > { %vm473_vm3 = vmpackc.low %vm440_vm15, %vm1876_vm9  ;;  %v433_v56 = vsel %vm415_vm0, %v424_v53, %v336_v43  ;;  %vm441_vm4 = vcmp.lt.s32.totalorder %v432_v55, 32  ;;  %vm408_vm9 = vcmp.lt.s32.totalorder %v358_v54, 0  ;;  %v1972_v41 = vcombine.high %v1968_v40, %v1968_v40 }
  0x34   : > { %v478_v60 = vsel %vm473_vm3, %v448_v50, 0  ;;  %vm442_vm5 = vcmp.lt.s32.totalorder %v433_v56, 32  ;;  %vm416_vm7 = vmand %vm407_vm2, %vm398_vm1  ;;  %vm401_vm1 = vcmp.ne.s32.totalorder %v380_v14, 0  ;;  %vm410_vm2 = vcmp.lt.s32.totalorder %v380_v14, 0 }
  0x35   : > { %483 = vst [vmem:[#allocation2 + $0x4] sm:$0xff] %v478_v60  ;;  %vm474_vm8 = vmpackc.low %vm442_vm5, %vm441_vm4  ;;  %v1890_v61 = vcombine.high %v478_v60, %v478_v60  ;;  %v1892_v62 = vcombine.low %v478_v60, %v478_v60  ;;  %v434_v2 = vsel %vm416_vm7, %v425_v58, %v347_v44  ;;  %vm402_vm7 = vcmp.ne.s32.totalorder %v391_v29, 0 }
  0x36   : > { %v479_v0 = vsel %vm474_vm8, %v449_v57, 0  ;;  %vm417_vm10 = vmand %vm408_vm9, %vm399_vm6  ;;  %vm443_vm11 = vcmp.lt.s32.totalorder %v434_v2, 32  ;;  %vm411_vm8 = vcmp.lt.s32.totalorder %v391_v29, 0 }
  0x37   : > { %484 = vst [vmem:[#allocation2 + $0xc] sm:$0xff] %v479_v0  ;;  %v1896_v5 = vcombine.low %v479_v0, %v479_v0  ;;  %v435_v6 = vsel %vm417_vm10, %v426_v63, %v358_v54  ;;  %v1899_v8 = vcombine.high %v479_v0, %v479_v0  ;;  %834 = vst [vmem:[#allocation3 + $0x128] sm:$0xf] %v1890_v61 }
  0x38   : > { %833 = vst [vmem:[#allocation3 + $0x120] sm:$0xf] %v1892_v62  ;;  %vm444_vm12 = vcmp.lt.s32.totalorder %v435_v6, 32  ;;  %vm418_vm0 = vmand %vm409_vm14, %vm400_vm13  ;;  %vm1230_vm13 = vcmask 130048   ;;  %vm539_vm14 = vcmask 285696  }
  0x39   : > { %vm475_vm15 = vmpackc.low %vm444_vm12, %vm443_vm11  ;;  %836 = vst [vmem:[#allocation3 + $0x138] sm:$0xf] %v1899_v8  ;;  %v436_v15 = vsel %vm418_vm0, %v427_v10, %v369_v3  ;;  %vm487_vm11 = vcmask 519168   ;;  %1623 = vmatprep.mubr.msk.bf16.mxu0 %vm1230_vm13, %v1972_v41  ;;  %1624 = vmatprep.mubr.msk.bf16.mxu1 %vm1230_vm13, %v1972_v41  ;;  %vm695_vm0 = vcmask 269312  }
  0x3a   : > { %835 = vst [vmem:[#allocation3 + $0x130] sm:$0xf] %v1896_v5  ;;  %v480_v13 = vsel %vm475_vm15, %v450_v7, 0  ;;  %vm419_vm3 = vmand %vm410_vm2, %vm401_vm1  ;;  %vm445_vm4 = vcmp.lt.s32.totalorder %v436_v15, 32  ;;  %vm617_vm15 = vcmask 277504   ;;  %vm773_vm1 = vcmask 7168  }
  0x3b   : > { %485 = vst [vmem:[#allocation2 + $0x14] sm:$0xff] %v480_v13  ;;  %v1910_v16 = vcombine.low %v480_v13, %v480_v13  ;;  %v1912_v17 = vcombine.high %v480_v13, %v480_v13  ;;  %v437_v24 = vsel %vm419_vm3, %v428_v19, %v380_v14  ;;  %vm420_vm9 = vmand %vm411_vm8, %vm402_vm7  ;;  %vm888_vm2 = vcmask 1039360  }
  0x3c   : > { %v489_v18 = vld [vmem:[#allocation2] sm:$0xff]  ;;  %vm446_vm5 = vcmp.lt.s32.totalorder %v437_v24, 32  ;;  %v438_v32 = vsel %vm420_vm9, %v429_v31, %v391_v29  ;;  %vm961_vm3 = vcmask 777216  }
  0x3d   : > { %v1538_v20 = vcombine.high %v489_v18, %v489_v18  ;;  %v1537_v21 = vcombine.low %v489_v18, %v489_v18  ;;  %838 = vst [vmem:[#allocation3 + $0x148] sm:$0xf] %v1912_v17  ;;  %837 = vst [vmem:[#allocation3 + $0x140] sm:$0xf] %v1910_v16  ;;  %vm447_vm10 = vcmp.lt.s32.totalorder %v438_v32, 32 }
  0x3e   : > { %v490_v22 = vld [vmem:[#allocation2 + $0x8] sm:$0xff]  ;;  %vm476_vm6 = vmpackc.low %vm446_vm5, %vm445_vm4  ;;  %vm1034_vm4 = vcmask 769024   ;;  %vm1107_vm5 = vcmask 760832  }
  0x3f   : > { %521 = vrot.lane.b32.xlu0 %v1538_v20, %s1690_s22  ;;  %519 = vrot.lane.b32.xlu1 %v1537_v21, %s1690_s22  ;;  %v1539_v26 = vcombine.low %v490_v22, %v490_v22  ;;  %v481_v28 = vsel %vm476_vm6, %v451_v25, 0  ;;  %vm477_vm12 = vmpackc.low %vm447_vm10, %vm447_vm10  ;;  %v1540_v36 = vcombine.high %v490_v22, %v490_v22  ;;  %v1171_v22 = vld [vmem:[#allocation3 + $0x128] sm:$0xff]  ;;  %v1170_v27 = vld [vmem:[#allocation3 + $0x120] sm:$0xff]  ;;  %vm1473_vm6 = vcmask 518144  }
  0x40   : > { %486 = vst [vmem:[#allocation2 + $0x1c] sm:$0xff] %v481_v28  ;;  %v1921_v30 = vcombine.low %v481_v28, %v481_v28  ;;  %v1927_v34 = vcombine.high %v481_v28, %v481_v28  ;;  %v1932_v35 = vsel %vm477_vm12, %v452_v33, 0 }
  0x41   : > { %488 = vst.msk [vmem:[#allocation2 + $0x24] sm:$0xf] %vm487_vm11, %v1932_v35  ;;  %v1585_v58 = vcombine.low %v1932_v35, %v1932_v35 }
  0x42   : > { %839 = vst [vmem:[#allocation3 + $0x150] sm:$0xf] %v1921_v30  ;;  %840 = vst [vmem:[#allocation3 + $0x158] sm:$0xf] %v1927_v34  ;;  %v491_v37 = vld [vmem:[#allocation2 + $0x10] sm:$0xff] }
  0x43   : > { %523 = vrot.lane.b32.xlu0 %v1539_v26, %s1690_s22  ;;  %599 = vrot.lane.b32.xlu1 %v1538_v20, %s1691_s23  ;;  %v1541_v38 = vcombine.low %v491_v37, %v491_v37  ;;  %v1542_v42 = vcombine.high %v491_v37, %v491_v37  ;;  %841 = vst.msk [vmem:[#allocation3 + $0x160] sm:$0xf] %vm487_vm11, %v1585_v58 }
  0x47   : > { %601 = vrot.lane.b32.xlu0 %v1539_v26, %s1691_s23  ;;  %597 = vrot.lane.b32.xlu1 %v1537_v21, %s1691_s23  ;;  %v492_v39 = vld [vmem:[#allocation2 + $0x18] sm:$0xff] }
  0x48   : > { %v1543_v43 = vcombine.low %v492_v39, %v492_v39  ;;  %v493_v44 = vld [vmem:[#allocation2 + $0x20] sm:$0xff]  ;;  %v1544_v45 = vcombine.high %v492_v39, %v492_v39 }
  0x49   : > { %v1545_v46 = vcombine.low %v493_v44, %v493_v44  ;;  %v1546_v47 = vcombine.high %v493_v44, %v493_v44  ;;  %v1677_v6 = vld [vmem:[#allocation2 + $0x24] ss:$0 sps:$4 sm:$0xff]  }
  0x4a   : > { %v1678_v12 = vld [vmem:[#allocation2 + $0x24] ss:$0 sps:$4 sm:$0xff]  }
  0x4b   : > { %677 = vrot.lane.b32.xlu0 %v1538_v20, %s1692_s24  ;;  %679 = vrot.lane.b32.xlu1 %v1539_v26, %s1692_s24  ;;  %v1680_v24 = vld [vmem:[#allocation2 + $0x24] ss:$0 sps:$4 sm:$0xff]  }
  0x4f   : > { %675 = vrot.lane.b32.xlu0 %v1537_v21, %s1692_s24  ;;  %755 = vrot.lane.b32.xlu1 %v1538_v20, %s1693_s25 }
  0x53   : > { %757 = vrot.lane.b32.xlu0 %v1539_v26, %s1693_s25  ;;  %753 = vrot.lane.b32.xlu1 %v1537_v21, %s1693_s25 }
  0x57   : > { %872 = vrot.lane.b32.xlu0 %v1890_v61, %s1694_s26  ;;  %874 = vrot.lane.b32.xlu1 %v1896_v5, %s1694_s26 }
  0x5b   : > { %870 = vrot.lane.b32.xlu0 %v1892_v62, %s1694_s26  ;;  %945 = vrot.lane.b32.xlu1 %v1890_v61, %s1695_s27 }
  0x5f   : > { %947 = vrot.lane.b32.xlu0 %v1896_v5, %s1695_s27  ;;  %943 = vrot.lane.b32.xlu1 %v1892_v62, %s1695_s27 }
  0x63   : > { %1018 = vrot.lane.b32.xlu0 %v1890_v61, %s1696_s28  ;;  %1020 = vrot.lane.b32.xlu1 %v1896_v5, %s1696_s28 }
  0x67   : > { %1016 = vrot.lane.b32.xlu0 %v1892_v62, %s1696_s28  ;;  %1091 = vrot.lane.b32.xlu1 %v1890_v61, %s1697_s29 }
  0x6b   : > { %1093 = vrot.lane.b32.xlu0 %v1896_v5, %s1697_s29  ;;  %525 = vrot.lane.b32.xlu1 %v1540_v36, %s1690_s22 }
  0x6f   : > { %527 = vrot.lane.b32.xlu0 %v1541_v38, %s1690_s22  ;;  %1089 = vrot.lane.b32.xlu1 %v1892_v62, %s1697_s29 }
  0x73   : > { %529 = vrot.lane.b32.xlu0 %v1542_v42, %s1690_s22  ;;  %531 = vrot.lane.b32.xlu1 %v1543_v43, %s1690_s22 }
  0x77   : > { %603 = vrot.lane.b32.xlu0 %v1540_v36, %s1691_s23  ;;  %605 = vrot.lane.b32.xlu1 %v1541_v38, %s1691_s23 }
  0x7b   : > { %607 = vrot.lane.b32.xlu0 %v1542_v42, %s1691_s23  ;;  %609 = vrot.lane.b32.xlu1 %v1543_v43, %s1691_s23 }
  0x7f   : > { %681 = vrot.lane.b32.xlu0 %v1540_v36, %s1692_s24  ;;  %683 = vrot.lane.b32.xlu1 %v1541_v38, %s1692_s24 }
  0x83   : > { %685 = vrot.lane.b32.xlu0 %v1542_v42, %s1692_s24  ;;  %687 = vrot.lane.b32.xlu1 %v1543_v43, %s1692_s24 }
  0x87   : > { %759 = vrot.lane.b32.xlu0 %v1540_v36, %s1693_s25  ;;  %761 = vrot.lane.b32.xlu1 %v1541_v38, %s1693_s25  ;;  %v454_v36 = vld [vmem:[%s2238_s3] sm:$0x7] }
  0x8b   : > { %763 = vrot.lane.b32.xlu0 %v1542_v42, %s1693_s25  ;;  %765 = vrot.lane.b32.xlu1 %v1543_v43, %s1693_s25 }
  0x8f   : > { %876 = vrot.lane.b32.xlu0 %v1899_v8, %s1694_s26  ;;  %878 = vrot.lane.b32.xlu1 %v1910_v16, %s1694_s26 }
  0x93   : > { %880 = vrot.lane.b32.xlu0 %v1912_v17, %s1694_s26  ;;  %882 = vrot.lane.b32.xlu1 %v1921_v30, %s1694_s26 }
  0x97   : > { %949 = vrot.lane.b32.xlu0 %v1899_v8, %s1695_s27  ;;  %951 = vrot.lane.b32.xlu1 %v1910_v16, %s1695_s27 }
  0x9b   : > { %953 = vrot.lane.b32.xlu0 %v1912_v17, %s1695_s27  ;;  %955 = vrot.lane.b32.xlu1 %v1921_v30, %s1695_s27 }
  0x9f   : > { %1022 = vrot.lane.b32.xlu0 %v1899_v8, %s1696_s28  ;;  %1024 = vrot.lane.b32.xlu1 %v1910_v16, %s1696_s28 }
  0xa3   : > { %1026 = vrot.lane.b32.xlu0 %v1912_v17, %s1696_s28  ;;  %1028 = vrot.lane.b32.xlu1 %v1921_v30, %s1696_s28 }
  0xa7   : > { %1095 = vrot.lane.b32.xlu0 %v1899_v8, %s1697_s29  ;;  %1097 = vrot.lane.b32.xlu1 %v1910_v16, %s1697_s29 }
  0xab   : > { %1099 = vrot.lane.b32.xlu0 %v1912_v17, %s1697_s29  ;;  %1101 = vrot.lane.b32.xlu1 %v1921_v30, %s1697_s29  ;;  %v1679_v17 = vld [vmem:[#allocation2 + $0x24] ss:$0 sps:$4 sm:$0xff]  }
  0xaf   : > { %533 = vrot.lane.b32.xlu0 %v1544_v45, %s1690_s22  ;;  %535 = vrot.lane.b32.xlu1 %v1545_v46, %s1690_s22 }
  0xb1   : > { %v522_v48 = vpop.permute.xlu0 %521  ;;  %v520_v49 = vpop.permute.xlu1 %519 }
  0xb2   : > { %v540_v50 = vsel %vm539_vm14, %v520_v49, %v522_v48 }
  0xb3   : > { %558 = vst [vmem:[#allocation3] sm:$0xf] %v540_v50  ;;  %537 = vrot.lane.b32.xlu0 %v1546_v47, %s1690_s22  ;;  %611 = vrot.lane.b32.xlu1 %v1544_v45, %s1691_s23 }
  0xb5   : > { %v2032_v51 = vpop.permute.xlu0 %523  ;;  %v600_v52 = vpop.permute.xlu1 %599 }
  0xb6   : > { %v541_v53 = vsel %vm539_vm14, %v522_v48, %v2032_v51 }
  0xb7   : > { %559 = vst [vmem:[#allocation3 + $0x8] sm:$0xf] %v541_v53  ;;  %613 = vrot.lane.b32.xlu0 %v1545_v46, %s1691_s23  ;;  %615 = vrot.lane.b32.xlu1 %v1546_v47, %s1691_s23 }
  0xb9   : > { %v2038_v54 = vpop.permute.xlu0 %601  ;;  %v598_v55 = vpop.permute.xlu1 %597 }
  0xba   : > { %v619_v56 = vsel %vm617_vm15, %v600_v52, %v2038_v54  ;;  %v618_v57 = vsel %vm617_vm15, %v598_v55, %v600_v52  ;;  %v1134_v63 = vld [vmem:[#allocation3] sm:$0xff] }
  0xbb   : > { %637 = vst [vmem:[#allocation3 + $0x50] sm:$0xf] %v619_v56  ;;  %636 = vst [vmem:[#allocation3 + $0x48] sm:$0xf] %v618_v57  ;;  %689 = vrot.lane.b32.xlu0 %v1544_v45, %s1692_s24  ;;  %691 = vrot.lane.b32.xlu1 %v1545_v46, %s1692_s24 }
  0xbd   : > { %v678_v59 = vpop.permute.xlu0 %677  ;;  %v2048_v60 = vpop.permute.xlu1 %679 }
  0xbe   : > { %v697_v61 = vsel %vm695_vm0, %v678_v59, %v2048_v60  ;;  %v1135_v62 = vld [vmem:[#allocation3 + $0x8] sm:$0xff] }
  0xbf   : > { %715 = vst [vmem:[#allocation3 + $0x98] sm:$0xf] %v697_v61  ;;  %693 = vrot.lane.b32.xlu0 %v1546_v47, %s1692_s24  ;;  %1234 = vmatprep.subr.bf16.mxu0 %v1135_v62 }
  0xc0   : > { %767 = vrot.lane.b32.xlu1 %v1544_v45, %s1693_s25  ;;  %1235 = vmatpush1.bf16.msra.mxu0 %v1134_v63 }
  0xc1   : > { %v676_v0 = vpop.permute.xlu0 %675  ;;  %v756_v2 = vpop.permute.xlu1 %755 }
  0xc2   : > { %v696_v3 = vsel %vm695_vm0, %v676_v0, %v678_v59  ;;  %v1144_v4 = vld [vmem:[#allocation3 + $0x50] sm:$0xff]  ;;  %v1143_v5 = vld [vmem:[#allocation3 + $0x48] sm:$0xff] }
  0xc3   : > { %714 = vst [vmem:[#allocation3 + $0x90] sm:$0xf] %v696_v3  ;;  %769 = vrot.lane.b32.xlu0 %v1545_v46, %s1693_s25  ;;  %1236 = vmatprep.subr.bf16.mxu0 %v1144_v4 }
  0xc4   : > { %771 = vrot.lane.b32.xlu1 %v1546_v47, %s1693_s25  ;;  %1237 = vmatpush1.bf16.msra.mxu0 %v1143_v5 }
  0xc5   : > { %v2057_v7 = vpop.permute.xlu0 %757  ;;  %v754_v8 = vpop.permute.xlu1 %753 }
  0xc6   : > { %v775_v9 = vsel %vm773_vm1, %v756_v2, %v2057_v7  ;;  %v774_v10 = vsel %vm773_vm1, %v754_v8, %v756_v2  ;;  %v1153_v11 = vld [vmem:[#allocation3 + $0x98] sm:$0xff] }
  0xc7   : > { %793 = vst [vmem:[#allocation3 + $0xe0] sm:$0xf] %v775_v9  ;;  %792 = vst [vmem:[#allocation3 + $0xd8] sm:$0xf] %v774_v10  ;;  %884 = vrot.lane.b32.xlu0 %v1927_v34, %s1694_s26  ;;  %1238 = vmatprep.subr.bf16.mxu0 %v1153_v11 }
  0xc8   : > { %886 = vrot.lane.b32.xlu1 %v1677_v6, %s1694_s26 }
  0xc9   : > { %v873_v13 = vpop.permute.xlu0 %872  ;;  %v2065_v14 = vpop.permute.xlu1 %874 }
  0xca   : > { %v890_v15 = vsel %vm888_vm2, %v873_v13, %v2065_v14  ;;  %v1152_v16 = vld [vmem:[#allocation3 + $0x90] sm:$0xff] }
  0xcb   : > { %907 = vst [vmem:[#allocation3 + $0x170] sm:$0xf] %v890_v15  ;;  %957 = vrot.lane.b32.xlu0 %v1927_v34, %s1695_s27  ;;  %1239 = vmatpush1.bf16.msra.mxu0 %v1152_v16 }
  0xcc   : > { %959 = vrot.lane.b32.xlu1 %v1678_v12, %s1695_s27 }
  0xcd   : > { %v871_v18 = vpop.permute.xlu0 %870  ;;  %v946_v19 = vpop.permute.xlu1 %945 }
  0xce   : > { %v889_v20 = vsel %vm888_vm2, %v871_v18, %v873_v13  ;;  %v1162_v21 = vld [vmem:[#allocation3 + $0xe0] sm:$0xff]  ;;  %v1161_v23 = vld [vmem:[#allocation3 + $0xd8] sm:$0xff] }
  0xcf   : > { %906 = vst [vmem:[#allocation3 + $0x168] sm:$0xf] %v889_v20  ;;  %1030 = vrot.lane.b32.xlu0 %v1927_v34, %s1696_s28  ;;  %1240 = vmatprep.subr.bf16.mxu0 %v1162_v21 }
  0xd0   : > { %1241 = vmatpush1.bf16.msra.mxu0 %v1161_v23  ;;  %1032 = vrot.lane.b32.xlu1 %v1679_v17, %s1696_s28 }
  0xd1   : > { %v2076_v25 = vpop.permute.xlu0 %947  ;;  %v944_v26 = vpop.permute.xlu1 %943  ;;  %1242 = vmatprep.subr.bf16.mxu0 %v1171_v22 }
  0xd2   : > { %v963_v28 = vsel %vm961_vm3, %v946_v19, %v2076_v25  ;;  %v962_v29 = vsel %vm961_vm3, %v944_v26, %v946_v19  ;;  %v1180_v30 = vld [vmem:[#allocation3 + $0x170] sm:$0xff] }
  0xd3   : > { %980 = vst [vmem:[#allocation3 + $0x1b8] sm:$0xf] %v963_v28  ;;  %979 = vst [vmem:[#allocation3 + $0x1b0] sm:$0xf] %v962_v29  ;;  %1103 = vrot.lane.b32.xlu0 %v1927_v34, %s1697_s29  ;;  %v1438_v34 = vld [vmem:[%s2236_s1] sm:$0x7] }
  0xd4   : > { %1243 = vmatpush1.bf16.msra.mxu0 %v1170_v27  ;;  %1105 = vrot.lane.b32.xlu1 %v1680_v24, %s1697_s29 }
  0xd5   : > { %v1019_v31 = vpop.permute.xlu0 %1018  ;;  %1244 = vmatprep.subr.bf16.mxu0 %v1180_v30  ;;  %v2084_v32 = vpop.permute.xlu1 %1020 }
  0xd6   : > { %v1036_v33 = vsel %vm1034_vm4, %v1019_v31, %v2084_v32  ;;  %v1179_v35 = vld [vmem:[#allocation3 + $0x168] sm:$0xff] }
  0xd7   : > { %1053 = vst [vmem:[#allocation3 + $0x200] sm:$0xf] %v1036_v33  ;;  %1217 = vperm.xlu0 %1666, %v454_v36  }
  0xd8   : > { %1245 = vmatpush1.bf16.msra.mxu0 %v1179_v35  ;;  %1441 = vperm.xlu1 %1667, %v1438_v34  }
  0xd9   : > { %v1017_v37 = vpop.permute.xlu0 %1016  ;;  %v1092_v38 = vpop.permute.xlu1 %1091 }
  0xda   : > { %v1035_v39 = vsel %vm1034_vm4, %v1017_v37, %v1019_v31  ;;  %v1189_v42 = vld [vmem:[#allocation3 + $0x1b8] sm:$0xff]  ;;  %v1188_v43 = vld [vmem:[#allocation3 + $0x1b0] sm:$0xff] }
  0xdb   : > { %1052 = vst [vmem:[#allocation3 + $0x1f8] sm:$0xf] %v1035_v39  ;;  %1246 = vmatprep.subr.bf16.mxu0 %v1189_v42 }
  0xdc   : > { %1247 = vmatpush1.bf16.msra.mxu0 %v1188_v43 }
  0xdd   : > { %v2095_v44 = vpop.permute.xlu0 %1093  ;;  %v526_v45 = vpop.permute.xlu1 %525 }
  0xde   : > { %v1109_v46 = vsel %vm1107_vm5, %v1092_v38, %v2095_v44  ;;  %v542_v47 = vsel %vm539_vm14, %v2032_v51, %v526_v45  ;;  %v1198_v48 = vld [vmem:[#allocation3 + $0x200] sm:$0xff] }
  0xdf   : > { %1126 = vst [vmem:[#allocation3 + $0x248] sm:$0xf] %v1109_v46  ;;  %560 = vst [vmem:[#allocation3 + $0x10] sm:$0xf] %v542_v47  ;;  %1248 = vmatprep.subr.bf16.mxu0 %v1198_v48  ;;  %v1172_v48 = vld [vmem:[#allocation3 + $0x130] sm:$0xff] }
  0xe1   : > { %v528_v49 = vpop.permute.xlu0 %527  ;;  %v1090_v50 = vpop.permute.xlu1 %1089 }
  0xe2   : > { %v543_v52 = vsel %vm539_vm14, %v526_v45, %v528_v49  ;;  %v1108_v53 = vsel %vm1107_vm5, %v1090_v50, %v1092_v38  ;;  %v1197_v55 = vld [vmem:[#allocation3 + $0x1f8] sm:$0xff] }
  0xe3   : > { %561 = vst [vmem:[#allocation3 + $0x18] sm:$0xf] %v543_v52  ;;  %1125 = vst [vmem:[#allocation3 + $0x240] sm:$0xf] %v1108_v53  ;;  %1249 = vmatpush1.bf16.msra.mxu0 %v1197_v55  ;;  %v1173_v45 = vld [vmem:[#allocation3 + $0x138] sm:$0xff]  ;;  %v1175_v53 = vld [vmem:[#allocation3 + $0x148] sm:$0xff] }
  0xe5   : > { %v530_v56 = vpop.permute.xlu0 %529  ;;  %v2103_v57 = vpop.permute.xlu1 %531 }
  0xe6   : > { %v544_v58 = vsel %vm539_vm14, %v528_v49, %v530_v56  ;;  %v545_v51 = vsel %vm539_vm14, %v530_v56, %v2103_v57  ;;  %v1207_v59 = vld [vmem:[#allocation3 + $0x248] sm:$0xff]  ;;  %v1136_v4 = vld [vmem:[#allocation3 + $0x10] sm:$0xff] }
  0xe7   : > { %562 = vst [vmem:[#allocation3 + $0x20] sm:$0xf] %v544_v58  ;;  %563 = vst [vmem:[#allocation3 + $0x28] sm:$0xf] %v545_v51  ;;  %1250 = vmatprep.subr.bf16.mxu0 %v1207_v59  ;;  %v1174_v58 = vld [vmem:[#allocation3 + $0x140] sm:$0xff] }
  0xe9   : > { %v604_v61 = vpop.permute.xlu0 %603  ;;  %v606_v62 = vpop.permute.xlu1 %605 }
  0xea   : > { %v620_v63 = vsel %vm617_vm15, %v2038_v54, %v604_v61  ;;  %v621_v0 = vsel %vm617_vm15, %v604_v61, %v606_v62  ;;  %v1206_v2 = vld [vmem:[#allocation3 + $0x240] sm:$0xff]  ;;  %v1137_v3 = vld [vmem:[#allocation3 + $0x18] sm:$0xff] }
  0xeb   : > { %638 = vst [vmem:[#allocation3 + $0x58] sm:$0xf] %v620_v63  ;;  %639 = vst [vmem:[#allocation3 + $0x60] sm:$0xf] %v621_v0  ;;  %1251 = vmatpush1.bf16.msra.mxu0 %v1206_v2  ;;  %1275 = vmatprep.subr.bf16.mxu1 %v1137_v3 }
  0xec   : > { %1276 = vmatpush1.bf16.msra.mxu1 %v1136_v4 }
  0xed   : > { %v608_v5 = vpop.permute.xlu0 %607  ;;  %v2111_v6 = vpop.permute.xlu1 %609 }
  0xee   : > { %v622_v8 = vsel %vm617_vm15, %v606_v62, %v608_v5  ;;  %v623_v9 = vsel %vm617_vm15, %v608_v5, %v2111_v6  ;;  %v1139_v10 = vld [vmem:[#allocation3 + $0x28] sm:$0xff]  ;;  %1267 = vmatmul.mubr.bf16.vlgmr.msra.gmra.mrb[0].mxu0 %v1968_v40  ;;  %v1138_v54 = vld [vmem:[#allocation3 + $0x20] sm:$0xff] }
  0xef   : > { %640 = vst [vmem:[#allocation3 + $0x68] sm:$0xf] %v622_v8  ;;  %641 = vst [vmem:[#allocation3 + $0x70] sm:$0xf] %v623_v9  ;;  %1316 = vmatprep.subr.bf16.mxu0 %v1139_v10  ;;  %1625 = vmatprep.mubr.msk.bf16.mxu0 %vm1230_vm13, %v1972_v41 }
  0xf0   : > { %1317 = vmatpush1.bf16.msra.mxu0 %v1138_v54 }
  0xf1   : > { %v682_v11 = vpop.permute.xlu0 %681  ;;  %v684_v12 = vpop.permute.xlu1 %683 }
  0xf2   : > { %v698_v13 = vsel %vm695_vm0, %v2048_v60, %v682_v11  ;;  %v699_v15 = vsel %vm695_vm0, %v682_v11, %v684_v12  ;;  %v1146_v16 = vld [vmem:[#allocation3 + $0x60] sm:$0xff]  ;;  %v1145_v17 = vld [vmem:[#allocation3 + $0x58] sm:$0xff] }
  0xf3   : > { %716 = vst [vmem:[#allocation3 + $0xa0] sm:$0xf] %v698_v13  ;;  %717 = vst [vmem:[#allocation3 + $0xa8] sm:$0xf] %v699_v15  ;;  %1277 = vmatprep.subr.bf16.mxu1 %v1146_v16 }
  0xf4   : > { %1278 = vmatpush1.bf16.msra.mxu1 %v1145_v17 }
  0xf5   : > { %v686_v18 = vpop.permute.xlu0 %685  ;;  %v2122_v19 = vpop.permute.xlu1 %687 }
  0xf6   : > { %v700_v20 = vsel %vm695_vm0, %v684_v12, %v686_v18  ;;  %v701_v21 = vsel %vm695_vm0, %v686_v18, %v2122_v19  ;;  %v1148_v23 = vld [vmem:[#allocation3 + $0x70] sm:$0xff]  ;;  %v1147_v22 = vld [vmem:[#allocation3 + $0x68] sm:$0xff] }
  0xf7   : > { %718 = vst [vmem:[#allocation3 + $0xb0] sm:$0xf] %v700_v20  ;;  %719 = vst [vmem:[#allocation3 + $0xb8] sm:$0xf] %v701_v21  ;;  %1318 = vmatprep.subr.bf16.mxu0 %v1148_v23 }
  0xf8   : > { %1319 = vmatpush1.bf16.msra.mxu0 %v1147_v22 }
  0xf9   : > { %v760_v60 = vpop.permute.xlu0 %759  ;;  %v762_v24 = vpop.permute.xlu1 %761 }
  0xfa   : > { %v776_v26 = vsel %vm773_vm1, %v2057_v7, %v760_v60  ;;  %v777_v27 = vsel %vm773_vm1, %v760_v60, %v762_v24  ;;  %v1155_v28 = vld [vmem:[#allocation3 + $0xa8] sm:$0xff]  ;;  %v1154_v29 = vld [vmem:[#allocation3 + $0xa0] sm:$0xff] }
  0xfb   : > { %794 = vst [vmem:[#allocation3 + $0xe8] sm:$0xf] %v776_v26  ;;  %795 = vst [vmem:[#allocation3 + $0xf0] sm:$0xf] %v777_v27  ;;  %1279 = vmatprep.subr.bf16.mxu1 %v1155_v28 }
  0xfc   : > { %1280 = vmatpush1.bf16.msra.mxu1 %v1154_v29 }
  0xfd   : > { %v764_v30 = vpop.permute.xlu0 %763  ;;  %v2130_v31 = vpop.permute.xlu1 %765 }
  0xfe   : > { %v778_v33 = vsel %vm773_vm1, %v762_v24, %v764_v30  ;;  %v779_v35 = vsel %vm773_vm1, %v764_v30, %v2130_v31  ;;  %v1157_v36 = vld [vmem:[#allocation3 + $0xb8] sm:$0xff]  ;;  %v1156_v34 = vld [vmem:[#allocation3 + $0xb0] sm:$0xff] }
  0xff   : > { %796 = vst [vmem:[#allocation3 + $0xf8] sm:$0xf] %v778_v33  ;;  %797 = vst [vmem:[#allocation3 + $0x100] sm:$0xf] %v779_v35  ;;  %1320 = vmatprep.subr.bf16.mxu0 %v1157_v36 }
 0x100   : > { %1321 = vmatpush1.bf16.msra.mxu0 %v1156_v34 }
 0x101   : > { %v877_v7 = vpop.permute.xlu0 %876  ;;  %v879_v37 = vpop.permute.xlu1 %878 }
 0x102   : > { %v891_v38 = vsel %vm888_vm2, %v2065_v14, %v877_v7  ;;  %v892_v39 = vsel %vm888_vm2, %v877_v7, %v879_v37  ;;  %v1164_v42 = vld [vmem:[#allocation3 + $0xf0] sm:$0xff]  ;;  %v1163_v43 = vld [vmem:[#allocation3 + $0xe8] sm:$0xff] }
 0x103   : > { %908 = vst [vmem:[#allocation3 + $0x178] sm:$0xf] %v891_v38  ;;  %909 = vst [vmem:[#allocation3 + $0x180] sm:$0xf] %v892_v39  ;;  %1281 = vmatprep.subr.bf16.mxu1 %v1164_v42 }
 0x104   : > { %1282 = vmatpush1.bf16.msra.mxu1 %v1163_v43 }
 0x105   : > { %v881_v46 = vpop.permute.xlu0 %880  ;;  %v2138_v47 = vpop.permute.xlu1 %882  ;;  %1283 = vmatprep.subr.bf16.mxu1 %v1173_v45 }
 0x106   : > { %v893_v49 = vsel %vm888_vm2, %v879_v37, %v881_v46  ;;  %v894_v50 = vsel %vm888_vm2, %v881_v46, %v2138_v47  ;;  %v1166_v14 = vld [vmem:[#allocation3 + $0x100] sm:$0xff]  ;;  %v1165_v52 = vld [vmem:[#allocation3 + $0xf8] sm:$0xff] }
 0x107   : > { %910 = vst [vmem:[#allocation3 + $0x188] sm:$0xf] %v893_v49  ;;  %911 = vst [vmem:[#allocation3 + $0x190] sm:$0xf] %v894_v50  ;;  %1322 = vmatprep.subr.bf16.mxu0 %v1166_v14 }
 0x108   : > { %1284 = vmatpush1.bf16.msra.mxu1 %v1172_v48  ;;  %1323 = vmatpush1.bf16.msra.mxu0 %v1165_v52 }
 0x109   : > { %v950_v55 = vpop.permute.xlu0 %949  ;;  %v952_v56 = vpop.permute.xlu1 %951  ;;  %1324 = vmatprep.subr.bf16.mxu0 %v1175_v53 }
 0x10a   : > { %v964_v51 = vsel %vm961_vm3, %v2076_v25, %v950_v55  ;;  %v965_v59 = vsel %vm961_vm3, %v950_v55, %v952_v56  ;;  %v1182_v61 = vld [vmem:[#allocation3 + $0x180] sm:$0xff]  ;;  %v1181_v62 = vld [vmem:[#allocation3 + $0x178] sm:$0xff] }
 0x10b   : > { %981 = vst [vmem:[#allocation3 + $0x1c0] sm:$0xf] %v964_v51  ;;  %982 = vst [vmem:[#allocation3 + $0x1c8] sm:$0xf] %v965_v59  ;;  %1285 = vmatprep.subr.bf16.mxu1 %v1182_v61 }
 0x10c   : > { %1286 = vmatpush1.bf16.msra.mxu1 %v1181_v62  ;;  %1325 = vmatpush1.bf16.msra.mxu0 %v1174_v58 }
 0x10d   : > { %v954_v63 = vpop.permute.xlu0 %953  ;;  %v2146_v0 = vpop.permute.xlu1 %955 }
 0x10e   : > { %v966_v2 = vsel %vm961_vm3, %v952_v56, %v954_v63  ;;  %v967_v3 = vsel %vm961_vm3, %v954_v63, %v2146_v0  ;;  %v1184_v4 = vld [vmem:[#allocation3 + $0x190] sm:$0xff]  ;;  %v1183_v5 = vld [vmem:[#allocation3 + $0x188] sm:$0xff] }
 0x10f   : > { %983 = vst [vmem:[#allocation3 + $0x1d0] sm:$0xf] %v966_v2  ;;  %984 = vst [vmem:[#allocation3 + $0x1d8] sm:$0xf] %v967_v3  ;;  %1326 = vmatprep.subr.bf16.mxu0 %v1184_v4 }
 0x110   : > { %1327 = vmatpush1.bf16.msra.mxu0 %v1183_v5 }
 0x111   : > { %v1023_v25 = vpop.permute.xlu0 %1022  ;;  %v1025_v8 = vpop.permute.xlu1 %1024 }
 0x112   : > { %v1037_v9 = vsel %vm1034_vm4, %v2084_v32, %v1023_v25  ;;  %v1038_v10 = vsel %vm1034_vm4, %v1023_v25, %v1025_v8  ;;  %v1191_v54 = vld [vmem:[#allocation3 + $0x1c8] sm:$0xff]  ;;  %v1190_v11 = vld [vmem:[#allocation3 + $0x1c0] sm:$0xff] }
 0x113   : > { %1054 = vst [vmem:[#allocation3 + $0x208] sm:$0xf] %v1037_v9  ;;  %1055 = vst [vmem:[#allocation3 + $0x210] sm:$0xf] %v1038_v10  ;;  %1287 = vmatprep.subr.bf16.mxu1 %v1191_v54 }
 0x114   : > { %1288 = vmatpush1.bf16.msra.mxu1 %v1190_v11 }
 0x115   : > { %v1027_v12 = vpop.permute.xlu0 %1026  ;;  %v2154_v13 = vpop.permute.xlu1 %1028 }
 0x116   : > { %v1039_v15 = vsel %vm1034_vm4, %v1025_v8, %v1027_v12  ;;  %v1040_v16 = vsel %vm1034_vm4, %v1027_v12, %v2154_v13  ;;  %v1193_v17 = vld [vmem:[#allocation3 + $0x1d8] sm:$0xff]  ;;  %v1192_v18 = vld [vmem:[#allocation3 + $0x1d0] sm:$0xff] }
 0x117   : > { %1056 = vst [vmem:[#allocation3 + $0x218] sm:$0xf] %v1039_v15  ;;  %1057 = vst [vmem:[#allocation3 + $0x220] sm:$0xf] %v1040_v16  ;;  %1328 = vmatprep.subr.bf16.mxu0 %v1193_v17  ;;  %v1177_v17 = vld [vmem:[#allocation3 + $0x158] sm:$0xff] }
 0x118   : > { %1329 = vmatpush1.bf16.msra.mxu0 %v1192_v18 }
 0x119   : > { %v1096_v32 = vpop.permute.xlu0 %1095  ;;  %v1098_v20 = vpop.permute.xlu1 %1097 }
 0x11a   : > { %v1110_v21 = vsel %vm1107_vm5, %v2095_v44, %v1096_v32  ;;  %v1111_v23 = vsel %vm1107_vm5, %v1096_v32, %v1098_v20  ;;  %v1200_v22 = vld [vmem:[#allocation3 + $0x210] sm:$0xff]  ;;  %v1199_v60 = vld [vmem:[#allocation3 + $0x208] sm:$0xff] }
 0x11b   : > { %1127 = vst [vmem:[#allocation3 + $0x250] sm:$0xf] %v1110_v21  ;;  %1128 = vst [vmem:[#allocation3 + $0x258] sm:$0xf] %v1111_v23  ;;  %1289 = vmatprep.subr.bf16.mxu1 %v1200_v22  ;;  %v1178_v21 = vld [vmem:[#allocation3 + $0x160] sm:$0xff] }
 0x11c   : > { %1290 = vmatpush1.bf16.msra.mxu1 %v1199_v60 }
 0x11d   : > { %v1100_v24 = vpop.permute.xlu0 %1099  ;;  %v2162_v26 = vpop.permute.xlu1 %1101 }
 0x11e   : > { %v1112_v27 = vsel %vm1107_vm5, %v1098_v20, %v1100_v24  ;;  %v1113_v28 = vsel %vm1107_vm5, %v1100_v24, %v2162_v26  ;;  %v1202_v29 = vld [vmem:[#allocation3 + $0x220] sm:$0xff]  ;;  %v1201_v30 = vld [vmem:[#allocation3 + $0x218] sm:$0xff] }
 0x11f   : > { %1129 = vst [vmem:[#allocation3 + $0x260] sm:$0xf] %v1112_v27  ;;  %1130 = vst [vmem:[#allocation3 + $0x268] sm:$0xf] %v1113_v28  ;;  %1330 = vmatprep.subr.bf16.mxu0 %v1202_v29 }
 0x120   : > { %1331 = vmatpush1.bf16.msra.mxu0 %v1201_v30 }
 0x121   : > { %v534_v44 = vpop.permute.xlu0 %533  ;;  %v536_v33 = vpop.permute.xlu1 %535 }
 0x122   : > { %v546_v35 = vsel %vm539_vm14, %v2103_v57, %v534_v44  ;;  %v547_v36 = vsel %vm539_vm14, %v534_v44, %v536_v33  ;;  %v1209_v34 = vld [vmem:[#allocation3 + $0x258] sm:$0xff]  ;;  %v1208_v7 = vld [vmem:[#allocation3 + $0x250] sm:$0xff] }
 0x123   : > { %564 = vst [vmem:[#allocation3 + $0x30] sm:$0xf] %v546_v35  ;;  %565 = vst [vmem:[#allocation3 + $0x38] sm:$0xf] %v547_v36  ;;  %1291 = vmatprep.subr.bf16.mxu1 %v1209_v34 }
 0x124   : > { %1292 = vmatpush1.bf16.msra.mxu1 %v1208_v7 }
 0x125   : > { %v538_v37 = vpop.permute.xlu0 %537  ;;  %v612_v38 = vpop.permute.xlu1 %611 }
 0x126   : > { %v548_v39 = vsel %vm539_vm14, %v536_v33, %v538_v37  ;;  %v624_v42 = vsel %vm617_vm15, %v2111_v6, %v612_v38  ;;  %v1211_v43 = vld [vmem:[#allocation3 + $0x268] sm:$0xff]  ;;  %v1210_v45 = vld [vmem:[#allocation3 + $0x260] sm:$0xff] }
 0x127   : > { %566 = vst.msk [vmem:[#allocation3 + $0x40] sm:$0xf] %vm487_vm11, %v548_v39  ;;  %642 = vst [vmem:[#allocation3 + $0x78] sm:$0xf] %v624_v42  ;;  %1332 = vmatprep.subr.bf16.mxu0 %v1211_v43  ;;  %1308 = vmatmul.mubr.bf16.vlgmr.msra.gmra.mrb[0].mxu1 %v1968_v40 }
 0x128   : > { %1333 = vmatpush1.bf16.msra.mxu0 %v1210_v45  ;;  %1626 = vmatprep.mubr.msk.bf16.mxu1 %vm1230_vm13, %v1972_v41 }
 0x129   : > { %v614_v57 = vpop.permute.xlu0 %613  ;;  %v616_v46 = vpop.permute.xlu1 %615  ;;  %1398 = vmatprep.subr.bf16.mxu0 %v1689_v1 }
 0x12a   : > { %v625_v48 = vsel %vm617_vm15, %v612_v38, %v614_v57  ;;  %v626_v6 = vsel %vm617_vm15, %v614_v57, %v616_v46  ;;  %v1141_v49 = vld [vmem:[#allocation3 + $0x38] sm:$0xff]  ;;  %v1140_v50 = vld [vmem:[#allocation3 + $0x30] sm:$0xff] }
 0x12b   : > { %643 = vst [vmem:[#allocation3 + $0x80] sm:$0xf] %v625_v48  ;;  %644 = vst.msk [vmem:[#allocation3 + $0x88] sm:$0xf] %vm487_vm11, %v626_v6  ;;  %1357 = vmatprep.subr.bf16.mxu1 %v1141_v49  ;;  %1349 = vmatmul.mubr.bf16.vlgmr.msra.gmra.mrb[4].mxu0 %v1968_v40 }
 0x12c   : > { %1358 = vmatpush1.bf16.msra.mxu1 %v1140_v50  ;;  %1627 = vmatprep.mubr.msk.bf16.mxu0 %vm1230_vm13, %v1972_v41 }
 0x12d   : > { %v690_v14 = vpop.permute.xlu0 %689  ;;  %v692_v52 = vpop.permute.xlu1 %691 }
 0x12e   : > { %v702_v53 = vsel %vm695_vm0, %v2122_v19, %v690_v14  ;;  %v703_v55 = vsel %vm695_vm0, %v690_v14, %v692_v52  ;;  %v1142_v56 = vld [vmem:[#allocation3 + $0x40] sm:$0xff]  ;;  %v1149_v19 = vld [vmem:[#allocation3 + $0x78] sm:$0xff] }
 0x12f   : > { %720 = vst [vmem:[#allocation3 + $0xc0] sm:$0xf] %v702_v53  ;;  %721 = vst [vmem:[#allocation3 + $0xc8] sm:$0xf] %v703_v55  ;;  %1399 = vmatpush1.bf16.msra.mxu0 %v1142_v56 }
 0x130   : > { %1400 = vmatprep.subr.bf16.mxu0 %v1689_v1 }
 0x131   : > { %v694_v58 = vpop.permute.xlu0 %693 }
 0x132   : > { %v704_v51 = vsel %vm695_vm0, %v692_v52, %v694_v58  ;;  %v768_v59 = vpop.permute.xlu1 %767  ;;  %v1150_v61 = vld [vmem:[#allocation3 + $0x80] sm:$0xff]  ;;  %v1151_v62 = vld [vmem:[#allocation3 + $0x88] sm:$0xff] }
 0x133   : > { %722 = vst.msk [vmem:[#allocation3 + $0xd0] sm:$0xf] %vm487_vm11, %v704_v51  ;;  %v780_v41 = vsel %vm773_vm1, %v2130_v31, %v768_v59  ;;  %1359 = vmatprep.subr.bf16.mxu1 %v1150_v61  ;;  %1401 = vmatpush1.bf16.msra.mxu0 %v1151_v62 }
 0x134   : > { %798 = vst [vmem:[#allocation3 + $0x108] sm:$0xf] %v780_v41  ;;  %1360 = vmatpush1.bf16.msra.mxu1 %v1149_v19  ;;  %1402 = vmatprep.subr.bf16.mxu0 %v1689_v1 }
 0x135   : > { %v770_v63 = vpop.permute.xlu0 %769 }
 0x136   : > { %v781_v2 = vsel %vm773_vm1, %v768_v59, %v770_v63  ;;  %v772_v3 = vpop.permute.xlu1 %771  ;;  %v1159_v4 = vld [vmem:[#allocation3 + $0xc8] sm:$0xff]  ;;  %v1158_v5 = vld [vmem:[#allocation3 + $0xc0] sm:$0xff] }
 0x137   : > { %799 = vst [vmem:[#allocation3 + $0x110] sm:$0xf] %v781_v2  ;;  %v782_v25 = vsel %vm773_vm1, %v770_v63, %v772_v3  ;;  %1361 = vmatprep.subr.bf16.mxu1 %v1159_v4 }
 0x138   : > { %800 = vst.msk [vmem:[#allocation3 + $0x118] sm:$0xf] %vm487_vm11, %v782_v25  ;;  %1362 = vmatpush1.bf16.msra.mxu1 %v1158_v5 }
 0x139   : > { %v885_v31 = vpop.permute.xlu0 %884 }
 0x13a   : > { %v895_v8 = vsel %vm888_vm2, %v2138_v47, %v885_v31  ;;  %v1160_v9 = vld [vmem:[#allocation3 + $0xd0] sm:$0xff]  ;;  %v887_v10 = vpop.permute.xlu1 %886 }
 0x13b   : > { %912 = vst [vmem:[#allocation3 + $0x198] sm:$0xf] %v895_v8  ;;  %1403 = vmatpush1.bf16.msra.mxu0 %v1160_v9  ;;  %v896_v54 = vsel %vm888_vm2, %v885_v31, %v887_v10  ;;  %914 = vst.msk [vmem:[#allocation3 + $0x1a8] sm:$0xf] %vm487_vm11, %v887_v10  ;;  %v1167_v18 = vld [vmem:[#allocation3 + $0x108] sm:$0xff] }
 0x13c   : > { %913 = vst [vmem:[#allocation3 + $0x1a0] sm:$0xf] %v896_v54  ;;  %1404 = vmatprep.subr.bf16.mxu0 %v1689_v1 }
 0x13d   : > { %v958_v11 = vpop.permute.xlu0 %957 }
 0x13e   : > { %v968_v12 = vsel %vm961_vm3, %v2146_v0, %v958_v11  ;;  %v1168_v15 = vld [vmem:[#allocation3 + $0x110] sm:$0xff]  ;;  %v960_v16 = vpop.permute.xlu1 %959 }
 0x13f   : > { %985 = vst [vmem:[#allocation3 + $0x1e0] sm:$0xf] %v968_v12  ;;  %1363 = vmatprep.subr.bf16.mxu1 %v1168_v15  ;;  %v1169_v47 = vld [vmem:[#allocation3 + $0x118] sm:$0xff]  ;;  %v969_v32 = vsel %vm961_vm3, %v958_v11, %v960_v16  ;;  %987 = vst.msk [vmem:[#allocation3 + $0x1f0] sm:$0xf] %vm487_vm11, %v960_v16  ;;  %v1176_v0 = vld [vmem:[#allocation3 + $0x150] sm:$0xff] }
 0x140   : > { %1405 = vmatpush1.bf16.msra.mxu0 %v1169_v47  ;;  %1364 = vmatpush1.bf16.msra.mxu1 %v1167_v18  ;;  %986 = vst [vmem:[#allocation3 + $0x1e8] sm:$0xf] %v969_v32 }
 0x141   : > { %v1031_v20 = vpop.permute.xlu0 %1030  ;;  %1406 = vmatprep.subr.bf16.mxu0 %v1689_v1  ;;  %1365 = vmatprep.subr.bf16.mxu1 %v1177_v17 }
 0x142   : > { %v1041_v23 = vsel %vm1034_vm4, %v2154_v13, %v1031_v20  ;;  %v1033_v22 = vpop.permute.xlu1 %1032  ;;  %v1187_v28 = vld [vmem:[#allocation3 + $0x1a8] sm:$0xff]  ;;  %v1185_v13 = vld [vmem:[#allocation3 + $0x198] sm:$0xff] }
 0x143   : > { %1058 = vst [vmem:[#allocation3 + $0x228] sm:$0xf] %v1041_v23  ;;  %v1042_v60 = vsel %vm1034_vm4, %v1031_v20, %v1033_v22  ;;  %1060 = vst.msk [vmem:[#allocation3 + $0x238] sm:$0xf] %vm487_vm11, %v1033_v22  ;;  %v1186_v24 = vld [vmem:[#allocation3 + $0x1a0] sm:$0xff] }
 0x144   : > { %1407 = vmatpush1.bf16.msra.mxu0 %v1178_v21  ;;  %1366 = vmatpush1.bf16.msra.mxu1 %v1176_v0  ;;  %1059 = vst [vmem:[#allocation3 + $0x230] sm:$0xf] %v1042_v60 }
 0x145   : > { %v1104_v27 = vpop.permute.xlu0 %1103  ;;  %1408 = vmatprep.subr.bf16.mxu0 %v1689_v1  ;;  %1367 = vmatprep.subr.bf16.mxu1 %v1186_v24 }
 0x146   : > { %v1114_v29 = vsel %vm1107_vm5, %v2162_v26, %v1104_v27  ;;  %v1106_v30 = vpop.permute.xlu1 %1105  ;;  %v1196_v35 = vld [vmem:[#allocation3 + $0x1f0] sm:$0xff]  ;;  %v1194_v36 = vld [vmem:[#allocation3 + $0x1e0] sm:$0xff] }
 0x147   : > { %1131 = vst [vmem:[#allocation3 + $0x270] sm:$0xf] %v1114_v29  ;;  %v1115_v44 = vsel %vm1107_vm5, %v1104_v27, %v1106_v30  ;;  %1133 = vst.msk [vmem:[#allocation3 + $0x280] sm:$0xf] %vm487_vm11, %v1106_v30  ;;  %v1195_v33 = vld [vmem:[#allocation3 + $0x1e8] sm:$0xff] }
 0x148   : > { %1409 = vmatpush1.bf16.msra.mxu0 %v1187_v28  ;;  %1368 = vmatpush1.bf16.msra.mxu1 %v1185_v13  ;;  %1132 = vst [vmem:[#allocation3 + $0x278] sm:$0xf] %v1115_v44 }
 0x149   : > { %1410 = vmatprep.subr.bf16.mxu0 %v1689_v1  ;;  %1369 = vmatprep.subr.bf16.mxu1 %v1195_v33 }
 0x14a   : > { %v1205_v26 = vld [vmem:[#allocation3 + $0x238] sm:$0xff]  ;;  %v1203_v7 = vld [vmem:[#allocation3 + $0x228] sm:$0xff] }
 0x14b   : > { %v1204_v34 = vld [vmem:[#allocation3 + $0x230] sm:$0xff] }
 0x14c   : > { %1411 = vmatpush1.bf16.msra.mxu0 %v1196_v35  ;;  %1370 = vmatpush1.bf16.msra.mxu1 %v1194_v36 }
 0x14d   : > { %1412 = vmatprep.subr.bf16.mxu0 %v1689_v1  ;;  %1371 = vmatprep.subr.bf16.mxu1 %v1204_v34 }
 0x14e   : > { %v1214_v38 = vld [vmem:[#allocation3 + $0x280] sm:$0xff]  ;;  %v1212_v39 = vld [vmem:[#allocation3 + $0x270] sm:$0xff] }
 0x14f   : > { %v1213_v37 = vld [vmem:[#allocation3 + $0x278] sm:$0xff] }
 0x150   : > { %1413 = vmatpush1.bf16.msra.mxu0 %v1205_v26  ;;  %1372 = vmatpush1.bf16.msra.mxu1 %v1203_v7 }
 0x151   : > { %1414 = vmatprep.subr.bf16.mxu0 %v1689_v1  ;;  %1373 = vmatprep.subr.bf16.mxu1 %v1213_v37 }
 0x154   : > { %1415 = vmatpush1.bf16.msra.mxu0 %v1214_v38  ;;  %1374 = vmatpush1.bf16.msra.mxu1 %v1212_v39 }
 0x156   : > { %v1218_v42 = vpop.permute.xlu0 %1217 }
 0x157   : > { %1390 = vmatmul.mubr.bf16.vlgmr.msra.gmra.mrb[4].mxu1 %v1968_v40  ;;  %1431 = vmatmul.mubr.bf16.vlgmr.msra.gmra.mrb[8].mxu0 %v1968_v40  ;;  %v1442_v45 = vpop.permute.xlu1 %1441 }
 0x1c1   : > { %v1268_v43 = vpop.f32.mrb[0].mxu0 }
 0x1c2   : > { %v1270_v57 = vpop.f32.mrb[1].mxu0  ;;  %v1269_v46 = vadd.f32 %v1268_v43, %v1218_v42 }
 0x1c3   : > { %v1272_v48 = vpop.f32.mrb[2].mxu0  ;;  %v1271_v6 = vadd.f32 %v1270_v57, %v1218_v42 }
 0x1c4   : > { %v1273_v49 = vpop.f32.mrb[3].mxu0  ;;  %v1444_v50 = vadd.f32 %v1442_v45, %v1269_v46 }
 0x1c5   : > { %v1445_v1 = vadd.f32 %v1442_v45, %v1271_v6 }
 0x1c7   : > { %v1461_v14 = vcombine.low %v1444_v50, %v1445_v1 }
 0x1c9   : > { %1469 = vst [vmem:[%s2225_s12] sm:$0x77] %v1461_v14 }
 0x1fa   : > { %v1309_v40 = vpop.f32.mrb[0].mxu1 }
 0x1fb   : > { %v1310_v52 = vadd.f32 %v1309_v40, %v1218_v42  ;;  %v1311_v53 = vpop.f32.mrb[1].mxu1 }
 0x1fc   : > { %v1312_v55 = vadd.f32 %v1311_v53, %v1218_v42  ;;  %v1313_v56 = vpop.f32.mrb[2].mxu1 }
 0x1fd   : > { %v1446_v58 = vadd.f32 %v1442_v45, %v1310_v52  ;;  %v1314_v51 = vpop.f32.mrb[3].mxu1 }
 0x1fe   : > { %v1447_v59 = vadd.f32 %v1442_v45, %v1312_v55  ;;  %v1350_v61 = vpop.f32.mrb[4].mxu0 }
 0x1ff   : > { %v1351_v62 = vadd.f32 %v1350_v61, %v1218_v42  ;;  %v1352_v41 = vpop.f32.mrb[5].mxu0 }
 0x200   : > { %v1462_v19 = vcombine.low %v1446_v58, %v1447_v59  ;;  %v1353_v63 = vadd.f32 %v1352_v41, %v1218_v42  ;;  %v1354_v2 = vpop.f32.mrb[6].mxu0 }
 0x201   : > { %v1448_v3 = vadd.f32 %v1442_v45, %v1351_v62  ;;  %v1355_v4 = vpop.f32.mrb[7].mxu0 }
 0x202   : > { %1470 = vst [vmem:[%s2225_s12 + $0x8] sm:$0x77] %v1462_v19  ;;  %v1449_v5 = vadd.f32 %v1442_v45, %v1353_v63 }
 0x204   : > { %v1463_v25 = vcombine.low %v1448_v3, %v1449_v5 }
 0x206   : > { %1471 = vst [vmem:[%s2225_s12 + $0x10] sm:$0x77] %v1463_v25 }
 0x22a   : > { %v1391_v31 = vpop.f32.mrb[4].mxu1  ;;  %v1432_v8 = vpop.f32.mrb[8].mxu0 }
 0x22b   : > { %v1392_v9 = vadd.f32 %v1391_v31, %v1218_v42  ;;  %v1433_v10 = vadd.f32 %v1432_v8, %v1218_v42  ;;  %v1393_v54 = vpop.f32.mrb[5].mxu1  ;;  %v1434_v11 = vpop.f32.mrb[9].mxu0 }
 0x22c   : > { %v1394_v12 = vadd.f32 %v1393_v54, %v1218_v42  ;;  %v1395_v15 = vpop.f32.mrb[6].mxu1  ;;  %v1435_v16 = vpop.f32.mrb[10].mxu0 }
 0x22d   : > { %v1450_v17 = vadd.f32 %v1442_v45, %v1392_v9  ;;  %v1452_v47 = vadd.f32 %v1442_v45, %v1433_v10  ;;  %v1396_v18 = vpop.f32.mrb[7].mxu1  ;;  %v1436_v32 = vpop.f32.mrb[11].mxu0 }
 0x22e   : > { %v1451_v20 = vadd.f32 %v1442_v45, %v1394_v12 }
 0x22f   : > { %1474 = vst.msk [vmem:[%s2225_s12 + $0x20] sm:$0x7] %vm1473_vm6, %v1452_v47 }
 0x230   : > { %v1464_v21 = vcombine.low %v1450_v17, %v1451_v20 }
 0x232   : > { %1472 = vst [vmem:[%s2225_s12 + $0x18] sm:$0x77] %v1464_v21 }
 0x233 PF: > { %s14_s15 = sadd.s32 1, %s1687_s15  }
 0x234   : > { %p11_p4 = scmp.ge.s32.totalorder %s14_s15, 4  }
 0x236   :  { %13 = sbr.rel (!%p11_p4) target bundleno = 1 (0x1), region = 66 }

</bundles_post_ra>
